<compile_context>
chip_gen: v7x
topology: tpu7x:2x2x1
jax: 0.10.0
libtpu: 0.0.40
codegen_flags: <defaults>
</compile_context>

<pallas_src>
import math
import functools

import jax
import jax.numpy as jnp
from jax.experimental import pallas as pl
from jax.experimental.pallas import tpu as pltpu


# ----------------------------------------------------------------------------
# Single fused kernel: entire Transformer forward.
# ----------------------------------------------------------------------------
def _fused_transformer_kernel(wqkv_ref, gamma_ref, beta_ref,
                              nwqkv_ref, ngamma_ref, nbeta_ref,
                              eps_ref, out_ref, loss_ref,
                              *, B, T, C, H, NL, temp, ln_eps):
    BT = B * T
    HC = H * C

    def attn_block(x, wqkv, gamma, beta):
        """SelfAttention (+ identity FFN): LayerNorm(sum_h softmax(QK^T)V) + x."""
        # One fused QKV matmul on the MXU: bf16 inputs, f32 accumulation.
        qkv = jnp.dot(x.reshape(BT, C).astype(wqkv.dtype), wqkv,
                      preferred_element_type=jnp.float32)            # (BT, 3*H*C)
        qkv = qkv.reshape(B, T, 3 * HC)
        outp = jnp.zeros((B, T, C), jnp.float32)
        for h in range(H):                                           # static head loop
            # Per-head lane slices; batch handled by batched contractions
            # (no explicit k transpose).  1/sqrt(C) scale is folded into Wq.
            qh = qkv[:, :, h * C:(h + 1) * C]
            kh = qkv[:, :, HC + h * C:HC + (h + 1) * C]
            vh = qkv[:, :, 2 * HC + h * C:2 * HC + (h + 1) * C]
            s = jnp.einsum('bqd,bkd->bqk', qh, kh,
                           preferred_element_type=jnp.float32)       # (B, T, T)
            s = s - jnp.max(s, axis=-1, keepdims=True)
            p = jnp.exp(s)
            p = p * pl.reciprocal(jnp.sum(p, axis=-1, keepdims=True), approx=True)
            # sum(torch.split(attended, size, -1)) == sum over heads
            outp = outp + jnp.einsum('bqk,bkd->bqd', p, vh,
                                     preferred_element_type=jnp.float32)
        # LayerNorm(outp) + residual x (torch.nn.LayerNorm, eps=1e-5, biased var)
        mean = jnp.mean(outp, axis=-1, keepdims=True)
        cen = outp - mean
        var = jnp.mean(cen * cen, axis=-1, keepdims=True)
        normed = cen * jax.lax.rsqrt(var + ln_eps)
        return normed * gamma + beta + x

    noise_i = (1 + NL) // 2   # torch loop index at which NoiseInjection fires

    # RecurrentPositionalEmbedddings output is identically zero.
    x = jnp.zeros((B, T, C), jnp.float32)
    loss = jnp.zeros((), jnp.float32)

    for li in range(NL):      # static unroll over the NL attention layers
        if li == noise_i - 1:
            # NoiseInjection: two independent SelfAttention branches.
            mu = attn_block(x, nwqkv_ref[0], ngamma_ref[0], nbeta_ref[0])
            logvar = attn_block(x, nwqkv_ref[1], ngamma_ref[1], nbeta_ref[1])
            std = jnp.exp(0.5 * logvar)
            x = (1.0 - temp) * mu + temp * (mu + eps_ref[...] * std)
            kl = 1.0 + logvar - mu * mu - jnp.exp(logvar)
            loss = -0.5 * (jnp.sum(kl) * (1.0 / kl.size))
        if li == 0 and noise_i != 1:
            # First layer sees x == 0 exactly: SA(0) = LayerNorm(0)*g + b + 0 = b.
            # Skip the mathematically dead matmuls.
            x = jnp.broadcast_to(beta_ref[0], (B, T, C))
        else:
            x = attn_block(x, wqkv_ref[li], gamma_ref[li], beta_ref[li])

    out_ref[...] = jax.nn.sigmoid(x)
    loss_ref[0] = loss


# ----------------------------------------------------------------------------
# Wrapper: one pallas_call for the whole forward.
# ----------------------------------------------------------------------------
def transformer_forward(x, params, eps_noise, *, nheads, temp=1.0):
    """Forward of `Transformer`.  NOTE: the RPE layer zeroes the activation, so
    (faithfully to the PyTorch source) the output does not depend on `x`."""
    B, T, C = x.shape
    NL = params["wqkv"].shape[0]
    kernel = functools.partial(
        _fused_transformer_kernel,
        B=B, T=T, C=C, H=nheads, NL=NL, temp=float(temp), ln_eps=1e-5)
    out, loss = pl.pallas_call(
        kernel,
        out_shape=(jax.ShapeDtypeStruct((B, T, C), jnp.float32),
                   jax.ShapeDtypeStruct((1,), jnp.float32)),
        in_specs=[pl.BlockSpec(memory_space=pltpu.MemorySpace.VMEM)] * 7,
        out_specs=(pl.BlockSpec(memory_space=pltpu.MemorySpace.VMEM),
                   pl.BlockSpec(memory_space=pltpu.MemorySpace.SMEM)),
    )(params["wqkv"], params["gamma"], params["beta"],
      params["noise_wqkv"], params["noise_gamma"], params["noise_beta"],
      eps_noise)
    return out, loss


# ----------------------------------------------------------------------------
# Parameter construction (deterministic, synthetic), pre-stacked for the kernel.
# ----------------------------------------------------------------------------
def make_transformer_params(key, size, nheads, nlayers):
    C, H = size, nheads

    def make_stack(k, n):
        kw, kg, kb = jax.random.split(k, 3)
        bound = 1.0 / math.sqrt(C)
        w = jax.random.uniform(kw, (n, C, 3 * H * C), jnp.float32, -bound, bound)
        # Fold the attention score scale 1/sqrt(C) into the Q projection weights
        # (mathematically identical to scaling the (T,T) scores per head).
        w = w.at[:, :, :H * C].multiply(1.0 / math.sqrt(C))
        gamma = 1.0 + 0.05 * jax.random.normal(kg, (n, 1, C), jnp.float32)
        beta = 0.02 * jax.random.normal(kb, (n, 1, C), jnp.float32)
        # bf16 matmul inputs (MXU-native on v5e/v6e/v7x); accumulation and all
        # softmax/LayerNorm math stay f32 inside the kernel.
        return w.astype(jnp.bfloat16), gamma, beta

    k_lay, k_noise = jax.random.split(key)
    wqkv, gamma, beta = make_stack(k_lay, nlayers)
    nwqkv, ngamma, nbeta = make_stack(k_noise, 2)
    # NOTE: FFN and RPE parameters are dead in the forward pass (FFN returns its
    # input), so they are not materialized.
    return {"wqkv": wqkv, "gamma": gamma, "beta": beta,
            "noise_wqkv": nwqkv, "noise_gamma": ngamma, "noise_beta": nbeta}


# ----------------------------------------------------------------------------
if __name__ == "__main__":
    B, T = 2, 8          # batch, sequence
    SIZE = 32            # feature size (stand-in for 64*64*3)
    NHEADS = 4
    NLAYERS = 6

    root = jax.random.PRNGKey(0)
    k_params, k_x, k_eps = jax.random.split(root, 3)

    params = make_transformer_params(k_params, SIZE, NHEADS, NLAYERS)
    x = jax.random.normal(k_x, (B, T, SIZE), jnp.float32)
    # eps ~ N(0,1) replaces torch.randn_like inside NoiseInjection (deterministic).
    eps_noise = jax.random.normal(k_eps, (B, T, SIZE), jnp.float32)

    fwd = jax.jit(functools.partial(transformer_forward, nheads=NHEADS, temp=1.0))
    out, sampling_loss = fwd(x, params, eps_noise)
    jax.block_until_ready(out)
    jax.block_until_ready(sampling_loss)

    assert out.shape == (B, T, SIZE)
    assert sampling_loss.shape == (1,)
    assert bool(jnp.all(jnp.isfinite(out))) and bool(jnp.all(jnp.isfinite(sampling_loss)))
    print("KERNEL_OK")
</pallas_src>

<mosaic_0001>
module attributes {stable_mosaic.version = 11 : i64} {
  func.func @_fused_transformer_kernel(%arg0: memref<6x32x384xbf16, #tpu.memory_space<vmem>>, %arg1: memref<6x1x32xf32, #tpu.memory_space<vmem>>, %arg2: memref<6x1x32xf32, #tpu.memory_space<vmem>>, %arg3: memref<2x32x384xbf16, #tpu.memory_space<vmem>>, %arg4: memref<2x1x32xf32, #tpu.memory_space<vmem>>, %arg5: memref<2x1x32xf32, #tpu.memory_space<vmem>>, %arg6: memref<2x8x32xf32, #tpu.memory_space<vmem>>, %arg7: memref<2x8x32xf32, #tpu.memory_space<vmem>>, %arg8: memref<1xf32, #tpu.memory_space<smem>>) attributes {dimension_semantics = [], scalar_prefetch = 0 : i64, scratch_operands = 0 : i64, tpu.core_type = #tpu.core_type<tc>} {
    %c0 = arith.constant 0 : index
    %c0_0 = arith.constant 0 : index
    %c0_1 = arith.constant 0 : index
    %0 = vector.load %arg2[%c0, %c0_0, %c0_1] : memref<6x1x32xf32, #tpu.memory_space<vmem>>, vector<1x1x32xf32>
    %1 = vector.shape_cast %0 : vector<1x1x32xf32> to vector<1x32xf32>
    %2 = vector.shape_cast %1 : vector<1x32xf32> to vector<1x1x32xf32>
    %3 = vector.broadcast %2 : vector<1x1x32xf32> to vector<2x8x32xf32>
    %c1 = arith.constant 1 : index
    %c0_2 = arith.constant 0 : index
    %c0_3 = arith.constant 0 : index
    %4 = vector.load %arg0[%c1, %c0_2, %c0_3] : memref<6x32x384xbf16, #tpu.memory_space<vmem>>, vector<1x32x384xbf16>
    %5 = vector.shape_cast %4 : vector<1x32x384xbf16> to vector<32x384xbf16>
    %c1_4 = arith.constant 1 : index
    %c0_5 = arith.constant 0 : index
    %c0_6 = arith.constant 0 : index
    %6 = vector.load %arg1[%c1_4, %c0_5, %c0_6] : memref<6x1x32xf32, #tpu.memory_space<vmem>>, vector<1x1x32xf32>
    %7 = vector.shape_cast %6 : vector<1x1x32xf32> to vector<1x32xf32>
    %c1_7 = arith.constant 1 : index
    %c0_8 = arith.constant 0 : index
    %c0_9 = arith.constant 0 : index
    %8 = vector.load %arg2[%c1_7, %c0_8, %c0_9] : memref<6x1x32xf32, #tpu.memory_space<vmem>>, vector<1x1x32xf32>
    %9 = vector.shape_cast %8 : vector<1x1x32xf32> to vector<1x32xf32>
    %10 = vector.shape_cast %3 : vector<2x8x32xf32> to vector<16x32xf32>
    %11 = arith.truncf %10 : vector<16x32xf32> to vector<16x32xbf16>
    %cst = arith.constant dense<0.000000e+00> : vector<16x384xf32>
    %12 = tpu.matmul %11, %5, %cst {dimension_numbers = #tpu.dot_dimension_numbers<[1], [0], [0], [1], [0, 0, 1, 1], [], []>} : vector<16x32xbf16>, vector<32x384xbf16>, vector<16x384xf32> -> vector<16x384xf32>
    %13 = vector.shape_cast %12 : vector<16x384xf32> to vector<2x8x384xf32>
    %cst_10 = arith.constant 0.000000e+00 : f32
    %14 = vector.broadcast %cst_10 : f32 to vector<2x8x32xf32>
    %15 = vector.extract_strided_slice %13 {offsets = [0, 0, 0], sizes = [2, 8, 32], strides = [1, 1, 1]} : vector<2x8x384xf32> to vector<2x8x32xf32>
    %16 = vector.extract_strided_slice %13 {offsets = [0, 0, 128], sizes = [2, 8, 32], strides = [1, 1, 1]} : vector<2x8x384xf32> to vector<2x8x32xf32>
    %17 = vector.extract_strided_slice %13 {offsets = [0, 0, 256], sizes = [2, 8, 32], strides = [1, 1, 1]} : vector<2x8x384xf32> to vector<2x8x32xf32>
    "tpu.trace_start"() <{level = 10 : i32, message = "bqd,bkd->bqk"}> : () -> ()
    %cst_11 = arith.constant dense<0.000000e+00> : vector<2x8x8xf32>
    %18 = tpu.matmul %15, %16, %cst_11 {dimension_numbers = #tpu.dot_dimension_numbers<[2], [2], [1], [1], [0, 0, 0, 1, 1, 1], [0], [0]>} : vector<2x8x32xf32>, vector<2x8x32xf32>, vector<2x8x8xf32> -> vector<2x8x8xf32>
    "tpu.trace_stop"() : () -> ()
    %cst_12 = arith.constant dense<0xFF800000> : vector<2x8xf32>
    %19 = vector.multi_reduction <maximumf>, %18, %cst_12 [2] : vector<2x8x8xf32> to vector<2x8xf32>
    %20 = vector.shape_cast %19 : vector<2x8xf32> to vector<2x8x1xf32>
    %21 = vector.broadcast %20 : vector<2x8x1xf32> to vector<2x8x8xf32>
    %22 = arith.subf %18, %21 : vector<2x8x8xf32>
    %23 = math.exp %22 : vector<2x8x8xf32>
    %cst_13 = arith.constant dense<0.000000e+00> : vector<2x8xf32>
    %24 = vector.multi_reduction <add>, %23, %cst_13 [2] : vector<2x8x8xf32> to vector<2x8xf32>
    %25 = vector.shape_cast %24 : vector<2x8xf32> to vector<2x8x1xf32>
    %26 = tpu.reciprocal %25 {approx = true} : vector<2x8x1xf32> -> vector<2x8x1xf32>
    %27 = vector.broadcast %26 : vector<2x8x1xf32> to vector<2x8x8xf32>
    %28 = arith.mulf %23, %27 : vector<2x8x8xf32>
    "tpu.trace_start"() <{level = 10 : i32, message = "bqk,bkd->bqd"}> : () -> ()
    %cst_14 = arith.constant dense<0.000000e+00> : vector<2x8x32xf32>
    %29 = tpu.matmul %28, %17, %cst_14 {dimension_numbers = #tpu.dot_dimension_numbers<[2], [1], [1], [2], [0, 0, 0, 1, 1, 2], [0], [0]>} : vector<2x8x8xf32>, vector<2x8x32xf32>, vector<2x8x32xf32> -> vector<2x8x32xf32>
    "tpu.trace_stop"() : () -> ()
    %30 = arith.addf %14, %29 : vector<2x8x32xf32>
    %31 = vector.extract_strided_slice %13 {offsets = [0, 0, 32], sizes = [2, 8, 32], strides = [1, 1, 1]} : vector<2x8x384xf32> to vector<2x8x32xf32>
    %32 = vector.extract_strided_slice %13 {offsets = [0, 0, 160], sizes = [2, 8, 32], strides = [1, 1, 1]} : vector<2x8x384xf32> to vector<2x8x32xf32>
    %33 = vector.extract_strided_slice %13 {offsets = [0, 0, 288], sizes = [2, 8, 32], strides = [1, 1, 1]} : vector<2x8x384xf32> to vector<2x8x32xf32>
    "tpu.trace_start"() <{level = 10 : i32, message = "bqd,bkd->bqk"}> : () -> ()
    %cst_15 = arith.constant dense<0.000000e+00> : vector<2x8x8xf32>
    %34 = tpu.matmul %31, %32, %cst_15 {dimension_numbers = #tpu.dot_dimension_numbers<[2], [2], [1], [1], [0, 0, 0, 1, 1, 1], [0], [0]>} : vector<2x8x32xf32>, vector<2x8x32xf32>, vector<2x8x8xf32> -> vector<2x8x8xf32>
    "tpu.trace_stop"() : () -> ()
    %cst_16 = arith.constant dense<0xFF800000> : vector<2x8xf32>
    %35 = vector.multi_reduction <maximumf>, %34, %cst_16 [2] : vector<2x8x8xf32> to vector<2x8xf32>
    %36 = vector.shape_cast %35 : vector<2x8xf32> to vector<2x8x1xf32>
    %37 = vector.broadcast %36 : vector<2x8x1xf32> to vector<2x8x8xf32>
    %38 = arith.subf %34, %37 : vector<2x8x8xf32>
    %39 = math.exp %38 : vector<2x8x8xf32>
    %cst_17 = arith.constant dense<0.000000e+00> : vector<2x8xf32>
    %40 = vector.multi_reduction <add>, %39, %cst_17 [2] : vector<2x8x8xf32> to vector<2x8xf32>
    %41 = vector.shape_cast %40 : vector<2x8xf32> to vector<2x8x1xf32>
    %42 = tpu.reciprocal %41 {approx = true} : vector<2x8x1xf32> -> vector<2x8x1xf32>
    %43 = vector.broadcast %42 : vector<2x8x1xf32> to vector<2x8x8xf32>
    %44 = arith.mulf %39, %43 : vector<2x8x8xf32>
    "tpu.trace_start"() <{level = 10 : i32, message = "bqk,bkd->bqd"}> : () -> ()
    %cst_18 = arith.constant dense<0.000000e+00> : vector<2x8x32xf32>
    %45 = tpu.matmul %44, %33, %cst_18 {dimension_numbers = #tpu.dot_dimension_numbers<[2], [1], [1], [2], [0, 0, 0, 1, 1, 2], [0], [0]>} : vector<2x8x8xf32>, vector<2x8x32xf32>, vector<2x8x32xf32> -> vector<2x8x32xf32>
    "tpu.trace_stop"() : () -> ()
    %46 = arith.addf %30, %45 : vector<2x8x32xf32>
    %47 = vector.extract_strided_slice %13 {offsets = [0, 0, 64], sizes = [2, 8, 32], strides = [1, 1, 1]} : vector<2x8x384xf32> to vector<2x8x32xf32>
    %48 = vector.extract_strided_slice %13 {offsets = [0, 0, 192], sizes = [2, 8, 32], strides = [1, 1, 1]} : vector<2x8x384xf32> to vector<2x8x32xf32>
    %49 = vector.extract_strided_slice %13 {offsets = [0, 0, 320], sizes = [2, 8, 32], strides = [1, 1, 1]} : vector<2x8x384xf32> to vector<2x8x32xf32>
    "tpu.trace_start"() <{level = 10 : i32, message = "bqd,bkd->bqk"}> : () -> ()
    %cst_19 = arith.constant dense<0.000000e+00> : vector<2x8x8xf32>
    %50 = tpu.matmul %47, %48, %cst_19 {dimension_numbers = #tpu.dot_dimension_numbers<[2], [2], [1], [1], [0, 0, 0, 1, 1, 1], [0], [0]>} : vector<2x8x32xf32>, vector<2x8x32xf32>, vector<2x8x8xf32> -> vector<2x8x8xf32>
    "tpu.trace_stop"() : () -> ()
    %cst_20 = arith.constant dense<0xFF800000> : vector<2x8xf32>
    %51 = vector.multi_reduction <maximumf>, %50, %cst_20 [2] : vector<2x8x8xf32> to vector<2x8xf32>
    %52 = vector.shape_cast %51 : vector<2x8xf32> to vector<2x8x1xf32>
    %53 = vector.broadcast %52 : vector<2x8x1xf32> to vector<2x8x8xf32>
    %54 = arith.subf %50, %53 : vector<2x8x8xf32>
    %55 = math.exp %54 : vector<2x8x8xf32>
    %cst_21 = arith.constant dense<0.000000e+00> : vector<2x8xf32>
    %56 = vector.multi_reduction <add>, %55, %cst_21 [2] : vector<2x8x8xf32> to vector<2x8xf32>
    %57 = vector.shape_cast %56 : vector<2x8xf32> to vector<2x8x1xf32>
    %58 = tpu.reciprocal %57 {approx = true} : vector<2x8x1xf32> -> vector<2x8x1xf32>
    %59 = vector.broadcast %58 : vector<2x8x1xf32> to vector<2x8x8xf32>
    %60 = arith.mulf %55, %59 : vector<2x8x8xf32>
    "tpu.trace_start"() <{level = 10 : i32, message = "bqk,bkd->bqd"}> : () -> ()
    %cst_22 = arith.constant dense<0.000000e+00> : vector<2x8x32xf32>
    %61 = tpu.matmul %60, %49, %cst_22 {dimension_numbers = #tpu.dot_dimension_numbers<[2], [1], [1], [2], [0, 0, 0, 1, 1, 2], [0], [0]>} : vector<2x8x8xf32>, vector<2x8x32xf32>, vector<2x8x32xf32> -> vector<2x8x32xf32>
    "tpu.trace_stop"() : () -> ()
    %62 = arith.addf %46, %61 : vector<2x8x32xf32>
    %63 = vector.extract_strided_slice %13 {offsets = [0, 0, 96], sizes = [2, 8, 32], strides = [1, 1, 1]} : vector<2x8x384xf32> to vector<2x8x32xf32>
    %64 = vector.extract_strided_slice %13 {offsets = [0, 0, 224], sizes = [2, 8, 32], strides = [1, 1, 1]} : vector<2x8x384xf32> to vector<2x8x32xf32>
    %65 = vector.extract_strided_slice %13 {offsets = [0, 0, 352], sizes = [2, 8, 32], strides = [1, 1, 1]} : vector<2x8x384xf32> to vector<2x8x32xf32>
    "tpu.trace_start"() <{level = 10 : i32, message = "bqd,bkd->bqk"}> : () -> ()
    %cst_23 = arith.constant dense<0.000000e+00> : vector<2x8x8xf32>
    %66 = tpu.matmul %63, %64, %cst_23 {dimension_numbers = #tpu.dot_dimension_numbers<[2], [2], [1], [1], [0, 0, 0, 1, 1, 1], [0], [0]>} : vector<2x8x32xf32>, vector<2x8x32xf32>, vector<2x8x8xf32> -> vector<2x8x8xf32>
    "tpu.trace_stop"() : () -> ()
    %cst_24 = arith.constant dense<0xFF800000> : vector<2x8xf32>
    %67 = vector.multi_reduction <maximumf>, %66, %cst_24 [2] : vector<2x8x8xf32> to vector<2x8xf32>
    %68 = vector.shape_cast %67 : vector<2x8xf32> to vector<2x8x1xf32>
    %69 = vector.broadcast %68 : vector<2x8x1xf32> to vector<2x8x8xf32>
    %70 = arith.subf %66, %69 : vector<2x8x8xf32>
    %71 = math.exp %70 : vector<2x8x8xf32>
    %cst_25 = arith.constant dense<0.000000e+00> : vector<2x8xf32>
    %72 = vector.multi_reduction <add>, %71, %cst_25 [2] : vector<2x8x8xf32> to vector<2x8xf32>
    %73 = vector.shape_cast %72 : vector<2x8xf32> to vector<2x8x1xf32>
    %74 = tpu.reciprocal %73 {approx = true} : vector<2x8x1xf32> -> vector<2x8x1xf32>
    %75 = vector.broadcast %74 : vector<2x8x1xf32> to vector<2x8x8xf32>
    %76 = arith.mulf %71, %75 : vector<2x8x8xf32>
    "tpu.trace_start"() <{level = 10 : i32, message = "bqk,bkd->bqd"}> : () -> ()
    %cst_26 = arith.constant dense<0.000000e+00> : vector<2x8x32xf32>
    %77 = tpu.matmul %76, %65, %cst_26 {dimension_numbers = #tpu.dot_dimension_numbers<[2], [1], [1], [2], [0, 0, 0, 1, 1, 2], [0], [0]>} : vector<2x8x8xf32>, vector<2x8x32xf32>, vector<2x8x32xf32> -> vector<2x8x32xf32>
    "tpu.trace_stop"() : () -> ()
    %78 = arith.addf %62, %77 : vector<2x8x32xf32>
    %cst_27 = arith.constant dense<0.000000e+00> : vector<2x8xf32>
    %79 = vector.multi_reduction <add>, %78, %cst_27 [2] : vector<2x8x32xf32> to vector<2x8xf32>
    %80 = vector.shape_cast %79 : vector<2x8xf32> to vector<2x8x1xf32>
    %cst_28 = arith.constant 3.200000e+01 : f32
    %81 = vector.broadcast %cst_28 : f32 to vector<2x8x1xf32>
    %82 = arith.divf %80, %81 : vector<2x8x1xf32>
    %83 = vector.broadcast %82 : vector<2x8x1xf32> to vector<2x8x32xf32>
    %84 = arith.subf %78, %83 : vector<2x8x32xf32>
    %85 = arith.mulf %84, %84 : vector<2x8x32xf32>
    %cst_29 = arith.constant dense<0.000000e+00> : vector<2x8xf32>
    %86 = vector.multi_reduction <add>, %85, %cst_29 [2] : vector<2x8x32xf32> to vector<2x8xf32>
    %87 = vector.shape_cast %86 : vector<2x8xf32> to vector<2x8x1xf32>
    %cst_30 = arith.constant 3.200000e+01 : f32
    %88 = vector.broadcast %cst_30 : f32 to vector<2x8x1xf32>
    %89 = arith.divf %87, %88 : vector<2x8x1xf32>
    %cst_31 = arith.constant 9.99999974E-6 : f32
    %90 = vector.broadcast %cst_31 : f32 to vector<2x8x1xf32>
    %91 = arith.addf %89, %90 : vector<2x8x1xf32>
    %92 = math.rsqrt %91 : vector<2x8x1xf32>
    %93 = vector.broadcast %92 : vector<2x8x1xf32> to vector<2x8x32xf32>
    %94 = arith.mulf %84, %93 : vector<2x8x32xf32>
    %95 = vector.shape_cast %7 : vector<1x32xf32> to vector<1x1x32xf32>
    %96 = vector.broadcast %95 : vector<1x1x32xf32> to vector<2x8x32xf32>
    %97 = arith.mulf %94, %96 : vector<2x8x32xf32>
    %98 = vector.shape_cast %9 : vector<1x32xf32> to vector<1x1x32xf32>
    %99 = vector.broadcast %98 : vector<1x1x32xf32> to vector<2x8x32xf32>
    %100 = arith.addf %97, %99 : vector<2x8x32xf32>
    %101 = arith.addf %100, %3 : vector<2x8x32xf32>
    %c0_32 = arith.constant 0 : index
    %c0_33 = arith.constant 0 : index
    %c0_34 = arith.constant 0 : index
    %102 = vector.load %arg3[%c0_32, %c0_33, %c0_34] : memref<2x32x384xbf16, #tpu.memory_space<vmem>>, vector<1x32x384xbf16>
    %103 = vector.shape_cast %102 : vector<1x32x384xbf16> to vector<32x384xbf16>
    %c0_35 = arith.constant 0 : index
    %c0_36 = arith.constant 0 : index
    %c0_37 = arith.constant 0 : index
    %104 = vector.load %arg4[%c0_35, %c0_36, %c0_37] : memref<2x1x32xf32, #tpu.memory_space<vmem>>, vector<1x1x32xf32>
    %105 = vector.shape_cast %104 : vector<1x1x32xf32> to vector<1x32xf32>
    %c0_38 = arith.constant 0 : index
    %c0_39 = arith.constant 0 : index
    %c0_40 = arith.constant 0 : index
    %106 = vector.load %arg5[%c0_38, %c0_39, %c0_40] : memref<2x1x32xf32, #tpu.memory_space<vmem>>, vector<1x1x32xf32>
    %107 = vector.shape_cast %106 : vector<1x1x32xf32> to vector<1x32xf32>
    %108 = vector.shape_cast %101 : vector<2x8x32xf32> to vector<16x32xf32>
    %109 = arith.truncf %108 : vector<16x32xf32> to vector<16x32xbf16>
    %cst_41 = arith.constant dense<0.000000e+00> : vector<16x384xf32>
    %110 = tpu.matmul %109, %103, %cst_41 {dimension_numbers = #tpu.dot_dimension_numbers<[1], [0], [0], [1], [0, 0, 1, 1], [], []>} : vector<16x32xbf16>, vector<32x384xbf16>, vector<16x384xf32> -> vector<16x384xf32>
    %111 = vector.shape_cast %110 : vector<16x384xf32> to vector<2x8x384xf32>
    %cst_42 = arith.constant 0.000000e+00 : f32
    %112 = vector.broadcast %cst_42 : f32 to vector<2x8x32xf32>
    %113 = vector.extract_strided_slice %111 {offsets = [0, 0, 0], sizes = [2, 8, 32], strides = [1, 1, 1]} : vector<2x8x384xf32> to vector<2x8x32xf32>
    %114 = vector.extract_strided_slice %111 {offsets = [0, 0, 128], sizes = [2, 8, 32], strides = [1, 1, 1]} : vector<2x8x384xf32> to vector<2x8x32xf32>
    %115 = vector.extract_strided_slice %111 {offsets = [0, 0, 256], sizes = [2, 8, 32], strides = [1, 1, 1]} : vector<2x8x384xf32> to vector<2x8x32xf32>
    "tpu.trace_start"() <{level = 10 : i32, message = "bqd,bkd->bqk"}> : () -> ()
    %cst_43 = arith.constant dense<0.000000e+00> : vector<2x8x8xf32>
    %116 = tpu.matmul %113, %114, %cst_43 {dimension_numbers = #tpu.dot_dimension_numbers<[2], [2], [1], [1], [0, 0, 0, 1, 1, 1], [0], [0]>} : vector<2x8x32xf32>, vector<2x8x32xf32>, vector<2x8x8xf32> -> vector<2x8x8xf32>
    "tpu.trace_stop"() : () -> ()
    %cst_44 = arith.constant dense<0xFF800000> : vector<2x8xf32>
    %117 = vector.multi_reduction <maximumf>, %116, %cst_44 [2] : vector<2x8x8xf32> to vector<2x8xf32>
    %118 = vector.shape_cast %117 : vector<2x8xf32> to vector<2x8x1xf32>
    %119 = vector.broadcast %118 : vector<2x8x1xf32> to vector<2x8x8xf32>
    %120 = arith.subf %116, %119 : vector<2x8x8xf32>
    %121 = math.exp %120 : vector<2x8x8xf32>
    %cst_45 = arith.constant dense<0.000000e+00> : vector<2x8xf32>
    %122 = vector.multi_reduction <add>, %121, %cst_45 [2] : vector<2x8x8xf32> to vector<2x8xf32>
    %123 = vector.shape_cast %122 : vector<2x8xf32> to vector<2x8x1xf32>
    %124 = tpu.reciprocal %123 {approx = true} : vector<2x8x1xf32> -> vector<2x8x1xf32>
    %125 = vector.broadcast %124 : vector<2x8x1xf32> to vector<2x8x8xf32>
    %126 = arith.mulf %121, %125 : vector<2x8x8xf32>
    "tpu.trace_start"() <{level = 10 : i32, message = "bqk,bkd->bqd"}> : () -> ()
    %cst_46 = arith.constant dense<0.000000e+00> : vector<2x8x32xf32>
    %127 = tpu.matmul %126, %115, %cst_46 {dimension_numbers = #tpu.dot_dimension_numbers<[2], [1], [1], [2], [0, 0, 0, 1, 1, 2], [0], [0]>} : vector<2x8x8xf32>, vector<2x8x32xf32>, vector<2x8x32xf32> -> vector<2x8x32xf32>
    "tpu.trace_stop"() : () -> ()
    %128 = arith.addf %112, %127 : vector<2x8x32xf32>
    %129 = vector.extract_strided_slice %111 {offsets = [0, 0, 32], sizes = [2, 8, 32], strides = [1, 1, 1]} : vector<2x8x384xf32> to vector<2x8x32xf32>
    %130 = vector.extract_strided_slice %111 {offsets = [0, 0, 160], sizes = [2, 8, 32], strides = [1, 1, 1]} : vector<2x8x384xf32> to vector<2x8x32xf32>
    %131 = vector.extract_strided_slice %111 {offsets = [0, 0, 288], sizes = [2, 8, 32], strides = [1, 1, 1]} : vector<2x8x384xf32> to vector<2x8x32xf32>
    "tpu.trace_start"() <{level = 10 : i32, message = "bqd,bkd->bqk"}> : () -> ()
    %cst_47 = arith.constant dense<0.000000e+00> : vector<2x8x8xf32>
    %132 = tpu.matmul %129, %130, %cst_47 {dimension_numbers = #tpu.dot_dimension_numbers<[2], [2], [1], [1], [0, 0, 0, 1, 1, 1], [0], [0]>} : vector<2x8x32xf32>, vector<2x8x32xf32>, vector<2x8x8xf32> -> vector<2x8x8xf32>
    "tpu.trace_stop"() : () -> ()
    %cst_48 = arith.constant dense<0xFF800000> : vector<2x8xf32>
    %133 = vector.multi_reduction <maximumf>, %132, %cst_48 [2] : vector<2x8x8xf32> to vector<2x8xf32>
    %134 = vector.shape_cast %133 : vector<2x8xf32> to vector<2x8x1xf32>
    %135 = vector.broadcast %134 : vector<2x8x1xf32> to vector<2x8x8xf32>
    %136 = arith.subf %132, %135 : vector<2x8x8xf32>
    %137 = math.exp %136 : vector<2x8x8xf32>
    %cst_49 = arith.constant dense<0.000000e+00> : vector<2x8xf32>
    %138 = vector.multi_reduction <add>, %137, %cst_49 [2] : vector<2x8x8xf32> to vector<2x8xf32>
    %139 = vector.shape_cast %138 : vector<2x8xf32> to vector<2x8x1xf32>
    %140 = tpu.reciprocal %139 {approx = true} : vector<2x8x1xf32> -> vector<2x8x1xf32>
    %141 = vector.broadcast %140 : vector<2x8x1xf32> to vector<2x8x8xf32>
    %142 = arith.mulf %137, %141 : vector<2x8x8xf32>
    "tpu.trace_start"() <{level = 10 : i32, message = "bqk,bkd->bqd"}> : () -> ()
    %cst_50 = arith.constant dense<0.000000e+00> : vector<2x8x32xf32>
    %143 = tpu.matmul %142, %131, %cst_50 {dimension_numbers = #tpu.dot_dimension_numbers<[2], [1], [1], [2], [0, 0, 0, 1, 1, 2], [0], [0]>} : vector<2x8x8xf32>, vector<2x8x32xf32>, vector<2x8x32xf32> -> vector<2x8x32xf32>
    "tpu.trace_stop"() : () -> ()
    %144 = arith.addf %128, %143 : vector<2x8x32xf32>
    %145 = vector.extract_strided_slice %111 {offsets = [0, 0, 64], sizes = [2, 8, 32], strides = [1, 1, 1]} : vector<2x8x384xf32> to vector<2x8x32xf32>
    %146 = vector.extract_strided_slice %111 {offsets = [0, 0, 192], sizes = [2, 8, 32], strides = [1, 1, 1]} : vector<2x8x384xf32> to vector<2x8x32xf32>
    %147 = vector.extract_strided_slice %111 {offsets = [0, 0, 320], sizes = [2, 8, 32], strides = [1, 1, 1]} : vector<2x8x384xf32> to vector<2x8x32xf32>
    "tpu.trace_start"() <{level = 10 : i32, message = "bqd,bkd->bqk"}> : () -> ()
    %cst_51 = arith.constant dense<0.000000e+00> : vector<2x8x8xf32>
    %148 = tpu.matmul %145, %146, %cst_51 {dimension_numbers = #tpu.dot_dimension_numbers<[2], [2], [1], [1], [0, 0, 0, 1, 1, 1], [0], [0]>} : vector<2x8x32xf32>, vector<2x8x32xf32>, vector<2x8x8xf32> -> vector<2x8x8xf32>
    "tpu.trace_stop"() : () -> ()
    %cst_52 = arith.constant dense<0xFF800000> : vector<2x8xf32>
    %149 = vector.multi_reduction <maximumf>, %148, %cst_52 [2] : vector<2x8x8xf32> to vector<2x8xf32>
    %150 = vector.shape_cast %149 : vector<2x8xf32> to vector<2x8x1xf32>
    %151 = vector.broadcast %150 : vector<2x8x1xf32> to vector<2x8x8xf32>
    %152 = arith.subf %148, %151 : vector<2x8x8xf32>
    %153 = math.exp %152 : vector<2x8x8xf32>
    %cst_53 = arith.constant dense<0.000000e+00> : vector<2x8xf32>
    %154 = vector.multi_reduction <add>, %153, %cst_53 [2] : vector<2x8x8xf32> to vector<2x8xf32>
    %155 = vector.shape_cast %154 : vector<2x8xf32> to vector<2x8x1xf32>
    %156 = tpu.reciprocal %155 {approx = true} : vector<2x8x1xf32> -> vector<2x8x1xf32>
    %157 = vector.broadcast %156 : vector<2x8x1xf32> to vector<2x8x8xf32>
    %158 = arith.mulf %153, %157 : vector<2x8x8xf32>
    "tpu.trace_start"() <{level = 10 : i32, message = "bqk,bkd->bqd"}> : () -> ()
    %cst_54 = arith.constant dense<0.000000e+00> : vector<2x8x32xf32>
    %159 = tpu.matmul %158, %147, %cst_54 {dimension_numbers = #tpu.dot_dimension_numbers<[2], [1], [1], [2], [0, 0, 0, 1, 1, 2], [0], [0]>} : vector<2x8x8xf32>, vector<2x8x32xf32>, vector<2x8x32xf32> -> vector<2x8x32xf32>
    "tpu.trace_stop"() : () -> ()
    %160 = arith.addf %144, %159 : vector<2x8x32xf32>
    %161 = vector.extract_strided_slice %111 {offsets = [0, 0, 96], sizes = [2, 8, 32], strides = [1, 1, 1]} : vector<2x8x384xf32> to vector<2x8x32xf32>
    %162 = vector.extract_strided_slice %111 {offsets = [0, 0, 224], sizes = [2, 8, 32], strides = [1, 1, 1]} : vector<2x8x384xf32> to vector<2x8x32xf32>
    %163 = vector.extract_strided_slice %111 {offsets = [0, 0, 352], sizes = [2, 8, 32], strides = [1, 1, 1]} : vector<2x8x384xf32> to vector<2x8x32xf32>
    "tpu.trace_start"() <{level = 10 : i32, message = "bqd,bkd->bqk"}> : () -> ()
    %cst_55 = arith.constant dense<0.000000e+00> : vector<2x8x8xf32>
    %164 = tpu.matmul %161, %162, %cst_55 {dimension_numbers = #tpu.dot_dimension_numbers<[2], [2], [1], [1], [0, 0, 0, 1, 1, 1], [0], [0]>} : vector<2x8x32xf32>, vector<2x8x32xf32>, vector<2x8x8xf32> -> vector<2x8x8xf32>
    "tpu.trace_stop"() : () -> ()
    %cst_56 = arith.constant dense<0xFF800000> : vector<2x8xf32>
    %165 = vector.multi_reduction <maximumf>, %164, %cst_56 [2] : vector<2x8x8xf32> to vector<2x8xf32>
    %166 = vector.shape_cast %165 : vector<2x8xf32> to vector<2x8x1xf32>
    %167 = vector.broadcast %166 : vector<2x8x1xf32> to vector<2x8x8xf32>
    %168 = arith.subf %164, %167 : vector<2x8x8xf32>
    %169 = math.exp %168 : vector<2x8x8xf32>
    %cst_57 = arith.constant dense<0.000000e+00> : vector<2x8xf32>
    %170 = vector.multi_reduction <add>, %169, %cst_57 [2] : vector<2x8x8xf32> to vector<2x8xf32>
    %171 = vector.shape_cast %170 : vector<2x8xf32> to vector<2x8x1xf32>
    %172 = tpu.reciprocal %171 {approx = true} : vector<2x8x1xf32> -> vector<2x8x1xf32>
    %173 = vector.broadcast %172 : vector<2x8x1xf32> to vector<2x8x8xf32>
    %174 = arith.mulf %169, %173 : vector<2x8x8xf32>
    "tpu.trace_start"() <{level = 10 : i32, message = "bqk,bkd->bqd"}> : () -> ()
    %cst_58 = arith.constant dense<0.000000e+00> : vector<2x8x32xf32>
    %175 = tpu.matmul %174, %163, %cst_58 {dimension_numbers = #tpu.dot_dimension_numbers<[2], [1], [1], [2], [0, 0, 0, 1, 1, 2], [0], [0]>} : vector<2x8x8xf32>, vector<2x8x32xf32>, vector<2x8x32xf32> -> vector<2x8x32xf32>
    "tpu.trace_stop"() : () -> ()
    %176 = arith.addf %160, %175 : vector<2x8x32xf32>
    %cst_59 = arith.constant dense<0.000000e+00> : vector<2x8xf32>
    %177 = vector.multi_reduction <add>, %176, %cst_59 [2] : vector<2x8x32xf32> to vector<2x8xf32>
    %178 = vector.shape_cast %177 : vector<2x8xf32> to vector<2x8x1xf32>
    %cst_60 = arith.constant 3.200000e+01 : f32
    %179 = vector.broadcast %cst_60 : f32 to vector<2x8x1xf32>
    %180 = arith.divf %178, %179 : vector<2x8x1xf32>
    %181 = vector.broadcast %180 : vector<2x8x1xf32> to vector<2x8x32xf32>
    %182 = arith.subf %176, %181 : vector<2x8x32xf32>
    %183 = arith.mulf %182, %182 : vector<2x8x32xf32>
    %cst_61 = arith.constant dense<0.000000e+00> : vector<2x8xf32>
    %184 = vector.multi_reduction <add>, %183, %cst_61 [2] : vector<2x8x32xf32> to vector<2x8xf32>
    %185 = vector.shape_cast %184 : vector<2x8xf32> to vector<2x8x1xf32>
    %cst_62 = arith.constant 3.200000e+01 : f32
    %186 = vector.broadcast %cst_62 : f32 to vector<2x8x1xf32>
    %187 = arith.divf %185, %186 : vector<2x8x1xf32>
    %cst_63 = arith.constant 9.99999974E-6 : f32
    %188 = vector.broadcast %cst_63 : f32 to vector<2x8x1xf32>
    %189 = arith.addf %187, %188 : vector<2x8x1xf32>
    %190 = math.rsqrt %189 : vector<2x8x1xf32>
    %191 = vector.broadcast %190 : vector<2x8x1xf32> to vector<2x8x32xf32>
    %192 = arith.mulf %182, %191 : vector<2x8x32xf32>
    %193 = vector.shape_cast %105 : vector<1x32xf32> to vector<1x1x32xf32>
    %194 = vector.broadcast %193 : vector<1x1x32xf32> to vector<2x8x32xf32>
    %195 = arith.mulf %192, %194 : vector<2x8x32xf32>
    %196 = vector.shape_cast %107 : vector<1x32xf32> to vector<1x1x32xf32>
    %197 = vector.broadcast %196 : vector<1x1x32xf32> to vector<2x8x32xf32>
    %198 = arith.addf %195, %197 : vector<2x8x32xf32>
    %199 = arith.addf %198, %101 : vector<2x8x32xf32>
    %c1_64 = arith.constant 1 : index
    %c0_65 = arith.constant 0 : index
    %c0_66 = arith.constant 0 : index
    %200 = vector.load %arg3[%c1_64, %c0_65, %c0_66] : memref<2x32x384xbf16, #tpu.memory_space<vmem>>, vector<1x32x384xbf16>
    %201 = vector.shape_cast %200 : vector<1x32x384xbf16> to vector<32x384xbf16>
    %c1_67 = arith.constant 1 : index
    %c0_68 = arith.constant 0 : index
    %c0_69 = arith.constant 0 : index
    %202 = vector.load %arg4[%c1_67, %c0_68, %c0_69] : memref<2x1x32xf32, #tpu.memory_space<vmem>>, vector<1x1x32xf32>
    %203 = vector.shape_cast %202 : vector<1x1x32xf32> to vector<1x32xf32>
    %c1_70 = arith.constant 1 : index
    %c0_71 = arith.constant 0 : index
    %c0_72 = arith.constant 0 : index
    %204 = vector.load %arg5[%c1_70, %c0_71, %c0_72] : memref<2x1x32xf32, #tpu.memory_space<vmem>>, vector<1x1x32xf32>
    %205 = vector.shape_cast %204 : vector<1x1x32xf32> to vector<1x32xf32>
    %206 = vector.shape_cast %101 : vector<2x8x32xf32> to vector<16x32xf32>
    %207 = arith.truncf %206 : vector<16x32xf32> to vector<16x32xbf16>
    %cst_73 = arith.constant dense<0.000000e+00> : vector<16x384xf32>
    %208 = tpu.matmul %207, %201, %cst_73 {dimension_numbers = #tpu.dot_dimension_numbers<[1], [0], [0], [1], [0, 0, 1, 1], [], []>} : vector<16x32xbf16>, vector<32x384xbf16>, vector<16x384xf32> -> vector<16x384xf32>
    %209 = vector.shape_cast %208 : vector<16x384xf32> to vector<2x8x384xf32>
    %cst_74 = arith.constant 0.000000e+00 : f32
    %210 = vector.broadcast %cst_74 : f32 to vector<2x8x32xf32>
    %211 = vector.extract_strided_slice %209 {offsets = [0, 0, 0], sizes = [2, 8, 32], strides = [1, 1, 1]} : vector<2x8x384xf32> to vector<2x8x32xf32>
    %212 = vector.extract_strided_slice %209 {offsets = [0, 0, 128], sizes = [2, 8, 32], strides = [1, 1, 1]} : vector<2x8x384xf32> to vector<2x8x32xf32>
    %213 = vector.extract_strided_slice %209 {offsets = [0, 0, 256], sizes = [2, 8, 32], strides = [1, 1, 1]} : vector<2x8x384xf32> to vector<2x8x32xf32>
    "tpu.trace_start"() <{level = 10 : i32, message = "bqd,bkd->bqk"}> : () -> ()
    %cst_75 = arith.constant dense<0.000000e+00> : vector<2x8x8xf32>
    %214 = tpu.matmul %211, %212, %cst_75 {dimension_numbers = #tpu.dot_dimension_numbers<[2], [2], [1], [1], [0, 0, 0, 1, 1, 1], [0], [0]>} : vector<2x8x32xf32>, vector<2x8x32xf32>, vector<2x8x8xf32> -> vector<2x8x8xf32>
    "tpu.trace_stop"() : () -> ()
    %cst_76 = arith.constant dense<0xFF800000> : vector<2x8xf32>
    %215 = vector.multi_reduction <maximumf>, %214, %cst_76 [2] : vector<2x8x8xf32> to vector<2x8xf32>
    %216 = vector.shape_cast %215 : vector<2x8xf32> to vector<2x8x1xf32>
    %217 = vector.broadcast %216 : vector<2x8x1xf32> to vector<2x8x8xf32>
    %218 = arith.subf %214, %217 : vector<2x8x8xf32>
    %219 = math.exp %218 : vector<2x8x8xf32>
    %cst_77 = arith.constant dense<0.000000e+00> : vector<2x8xf32>
    %220 = vector.multi_reduction <add>, %219, %cst_77 [2] : vector<2x8x8xf32> to vector<2x8xf32>
    %221 = vector.shape_cast %220 : vector<2x8xf32> to vector<2x8x1xf32>
    %222 = tpu.reciprocal %221 {approx = true} : vector<2x8x1xf32> -> vector<2x8x1xf32>
    %223 = vector.broadcast %222 : vector<2x8x1xf32> to vector<2x8x8xf32>
    %224 = arith.mulf %219, %223 : vector<2x8x8xf32>
    "tpu.trace_start"() <{level = 10 : i32, message = "bqk,bkd->bqd"}> : () -> ()
    %cst_78 = arith.constant dense<0.000000e+00> : vector<2x8x32xf32>
    %225 = tpu.matmul %224, %213, %cst_78 {dimension_numbers = #tpu.dot_dimension_numbers<[2], [1], [1], [2], [0, 0, 0, 1, 1, 2], [0], [0]>} : vector<2x8x8xf32>, vector<2x8x32xf32>, vector<2x8x32xf32> -> vector<2x8x32xf32>
    "tpu.trace_stop"() : () -> ()
    %226 = arith.addf %210, %225 : vector<2x8x32xf32>
    %227 = vector.extract_strided_slice %209 {offsets = [0, 0, 32], sizes = [2, 8, 32], strides = [1, 1, 1]} : vector<2x8x384xf32> to vector<2x8x32xf32>
    %228 = vector.extract_strided_slice %209 {offsets = [0, 0, 160], sizes = [2, 8, 32], strides = [1, 1, 1]} : vector<2x8x384xf32> to vector<2x8x32xf32>
    %229 = vector.extract_strided_slice %209 {offsets = [0, 0, 288], sizes = [2, 8, 32], strides = [1, 1, 1]} : vector<2x8x384xf32> to vector<2x8x32xf32>
    "tpu.trace_start"() <{level = 10 : i32, message = "bqd,bkd->bqk"}> : () -> ()
    %cst_79 = arith.constant dense<0.000000e+00> : vector<2x8x8xf32>
    %230 = tpu.matmul %227, %228, %cst_79 {dimension_numbers = #tpu.dot_dimension_numbers<[2], [2], [1], [1], [0, 0, 0, 1, 1, 1], [0], [0]>} : vector<2x8x32xf32>, vector<2x8x32xf32>, vector<2x8x8xf32> -> vector<2x8x8xf32>
    "tpu.trace_stop"() : () -> ()
    %cst_80 = arith.constant dense<0xFF800000> : vector<2x8xf32>
    %231 = vector.multi_reduction <maximumf>, %230, %cst_80 [2] : vector<2x8x8xf32> to vector<2x8xf32>
    %232 = vector.shape_cast %231 : vector<2x8xf32> to vector<2x8x1xf32>
    %233 = vector.broadcast %232 : vector<2x8x1xf32> to vector<2x8x8xf32>
    %234 = arith.subf %230, %233 : vector<2x8x8xf32>
    %235 = math.exp %234 : vector<2x8x8xf32>
    %cst_81 = arith.constant dense<0.000000e+00> : vector<2x8xf32>
    %236 = vector.multi_reduction <add>, %235, %cst_81 [2] : vector<2x8x8xf32> to vector<2x8xf32>
    %237 = vector.shape_cast %236 : vector<2x8xf32> to vector<2x8x1xf32>
    %238 = tpu.reciprocal %237 {approx = true} : vector<2x8x1xf32> -> vector<2x8x1xf32>
    %239 = vector.broadcast %238 : vector<2x8x1xf32> to vector<2x8x8xf32>
    %240 = arith.mulf %235, %239 : vector<2x8x8xf32>
    "tpu.trace_start"() <{level = 10 : i32, message = "bqk,bkd->bqd"}> : () -> ()
    %cst_82 = arith.constant dense<0.000000e+00> : vector<2x8x32xf32>
    %241 = tpu.matmul %240, %229, %cst_82 {dimension_numbers = #tpu.dot_dimension_numbers<[2], [1], [1], [2], [0, 0, 0, 1, 1, 2], [0], [0]>} : vector<2x8x8xf32>, vector<2x8x32xf32>, vector<2x8x32xf32> -> vector<2x8x32xf32>
    "tpu.trace_stop"() : () -> ()
    %242 = arith.addf %226, %241 : vector<2x8x32xf32>
    %243 = vector.extract_strided_slice %209 {offsets = [0, 0, 64], sizes = [2, 8, 32], strides = [1, 1, 1]} : vector<2x8x384xf32> to vector<2x8x32xf32>
    %244 = vector.extract_strided_slice %209 {offsets = [0, 0, 192], sizes = [2, 8, 32], strides = [1, 1, 1]} : vector<2x8x384xf32> to vector<2x8x32xf32>
    %245 = vector.extract_strided_slice %209 {offsets = [0, 0, 320], sizes = [2, 8, 32], strides = [1, 1, 1]} : vector<2x8x384xf32> to vector<2x8x32xf32>
    "tpu.trace_start"() <{level = 10 : i32, message = "bqd,bkd->bqk"}> : () -> ()
    %cst_83 = arith.constant dense<0.000000e+00> : vector<2x8x8xf32>
    %246 = tpu.matmul %243, %244, %cst_83 {dimension_numbers = #tpu.dot_dimension_numbers<[2], [2], [1], [1], [0, 0, 0, 1, 1, 1], [0], [0]>} : vector<2x8x32xf32>, vector<2x8x32xf32>, vector<2x8x8xf32> -> vector<2x8x8xf32>
    "tpu.trace_stop"() : () -> ()
    %cst_84 = arith.constant dense<0xFF800000> : vector<2x8xf32>
    %247 = vector.multi_reduction <maximumf>, %246, %cst_84 [2] : vector<2x8x8xf32> to vector<2x8xf32>
    %248 = vector.shape_cast %247 : vector<2x8xf32> to vector<2x8x1xf32>
    %249 = vector.broadcast %248 : vector<2x8x1xf32> to vector<2x8x8xf32>
    %250 = arith.subf %246, %249 : vector<2x8x8xf32>
    %251 = math.exp %250 : vector<2x8x8xf32>
    %cst_85 = arith.constant dense<0.000000e+00> : vector<2x8xf32>
    %252 = vector.multi_reduction <add>, %251, %cst_85 [2] : vector<2x8x8xf32> to vector<2x8xf32>
    %253 = vector.shape_cast %252 : vector<2x8xf32> to vector<2x8x1xf32>
    %254 = tpu.reciprocal %253 {approx = true} : vector<2x8x1xf32> -> vector<2x8x1xf32>
    %255 = vector.broadcast %254 : vector<2x8x1xf32> to vector<2x8x8xf32>
    %256 = arith.mulf %251, %255 : vector<2x8x8xf32>
    "tpu.trace_start"() <{level = 10 : i32, message = "bqk,bkd->bqd"}> : () -> ()
    %cst_86 = arith.constant dense<0.000000e+00> : vector<2x8x32xf32>
    %257 = tpu.matmul %256, %245, %cst_86 {dimension_numbers = #tpu.dot_dimension_numbers<[2], [1], [1], [2], [0, 0, 0, 1, 1, 2], [0], [0]>} : vector<2x8x8xf32>, vector<2x8x32xf32>, vector<2x8x32xf32> -> vector<2x8x32xf32>
    "tpu.trace_stop"() : () -> ()
    %258 = arith.addf %242, %257 : vector<2x8x32xf32>
    %259 = vector.extract_strided_slice %209 {offsets = [0, 0, 96], sizes = [2, 8, 32], strides = [1, 1, 1]} : vector<2x8x384xf32> to vector<2x8x32xf32>
    %260 = vector.extract_strided_slice %209 {offsets = [0, 0, 224], sizes = [2, 8, 32], strides = [1, 1, 1]} : vector<2x8x384xf32> to vector<2x8x32xf32>
    %261 = vector.extract_strided_slice %209 {offsets = [0, 0, 352], sizes = [2, 8, 32], strides = [1, 1, 1]} : vector<2x8x384xf32> to vector<2x8x32xf32>
    "tpu.trace_start"() <{level = 10 : i32, message = "bqd,bkd->bqk"}> : () -> ()
    %cst_87 = arith.constant dense<0.000000e+00> : vector<2x8x8xf32>
    %262 = tpu.matmul %259, %260, %cst_87 {dimension_numbers = #tpu.dot_dimension_numbers<[2], [2], [1], [1], [0, 0, 0, 1, 1, 1], [0], [0]>} : vector<2x8x32xf32>, vector<2x8x32xf32>, vector<2x8x8xf32> -> vector<2x8x8xf32>
    "tpu.trace_stop"() : () -> ()
    %cst_88 = arith.constant dense<0xFF800000> : vector<2x8xf32>
    %263 = vector.multi_reduction <maximumf>, %262, %cst_88 [2] : vector<2x8x8xf32> to vector<2x8xf32>
    %264 = vector.shape_cast %263 : vector<2x8xf32> to vector<2x8x1xf32>
    %265 = vector.broadcast %264 : vector<2x8x1xf32> to vector<2x8x8xf32>
    %266 = arith.subf %262, %265 : vector<2x8x8xf32>
    %267 = math.exp %266 : vector<2x8x8xf32>
    %cst_89 = arith.constant dense<0.000000e+00> : vector<2x8xf32>
    %268 = vector.multi_reduction <add>, %267, %cst_89 [2] : vector<2x8x8xf32> to vector<2x8xf32>
    %269 = vector.shape_cast %268 : vector<2x8xf32> to vector<2x8x1xf32>
    %270 = tpu.reciprocal %269 {approx = true} : vector<2x8x1xf32> -> vector<2x8x1xf32>
    %271 = vector.broadcast %270 : vector<2x8x1xf32> to vector<2x8x8xf32>
    %272 = arith.mulf %267, %271 : vector<2x8x8xf32>
    "tpu.trace_start"() <{level = 10 : i32, message = "bqk,bkd->bqd"}> : () -> ()
    %cst_90 = arith.constant dense<0.000000e+00> : vector<2x8x32xf32>
    %273 = tpu.matmul %272, %261, %cst_90 {dimension_numbers = #tpu.dot_dimension_numbers<[2], [1], [1], [2], [0, 0, 0, 1, 1, 2], [0], [0]>} : vector<2x8x8xf32>, vector<2x8x32xf32>, vector<2x8x32xf32> -> vector<2x8x32xf32>
    "tpu.trace_stop"() : () -> ()
    %274 = arith.addf %258, %273 : vector<2x8x32xf32>
    %cst_91 = arith.constant dense<0.000000e+00> : vector<2x8xf32>
    %275 = vector.multi_reduction <add>, %274, %cst_91 [2] : vector<2x8x32xf32> to vector<2x8xf32>
    %276 = vector.shape_cast %275 : vector<2x8xf32> to vector<2x8x1xf32>
    %cst_92 = arith.constant 3.200000e+01 : f32
    %277 = vector.broadcast %cst_92 : f32 to vector<2x8x1xf32>
    %278 = arith.divf %276, %277 : vector<2x8x1xf32>
    %279 = vector.broadcast %278 : vector<2x8x1xf32> to vector<2x8x32xf32>
    %280 = arith.subf %274, %279 : vector<2x8x32xf32>
    %281 = arith.mulf %280, %280 : vector<2x8x32xf32>
    %cst_93 = arith.constant dense<0.000000e+00> : vector<2x8xf32>
    %282 = vector.multi_reduction <add>, %281, %cst_93 [2] : vector<2x8x32xf32> to vector<2x8xf32>
    %283 = vector.shape_cast %282 : vector<2x8xf32> to vector<2x8x1xf32>
    %cst_94 = arith.constant 3.200000e+01 : f32
    %284 = vector.broadcast %cst_94 : f32 to vector<2x8x1xf32>
    %285 = arith.divf %283, %284 : vector<2x8x1xf32>
    %cst_95 = arith.constant 9.99999974E-6 : f32
    %286 = vector.broadcast %cst_95 : f32 to vector<2x8x1xf32>
    %287 = arith.addf %285, %286 : vector<2x8x1xf32>
    %288 = math.rsqrt %287 : vector<2x8x1xf32>
    %289 = vector.broadcast %288 : vector<2x8x1xf32> to vector<2x8x32xf32>
    %290 = arith.mulf %280, %289 : vector<2x8x32xf32>
    %291 = vector.shape_cast %203 : vector<1x32xf32> to vector<1x1x32xf32>
    %292 = vector.broadcast %291 : vector<1x1x32xf32> to vector<2x8x32xf32>
    %293 = arith.mulf %290, %292 : vector<2x8x32xf32>
    %294 = vector.shape_cast %205 : vector<1x32xf32> to vector<1x1x32xf32>
    %295 = vector.broadcast %294 : vector<1x1x32xf32> to vector<2x8x32xf32>
    %296 = arith.addf %293, %295 : vector<2x8x32xf32>
    %297 = arith.addf %296, %101 : vector<2x8x32xf32>
    %cst_96 = arith.constant 5.000000e-01 : f32
    %298 = vector.broadcast %cst_96 : f32 to vector<2x8x32xf32>
    %299 = arith.mulf %298, %297 : vector<2x8x32xf32>
    %300 = math.exp %299 : vector<2x8x32xf32>
    %cst_97 = arith.constant 0.000000e+00 : f32
    %301 = vector.broadcast %cst_97 : f32 to vector<2x8x32xf32>
    %302 = arith.mulf %301, %199 : vector<2x8x32xf32>
    %c0_98 = arith.constant 0 : index
    %c0_99 = arith.constant 0 : index
    %c0_100 = arith.constant 0 : index
    %303 = vector.load %arg6[%c0_98, %c0_99, %c0_100] : memref<2x8x32xf32, #tpu.memory_space<vmem>>, vector<2x8x32xf32>
    %304 = arith.mulf %303, %300 : vector<2x8x32xf32>
    %305 = arith.addf %199, %304 : vector<2x8x32xf32>
    %cst_101 = arith.constant 1.000000e+00 : f32
    %306 = vector.broadcast %cst_101 : f32 to vector<2x8x32xf32>
    %307 = arith.mulf %306, %305 : vector<2x8x32xf32>
    %308 = arith.addf %302, %307 : vector<2x8x32xf32>
    %cst_102 = arith.constant 1.000000e+00 : f32
    %309 = vector.broadcast %cst_102 : f32 to vector<2x8x32xf32>
    %310 = arith.addf %309, %297 : vector<2x8x32xf32>
    %311 = arith.mulf %199, %199 : vector<2x8x32xf32>
    %312 = arith.subf %310, %311 : vector<2x8x32xf32>
    %313 = math.exp %297 : vector<2x8x32xf32>
    %314 = arith.subf %312, %313 : vector<2x8x32xf32>
    %315 = vector.shape_cast %314 : vector<2x8x32xf32> to vector<1x2x8x32xf32>
    %cst_103 = arith.constant dense<0.000000e+00> : vector<1xf32>
    %316 = vector.multi_reduction <add>, %315, %cst_103 [1, 2, 3] : vector<1x2x8x32xf32> to vector<1xf32>
    %317 = vector.shape_cast %316 : vector<1xf32> to vector<1x1x1x1xf32>
    %318 = vector.extract %317[0, 0, 0, 0] : f32 from vector<1x1x1x1xf32>
    %cst_104 = arith.constant 0.001953125 : f32
    %319 = arith.mulf %318, %cst_104 : f32
    %cst_105 = arith.constant -5.000000e-01 : f32
    %320 = arith.mulf %cst_105, %319 : f32
    %c2 = arith.constant 2 : index
    %c0_106 = arith.constant 0 : index
    %c0_107 = arith.constant 0 : index
    %321 = vector.load %arg0[%c2, %c0_106, %c0_107] : memref<6x32x384xbf16, #tpu.memory_space<vmem>>, vector<1x32x384xbf16>
    %322 = vector.shape_cast %321 : vector<1x32x384xbf16> to vector<32x384xbf16>
    %c2_108 = arith.constant 2 : index
    %c0_109 = arith.constant 0 : index
    %c0_110 = arith.constant 0 : index
    %323 = vector.load %arg1[%c2_108, %c0_109, %c0_110] : memref<6x1x32xf32, #tpu.memory_space<vmem>>, vector<1x1x32xf32>
    %324 = vector.shape_cast %323 : vector<1x1x32xf32> to vector<1x32xf32>
    %c2_111 = arith.constant 2 : index
    %c0_112 = arith.constant 0 : index
    %c0_113 = arith.constant 0 : index
    %325 = vector.load %arg2[%c2_111, %c0_112, %c0_113] : memref<6x1x32xf32, #tpu.memory_space<vmem>>, vector<1x1x32xf32>
    %326 = vector.shape_cast %325 : vector<1x1x32xf32> to vector<1x32xf32>
    %327 = vector.shape_cast %308 : vector<2x8x32xf32> to vector<16x32xf32>
    %328 = arith.truncf %327 : vector<16x32xf32> to vector<16x32xbf16>
    %cst_114 = arith.constant dense<0.000000e+00> : vector<16x384xf32>
    %329 = tpu.matmul %328, %322, %cst_114 {dimension_numbers = #tpu.dot_dimension_numbers<[1], [0], [0], [1], [0, 0, 1, 1], [], []>} : vector<16x32xbf16>, vector<32x384xbf16>, vector<16x384xf32> -> vector<16x384xf32>
    %330 = vector.shape_cast %329 : vector<16x384xf32> to vector<2x8x384xf32>
    %cst_115 = arith.constant 0.000000e+00 : f32
    %331 = vector.broadcast %cst_115 : f32 to vector<2x8x32xf32>
    %332 = vector.extract_strided_slice %330 {offsets = [0, 0, 0], sizes = [2, 8, 32], strides = [1, 1, 1]} : vector<2x8x384xf32> to vector<2x8x32xf32>
    %333 = vector.extract_strided_slice %330 {offsets = [0, 0, 128], sizes = [2, 8, 32], strides = [1, 1, 1]} : vector<2x8x384xf32> to vector<2x8x32xf32>
    %334 = vector.extract_strided_slice %330 {offsets = [0, 0, 256], sizes = [2, 8, 32], strides = [1, 1, 1]} : vector<2x8x384xf32> to vector<2x8x32xf32>
    "tpu.trace_start"() <{level = 10 : i32, message = "bqd,bkd->bqk"}> : () -> ()
    %cst_116 = arith.constant dense<0.000000e+00> : vector<2x8x8xf32>
    %335 = tpu.matmul %332, %333, %cst_116 {dimension_numbers = #tpu.dot_dimension_numbers<[2], [2], [1], [1], [0, 0, 0, 1, 1, 1], [0], [0]>} : vector<2x8x32xf32>, vector<2x8x32xf32>, vector<2x8x8xf32> -> vector<2x8x8xf32>
    "tpu.trace_stop"() : () -> ()
    %cst_117 = arith.constant dense<0xFF800000> : vector<2x8xf32>
    %336 = vector.multi_reduction <maximumf>, %335, %cst_117 [2] : vector<2x8x8xf32> to vector<2x8xf32>
    %337 = vector.shape_cast %336 : vector<2x8xf32> to vector<2x8x1xf32>
    %338 = vector.broadcast %337 : vector<2x8x1xf32> to vector<2x8x8xf32>
    %339 = arith.subf %335, %338 : vector<2x8x8xf32>
    %340 = math.exp %339 : vector<2x8x8xf32>
    %cst_118 = arith.constant dense<0.000000e+00> : vector<2x8xf32>
    %341 = vector.multi_reduction <add>, %340, %cst_118 [2] : vector<2x8x8xf32> to vector<2x8xf32>
    %342 = vector.shape_cast %341 : vector<2x8xf32> to vector<2x8x1xf32>
    %343 = tpu.reciprocal %342 {approx = true} : vector<2x8x1xf32> -> vector<2x8x1xf32>
    %344 = vector.broadcast %343 : vector<2x8x1xf32> to vector<2x8x8xf32>
    %345 = arith.mulf %340, %344 : vector<2x8x8xf32>
    "tpu.trace_start"() <{level = 10 : i32, message = "bqk,bkd->bqd"}> : () -> ()
    %cst_119 = arith.constant dense<0.000000e+00> : vector<2x8x32xf32>
    %346 = tpu.matmul %345, %334, %cst_119 {dimension_numbers = #tpu.dot_dimension_numbers<[2], [1], [1], [2], [0, 0, 0, 1, 1, 2], [0], [0]>} : vector<2x8x8xf32>, vector<2x8x32xf32>, vector<2x8x32xf32> -> vector<2x8x32xf32>
    "tpu.trace_stop"() : () -> ()
    %347 = arith.addf %331, %346 : vector<2x8x32xf32>
    %348 = vector.extract_strided_slice %330 {offsets = [0, 0, 32], sizes = [2, 8, 32], strides = [1, 1, 1]} : vector<2x8x384xf32> to vector<2x8x32xf32>
    %349 = vector.extract_strided_slice %330 {offsets = [0, 0, 160], sizes = [2, 8, 32], strides = [1, 1, 1]} : vector<2x8x384xf32> to vector<2x8x32xf32>
    %350 = vector.extract_strided_slice %330 {offsets = [0, 0, 288], sizes = [2, 8, 32], strides = [1, 1, 1]} : vector<2x8x384xf32> to vector<2x8x32xf32>
    "tpu.trace_start"() <{level = 10 : i32, message = "bqd,bkd->bqk"}> : () -> ()
    %cst_120 = arith.constant dense<0.000000e+00> : vector<2x8x8xf32>
    %351 = tpu.matmul %348, %349, %cst_120 {dimension_numbers = #tpu.dot_dimension_numbers<[2], [2], [1], [1], [0, 0, 0, 1, 1, 1], [0], [0]>} : vector<2x8x32xf32>, vector<2x8x32xf32>, vector<2x8x8xf32> -> vector<2x8x8xf32>
    "tpu.trace_stop"() : () -> ()
    %cst_121 = arith.constant dense<0xFF800000> : vector<2x8xf32>
    %352 = vector.multi_reduction <maximumf>, %351, %cst_121 [2] : vector<2x8x8xf32> to vector<2x8xf32>
    %353 = vector.shape_cast %352 : vector<2x8xf32> to vector<2x8x1xf32>
    %354 = vector.broadcast %353 : vector<2x8x1xf32> to vector<2x8x8xf32>
    %355 = arith.subf %351, %354 : vector<2x8x8xf32>
    %356 = math.exp %355 : vector<2x8x8xf32>
    %cst_122 = arith.constant dense<0.000000e+00> : vector<2x8xf32>
    %357 = vector.multi_reduction <add>, %356, %cst_122 [2] : vector<2x8x8xf32> to vector<2x8xf32>
    %358 = vector.shape_cast %357 : vector<2x8xf32> to vector<2x8x1xf32>
    %359 = tpu.reciprocal %358 {approx = true} : vector<2x8x1xf32> -> vector<2x8x1xf32>
    %360 = vector.broadcast %359 : vector<2x8x1xf32> to vector<2x8x8xf32>
    %361 = arith.mulf %356, %360 : vector<2x8x8xf32>
    "tpu.trace_start"() <{level = 10 : i32, message = "bqk,bkd->bqd"}> : () -> ()
    %cst_123 = arith.constant dense<0.000000e+00> : vector<2x8x32xf32>
    %362 = tpu.matmul %361, %350, %cst_123 {dimension_numbers = #tpu.dot_dimension_numbers<[2], [1], [1], [2], [0, 0, 0, 1, 1, 2], [0], [0]>} : vector<2x8x8xf32>, vector<2x8x32xf32>, vector<2x8x32xf32> -> vector<2x8x32xf32>
    "tpu.trace_stop"() : () -> ()
    %363 = arith.addf %347, %362 : vector<2x8x32xf32>
    %364 = vector.extract_strided_slice %330 {offsets = [0, 0, 64], sizes = [2, 8, 32], strides = [1, 1, 1]} : vector<2x8x384xf32> to vector<2x8x32xf32>
    %365 = vector.extract_strided_slice %330 {offsets = [0, 0, 192], sizes = [2, 8, 32], strides = [1, 1, 1]} : vector<2x8x384xf32> to vector<2x8x32xf32>
    %366 = vector.extract_strided_slice %330 {offsets = [0, 0, 320], sizes = [2, 8, 32], strides = [1, 1, 1]} : vector<2x8x384xf32> to vector<2x8x32xf32>
    "tpu.trace_start"() <{level = 10 : i32, message = "bqd,bkd->bqk"}> : () -> ()
    %cst_124 = arith.constant dense<0.000000e+00> : vector<2x8x8xf32>
    %367 = tpu.matmul %364, %365, %cst_124 {dimension_numbers = #tpu.dot_dimension_numbers<[2], [2], [1], [1], [0, 0, 0, 1, 1, 1], [0], [0]>} : vector<2x8x32xf32>, vector<2x8x32xf32>, vector<2x8x8xf32> -> vector<2x8x8xf32>
    "tpu.trace_stop"() : () -> ()
    %cst_125 = arith.constant dense<0xFF800000> : vector<2x8xf32>
    %368 = vector.multi_reduction <maximumf>, %367, %cst_125 [2] : vector<2x8x8xf32> to vector<2x8xf32>
    %369 = vector.shape_cast %368 : vector<2x8xf32> to vector<2x8x1xf32>
    %370 = vector.broadcast %369 : vector<2x8x1xf32> to vector<2x8x8xf32>
    %371 = arith.subf %367, %370 : vector<2x8x8xf32>
    %372 = math.exp %371 : vector<2x8x8xf32>
    %cst_126 = arith.constant dense<0.000000e+00> : vector<2x8xf32>
    %373 = vector.multi_reduction <add>, %372, %cst_126 [2] : vector<2x8x8xf32> to vector<2x8xf32>
    %374 = vector.shape_cast %373 : vector<2x8xf32> to vector<2x8x1xf32>
    %375 = tpu.reciprocal %374 {approx = true} : vector<2x8x1xf32> -> vector<2x8x1xf32>
    %376 = vector.broadcast %375 : vector<2x8x1xf32> to vector<2x8x8xf32>
    %377 = arith.mulf %372, %376 : vector<2x8x8xf32>
    "tpu.trace_start"() <{level = 10 : i32, message = "bqk,bkd->bqd"}> : () -> ()
    %cst_127 = arith.constant dense<0.000000e+00> : vector<2x8x32xf32>
    %378 = tpu.matmul %377, %366, %cst_127 {dimension_numbers = #tpu.dot_dimension_numbers<[2], [1], [1], [2], [0, 0, 0, 1, 1, 2], [0], [0]>} : vector<2x8x8xf32>, vector<2x8x32xf32>, vector<2x8x32xf32> -> vector<2x8x32xf32>
    "tpu.trace_stop"() : () -> ()
    %379 = arith.addf %363, %378 : vector<2x8x32xf32>
    %380 = vector.extract_strided_slice %330 {offsets = [0, 0, 96], sizes = [2, 8, 32], strides = [1, 1, 1]} : vector<2x8x384xf32> to vector<2x8x32xf32>
    %381 = vector.extract_strided_slice %330 {offsets = [0, 0, 224], sizes = [2, 8, 32], strides = [1, 1, 1]} : vector<2x8x384xf32> to vector<2x8x32xf32>
    %382 = vector.extract_strided_slice %330 {offsets = [0, 0, 352], sizes = [2, 8, 32], strides = [1, 1, 1]} : vector<2x8x384xf32> to vector<2x8x32xf32>
    "tpu.trace_start"() <{level = 10 : i32, message = "bqd,bkd->bqk"}> : () -> ()
    %cst_128 = arith.constant dense<0.000000e+00> : vector<2x8x8xf32>
    %383 = tpu.matmul %380, %381, %cst_128 {dimension_numbers = #tpu.dot_dimension_numbers<[2], [2], [1], [1], [0, 0, 0, 1, 1, 1], [0], [0]>} : vector<2x8x32xf32>, vector<2x8x32xf32>, vector<2x8x8xf32> -> vector<2x8x8xf32>
    "tpu.trace_stop"() : () -> ()
    %cst_129 = arith.constant dense<0xFF800000> : vector<2x8xf32>
    %384 = vector.multi_reduction <maximumf>, %383, %cst_129 [2] : vector<2x8x8xf32> to vector<2x8xf32>
    %385 = vector.shape_cast %384 : vector<2x8xf32> to vector<2x8x1xf32>
    %386 = vector.broadcast %385 : vector<2x8x1xf32> to vector<2x8x8xf32>
    %387 = arith.subf %383, %386 : vector<2x8x8xf32>
    %388 = math.exp %387 : vector<2x8x8xf32>
    %cst_130 = arith.constant dense<0.000000e+00> : vector<2x8xf32>
    %389 = vector.multi_reduction <add>, %388, %cst_130 [2] : vector<2x8x8xf32> to vector<2x8xf32>
    %390 = vector.shape_cast %389 : vector<2x8xf32> to vector<2x8x1xf32>
    %391 = tpu.reciprocal %390 {approx = true} : vector<2x8x1xf32> -> vector<2x8x1xf32>
    %392 = vector.broadcast %391 : vector<2x8x1xf32> to vector<2x8x8xf32>
    %393 = arith.mulf %388, %392 : vector<2x8x8xf32>
    "tpu.trace_start"() <{level = 10 : i32, message = "bqk,bkd->bqd"}> : () -> ()
    %cst_131 = arith.constant dense<0.000000e+00> : vector<2x8x32xf32>
    %394 = tpu.matmul %393, %382, %cst_131 {dimension_numbers = #tpu.dot_dimension_numbers<[2], [1], [1], [2], [0, 0, 0, 1, 1, 2], [0], [0]>} : vector<2x8x8xf32>, vector<2x8x32xf32>, vector<2x8x32xf32> -> vector<2x8x32xf32>
    "tpu.trace_stop"() : () -> ()
    %395 = arith.addf %379, %394 : vector<2x8x32xf32>
    %cst_132 = arith.constant dense<0.000000e+00> : vector<2x8xf32>
    %396 = vector.multi_reduction <add>, %395, %cst_132 [2] : vector<2x8x32xf32> to vector<2x8xf32>
    %397 = vector.shape_cast %396 : vector<2x8xf32> to vector<2x8x1xf32>
    %cst_133 = arith.constant 3.200000e+01 : f32
    %398 = vector.broadcast %cst_133 : f32 to vector<2x8x1xf32>
    %399 = arith.divf %397, %398 : vector<2x8x1xf32>
    %400 = vector.broadcast %399 : vector<2x8x1xf32> to vector<2x8x32xf32>
    %401 = arith.subf %395, %400 : vector<2x8x32xf32>
    %402 = arith.mulf %401, %401 : vector<2x8x32xf32>
    %cst_134 = arith.constant dense<0.000000e+00> : vector<2x8xf32>
    %403 = vector.multi_reduction <add>, %402, %cst_134 [2] : vector<2x8x32xf32> to vector<2x8xf32>
    %404 = vector.shape_cast %403 : vector<2x8xf32> to vector<2x8x1xf32>
    %cst_135 = arith.constant 3.200000e+01 : f32
    %405 = vector.broadcast %cst_135 : f32 to vector<2x8x1xf32>
    %406 = arith.divf %404, %405 : vector<2x8x1xf32>
    %cst_136 = arith.constant 9.99999974E-6 : f32
    %407 = vector.broadcast %cst_136 : f32 to vector<2x8x1xf32>
    %408 = arith.addf %406, %407 : vector<2x8x1xf32>
    %409 = math.rsqrt %408 : vector<2x8x1xf32>
    %410 = vector.broadcast %409 : vector<2x8x1xf32> to vector<2x8x32xf32>
    %411 = arith.mulf %401, %410 : vector<2x8x32xf32>
    %412 = vector.shape_cast %324 : vector<1x32xf32> to vector<1x1x32xf32>
    %413 = vector.broadcast %412 : vector<1x1x32xf32> to vector<2x8x32xf32>
    %414 = arith.mulf %411, %413 : vector<2x8x32xf32>
    %415 = vector.shape_cast %326 : vector<1x32xf32> to vector<1x1x32xf32>
    %416 = vector.broadcast %415 : vector<1x1x32xf32> to vector<2x8x32xf32>
    %417 = arith.addf %414, %416 : vector<2x8x32xf32>
    %418 = arith.addf %417, %308 : vector<2x8x32xf32>
    %c3 = arith.constant 3 : index
    %c0_137 = arith.constant 0 : index
    %c0_138 = arith.constant 0 : index
    %419 = vector.load %arg0[%c3, %c0_137, %c0_138] : memref<6x32x384xbf16, #tpu.memory_space<vmem>>, vector<1x32x384xbf16>
    %420 = vector.shape_cast %419 : vector<1x32x384xbf16> to vector<32x384xbf16>
    %c3_139 = arith.constant 3 : index
    %c0_140 = arith.constant 0 : index
    %c0_141 = arith.constant 0 : index
    %421 = vector.load %arg1[%c3_139, %c0_140, %c0_141] : memref<6x1x32xf32, #tpu.memory_space<vmem>>, vector<1x1x32xf32>
    %422 = vector.shape_cast %421 : vector<1x1x32xf32> to vector<1x32xf32>
    %c3_142 = arith.constant 3 : index
    %c0_143 = arith.constant 0 : index
    %c0_144 = arith.constant 0 : index
    %423 = vector.load %arg2[%c3_142, %c0_143, %c0_144] : memref<6x1x32xf32, #tpu.memory_space<vmem>>, vector<1x1x32xf32>
    %424 = vector.shape_cast %423 : vector<1x1x32xf32> to vector<1x32xf32>
    %425 = vector.shape_cast %418 : vector<2x8x32xf32> to vector<16x32xf32>
    %426 = arith.truncf %425 : vector<16x32xf32> to vector<16x32xbf16>
    %cst_145 = arith.constant dense<0.000000e+00> : vector<16x384xf32>
    %427 = tpu.matmul %426, %420, %cst_145 {dimension_numbers = #tpu.dot_dimension_numbers<[1], [0], [0], [1], [0, 0, 1, 1], [], []>} : vector<16x32xbf16>, vector<32x384xbf16>, vector<16x384xf32> -> vector<16x384xf32>
    %428 = vector.shape_cast %427 : vector<16x384xf32> to vector<2x8x384xf32>
    %cst_146 = arith.constant 0.000000e+00 : f32
    %429 = vector.broadcast %cst_146 : f32 to vector<2x8x32xf32>
    %430 = vector.extract_strided_slice %428 {offsets = [0, 0, 0], sizes = [2, 8, 32], strides = [1, 1, 1]} : vector<2x8x384xf32> to vector<2x8x32xf32>
    %431 = vector.extract_strided_slice %428 {offsets = [0, 0, 128], sizes = [2, 8, 32], strides = [1, 1, 1]} : vector<2x8x384xf32> to vector<2x8x32xf32>
    %432 = vector.extract_strided_slice %428 {offsets = [0, 0, 256], sizes = [2, 8, 32], strides = [1, 1, 1]} : vector<2x8x384xf32> to vector<2x8x32xf32>
    "tpu.trace_start"() <{level = 10 : i32, message = "bqd,bkd->bqk"}> : () -> ()
    %cst_147 = arith.constant dense<0.000000e+00> : vector<2x8x8xf32>
    %433 = tpu.matmul %430, %431, %cst_147 {dimension_numbers = #tpu.dot_dimension_numbers<[2], [2], [1], [1], [0, 0, 0, 1, 1, 1], [0], [0]>} : vector<2x8x32xf32>, vector<2x8x32xf32>, vector<2x8x8xf32> -> vector<2x8x8xf32>
    "tpu.trace_stop"() : () -> ()
    %cst_148 = arith.constant dense<0xFF800000> : vector<2x8xf32>
    %434 = vector.multi_reduction <maximumf>, %433, %cst_148 [2] : vector<2x8x8xf32> to vector<2x8xf32>
    %435 = vector.shape_cast %434 : vector<2x8xf32> to vector<2x8x1xf32>
    %436 = vector.broadcast %435 : vector<2x8x1xf32> to vector<2x8x8xf32>
    %437 = arith.subf %433, %436 : vector<2x8x8xf32>
    %438 = math.exp %437 : vector<2x8x8xf32>
    %cst_149 = arith.constant dense<0.000000e+00> : vector<2x8xf32>
    %439 = vector.multi_reduction <add>, %438, %cst_149 [2] : vector<2x8x8xf32> to vector<2x8xf32>
    %440 = vector.shape_cast %439 : vector<2x8xf32> to vector<2x8x1xf32>
    %441 = tpu.reciprocal %440 {approx = true} : vector<2x8x1xf32> -> vector<2x8x1xf32>
    %442 = vector.broadcast %441 : vector<2x8x1xf32> to vector<2x8x8xf32>
    %443 = arith.mulf %438, %442 : vector<2x8x8xf32>
    "tpu.trace_start"() <{level = 10 : i32, message = "bqk,bkd->bqd"}> : () -> ()
    %cst_150 = arith.constant dense<0.000000e+00> : vector<2x8x32xf32>
    %444 = tpu.matmul %443, %432, %cst_150 {dimension_numbers = #tpu.dot_dimension_numbers<[2], [1], [1], [2], [0, 0, 0, 1, 1, 2], [0], [0]>} : vector<2x8x8xf32>, vector<2x8x32xf32>, vector<2x8x32xf32> -> vector<2x8x32xf32>
    "tpu.trace_stop"() : () -> ()
    %445 = arith.addf %429, %444 : vector<2x8x32xf32>
    %446 = vector.extract_strided_slice %428 {offsets = [0, 0, 32], sizes = [2, 8, 32], strides = [1, 1, 1]} : vector<2x8x384xf32> to vector<2x8x32xf32>
    %447 = vector.extract_strided_slice %428 {offsets = [0, 0, 160], sizes = [2, 8, 32], strides = [1, 1, 1]} : vector<2x8x384xf32> to vector<2x8x32xf32>
    %448 = vector.extract_strided_slice %428 {offsets = [0, 0, 288], sizes = [2, 8, 32], strides = [1, 1, 1]} : vector<2x8x384xf32> to vector<2x8x32xf32>
    "tpu.trace_start"() <{level = 10 : i32, message = "bqd,bkd->bqk"}> : () -> ()
    %cst_151 = arith.constant dense<0.000000e+00> : vector<2x8x8xf32>
    %449 = tpu.matmul %446, %447, %cst_151 {dimension_numbers = #tpu.dot_dimension_numbers<[2], [2], [1], [1], [0, 0, 0, 1, 1, 1], [0], [0]>} : vector<2x8x32xf32>, vector<2x8x32xf32>, vector<2x8x8xf32> -> vector<2x8x8xf32>
    "tpu.trace_stop"() : () -> ()
    %cst_152 = arith.constant dense<0xFF800000> : vector<2x8xf32>
    %450 = vector.multi_reduction <maximumf>, %449, %cst_152 [2] : vector<2x8x8xf32> to vector<2x8xf32>
    %451 = vector.shape_cast %450 : vector<2x8xf32> to vector<2x8x1xf32>
    %452 = vector.broadcast %451 : vector<2x8x1xf32> to vector<2x8x8xf32>
    %453 = arith.subf %449, %452 : vector<2x8x8xf32>
    %454 = math.exp %453 : vector<2x8x8xf32>
    %cst_153 = arith.constant dense<0.000000e+00> : vector<2x8xf32>
    %455 = vector.multi_reduction <add>, %454, %cst_153 [2] : vector<2x8x8xf32> to vector<2x8xf32>
    %456 = vector.shape_cast %455 : vector<2x8xf32> to vector<2x8x1xf32>
    %457 = tpu.reciprocal %456 {approx = true} : vector<2x8x1xf32> -> vector<2x8x1xf32>
    %458 = vector.broadcast %457 : vector<2x8x1xf32> to vector<2x8x8xf32>
    %459 = arith.mulf %454, %458 : vector<2x8x8xf32>
    "tpu.trace_start"() <{level = 10 : i32, message = "bqk,bkd->bqd"}> : () -> ()
    %cst_154 = arith.constant dense<0.000000e+00> : vector<2x8x32xf32>
    %460 = tpu.matmul %459, %448, %cst_154 {dimension_numbers = #tpu.dot_dimension_numbers<[2], [1], [1], [2], [0, 0, 0, 1, 1, 2], [0], [0]>} : vector<2x8x8xf32>, vector<2x8x32xf32>, vector<2x8x32xf32> -> vector<2x8x32xf32>
    "tpu.trace_stop"() : () -> ()
    %461 = arith.addf %445, %460 : vector<2x8x32xf32>
    %462 = vector.extract_strided_slice %428 {offsets = [0, 0, 64], sizes = [2, 8, 32], strides = [1, 1, 1]} : vector<2x8x384xf32> to vector<2x8x32xf32>
    %463 = vector.extract_strided_slice %428 {offsets = [0, 0, 192], sizes = [2, 8, 32], strides = [1, 1, 1]} : vector<2x8x384xf32> to vector<2x8x32xf32>
    %464 = vector.extract_strided_slice %428 {offsets = [0, 0, 320], sizes = [2, 8, 32], strides = [1, 1, 1]} : vector<2x8x384xf32> to vector<2x8x32xf32>
    "tpu.trace_start"() <{level = 10 : i32, message = "bqd,bkd->bqk"}> : () -> ()
    %cst_155 = arith.constant dense<0.000000e+00> : vector<2x8x8xf32>
    %465 = tpu.matmul %462, %463, %cst_155 {dimension_numbers = #tpu.dot_dimension_numbers<[2], [2], [1], [1], [0, 0, 0, 1, 1, 1], [0], [0]>} : vector<2x8x32xf32>, vector<2x8x32xf32>, vector<2x8x8xf32> -> vector<2x8x8xf32>
    "tpu.trace_stop"() : () -> ()
    %cst_156 = arith.constant dense<0xFF800000> : vector<2x8xf32>
    %466 = vector.multi_reduction <maximumf>, %465, %cst_156 [2] : vector<2x8x8xf32> to vector<2x8xf32>
    %467 = vector.shape_cast %466 : vector<2x8xf32> to vector<2x8x1xf32>
    %468 = vector.broadcast %467 : vector<2x8x1xf32> to vector<2x8x8xf32>
    %469 = arith.subf %465, %468 : vector<2x8x8xf32>
    %470 = math.exp %469 : vector<2x8x8xf32>
    %cst_157 = arith.constant dense<0.000000e+00> : vector<2x8xf32>
    %471 = vector.multi_reduction <add>, %470, %cst_157 [2] : vector<2x8x8xf32> to vector<2x8xf32>
    %472 = vector.shape_cast %471 : vector<2x8xf32> to vector<2x8x1xf32>
    %473 = tpu.reciprocal %472 {approx = true} : vector<2x8x1xf32> -> vector<2x8x1xf32>
    %474 = vector.broadcast %473 : vector<2x8x1xf32> to vector<2x8x8xf32>
    %475 = arith.mulf %470, %474 : vector<2x8x8xf32>
    "tpu.trace_start"() <{level = 10 : i32, message = "bqk,bkd->bqd"}> : () -> ()
    %cst_158 = arith.constant dense<0.000000e+00> : vector<2x8x32xf32>
    %476 = tpu.matmul %475, %464, %cst_158 {dimension_numbers = #tpu.dot_dimension_numbers<[2], [1], [1], [2], [0, 0, 0, 1, 1, 2], [0], [0]>} : vector<2x8x8xf32>, vector<2x8x32xf32>, vector<2x8x32xf32> -> vector<2x8x32xf32>
    "tpu.trace_stop"() : () -> ()
    %477 = arith.addf %461, %476 : vector<2x8x32xf32>
    %478 = vector.extract_strided_slice %428 {offsets = [0, 0, 96], sizes = [2, 8, 32], strides = [1, 1, 1]} : vector<2x8x384xf32> to vector<2x8x32xf32>
    %479 = vector.extract_strided_slice %428 {offsets = [0, 0, 224], sizes = [2, 8, 32], strides = [1, 1, 1]} : vector<2x8x384xf32> to vector<2x8x32xf32>
    %480 = vector.extract_strided_slice %428 {offsets = [0, 0, 352], sizes = [2, 8, 32], strides = [1, 1, 1]} : vector<2x8x384xf32> to vector<2x8x32xf32>
    "tpu.trace_start"() <{level = 10 : i32, message = "bqd,bkd->bqk"}> : () -> ()
    %cst_159 = arith.constant dense<0.000000e+00> : vector<2x8x8xf32>
    %481 = tpu.matmul %478, %479, %cst_159 {dimension_numbers = #tpu.dot_dimension_numbers<[2], [2], [1], [1], [0, 0, 0, 1, 1, 1], [0], [0]>} : vector<2x8x32xf32>, vector<2x8x32xf32>, vector<2x8x8xf32> -> vector<2x8x8xf32>
    "tpu.trace_stop"() : () -> ()
    %cst_160 = arith.constant dense<0xFF800000> : vector<2x8xf32>
    %482 = vector.multi_reduction <maximumf>, %481, %cst_160 [2] : vector<2x8x8xf32> to vector<2x8xf32>
    %483 = vector.shape_cast %482 : vector<2x8xf32> to vector<2x8x1xf32>
    %484 = vector.broadcast %483 : vector<2x8x1xf32> to vector<2x8x8xf32>
    %485 = arith.subf %481, %484 : vector<2x8x8xf32>
    %486 = math.exp %485 : vector<2x8x8xf32>
    %cst_161 = arith.constant dense<0.000000e+00> : vector<2x8xf32>
    %487 = vector.multi_reduction <add>, %486, %cst_161 [2] : vector<2x8x8xf32> to vector<2x8xf32>
    %488 = vector.shape_cast %487 : vector<2x8xf32> to vector<2x8x1xf32>
    %489 = tpu.reciprocal %488 {approx = true} : vector<2x8x1xf32> -> vector<2x8x1xf32>
    %490 = vector.broadcast %489 : vector<2x8x1xf32> to vector<2x8x8xf32>
    %491 = arith.mulf %486, %490 : vector<2x8x8xf32>
    "tpu.trace_start"() <{level = 10 : i32, message = "bqk,bkd->bqd"}> : () -> ()
    %cst_162 = arith.constant dense<0.000000e+00> : vector<2x8x32xf32>
    %492 = tpu.matmul %491, %480, %cst_162 {dimension_numbers = #tpu.dot_dimension_numbers<[2], [1], [1], [2], [0, 0, 0, 1, 1, 2], [0], [0]>} : vector<2x8x8xf32>, vector<2x8x32xf32>, vector<2x8x32xf32> -> vector<2x8x32xf32>
    "tpu.trace_stop"() : () -> ()
    %493 = arith.addf %477, %492 : vector<2x8x32xf32>
    %cst_163 = arith.constant dense<0.000000e+00> : vector<2x8xf32>
    %494 = vector.multi_reduction <add>, %493, %cst_163 [2] : vector<2x8x32xf32> to vector<2x8xf32>
    %495 = vector.shape_cast %494 : vector<2x8xf32> to vector<2x8x1xf32>
    %cst_164 = arith.constant 3.200000e+01 : f32
    %496 = vector.broadcast %cst_164 : f32 to vector<2x8x1xf32>
    %497 = arith.divf %495, %496 : vector<2x8x1xf32>
    %498 = vector.broadcast %497 : vector<2x8x1xf32> to vector<2x8x32xf32>
    %499 = arith.subf %493, %498 : vector<2x8x32xf32>
    %500 = arith.mulf %499, %499 : vector<2x8x32xf32>
    %cst_165 = arith.constant dense<0.000000e+00> : vector<2x8xf32>
    %501 = vector.multi_reduction <add>, %500, %cst_165 [2] : vector<2x8x32xf32> to vector<2x8xf32>
    %502 = vector.shape_cast %501 : vector<2x8xf32> to vector<2x8x1xf32>
    %cst_166 = arith.constant 3.200000e+01 : f32
    %503 = vector.broadcast %cst_166 : f32 to vector<2x8x1xf32>
    %504 = arith.divf %502, %503 : vector<2x8x1xf32>
    %cst_167 = arith.constant 9.99999974E-6 : f32
    %505 = vector.broadcast %cst_167 : f32 to vector<2x8x1xf32>
    %506 = arith.addf %504, %505 : vector<2x8x1xf32>
    %507 = math.rsqrt %506 : vector<2x8x1xf32>
    %508 = vector.broadcast %507 : vector<2x8x1xf32> to vector<2x8x32xf32>
    %509 = arith.mulf %499, %508 : vector<2x8x32xf32>
    %510 = vector.shape_cast %422 : vector<1x32xf32> to vector<1x1x32xf32>
    %511 = vector.broadcast %510 : vector<1x1x32xf32> to vector<2x8x32xf32>
    %512 = arith.mulf %509, %511 : vector<2x8x32xf32>
    %513 = vector.shape_cast %424 : vector<1x32xf32> to vector<1x1x32xf32>
    %514 = vector.broadcast %513 : vector<1x1x32xf32> to vector<2x8x32xf32>
    %515 = arith.addf %512, %514 : vector<2x8x32xf32>
    %516 = arith.addf %515, %418 : vector<2x8x32xf32>
    %c4 = arith.constant 4 : index
    %c0_168 = arith.constant 0 : index
    %c0_169 = arith.constant 0 : index
    %517 = vector.load %arg0[%c4, %c0_168, %c0_169] : memref<6x32x384xbf16, #tpu.memory_space<vmem>>, vector<1x32x384xbf16>
    %518 = vector.shape_cast %517 : vector<1x32x384xbf16> to vector<32x384xbf16>
    %c4_170 = arith.constant 4 : index
    %c0_171 = arith.constant 0 : index
    %c0_172 = arith.constant 0 : index
    %519 = vector.load %arg1[%c4_170, %c0_171, %c0_172] : memref<6x1x32xf32, #tpu.memory_space<vmem>>, vector<1x1x32xf32>
    %520 = vector.shape_cast %519 : vector<1x1x32xf32> to vector<1x32xf32>
    %c4_173 = arith.constant 4 : index
    %c0_174 = arith.constant 0 : index
    %c0_175 = arith.constant 0 : index
    %521 = vector.load %arg2[%c4_173, %c0_174, %c0_175] : memref<6x1x32xf32, #tpu.memory_space<vmem>>, vector<1x1x32xf32>
    %522 = vector.shape_cast %521 : vector<1x1x32xf32> to vector<1x32xf32>
    %523 = vector.shape_cast %516 : vector<2x8x32xf32> to vector<16x32xf32>
    %524 = arith.truncf %523 : vector<16x32xf32> to vector<16x32xbf16>
    %cst_176 = arith.constant dense<0.000000e+00> : vector<16x384xf32>
    %525 = tpu.matmul %524, %518, %cst_176 {dimension_numbers = #tpu.dot_dimension_numbers<[1], [0], [0], [1], [0, 0, 1, 1], [], []>} : vector<16x32xbf16>, vector<32x384xbf16>, vector<16x384xf32> -> vector<16x384xf32>
    %526 = vector.shape_cast %525 : vector<16x384xf32> to vector<2x8x384xf32>
    %cst_177 = arith.constant 0.000000e+00 : f32
    %527 = vector.broadcast %cst_177 : f32 to vector<2x8x32xf32>
    %528 = vector.extract_strided_slice %526 {offsets = [0, 0, 0], sizes = [2, 8, 32], strides = [1, 1, 1]} : vector<2x8x384xf32> to vector<2x8x32xf32>
    %529 = vector.extract_strided_slice %526 {offsets = [0, 0, 128], sizes = [2, 8, 32], strides = [1, 1, 1]} : vector<2x8x384xf32> to vector<2x8x32xf32>
    %530 = vector.extract_strided_slice %526 {offsets = [0, 0, 256], sizes = [2, 8, 32], strides = [1, 1, 1]} : vector<2x8x384xf32> to vector<2x8x32xf32>
    "tpu.trace_start"() <{level = 10 : i32, message = "bqd,bkd->bqk"}> : () -> ()
    %cst_178 = arith.constant dense<0.000000e+00> : vector<2x8x8xf32>
    %531 = tpu.matmul %528, %529, %cst_178 {dimension_numbers = #tpu.dot_dimension_numbers<[2], [2], [1], [1], [0, 0, 0, 1, 1, 1], [0], [0]>} : vector<2x8x32xf32>, vector<2x8x32xf32>, vector<2x8x8xf32> -> vector<2x8x8xf32>
    "tpu.trace_stop"() : () -> ()
    %cst_179 = arith.constant dense<0xFF800000> : vector<2x8xf32>
    %532 = vector.multi_reduction <maximumf>, %531, %cst_179 [2] : vector<2x8x8xf32> to vector<2x8xf32>
    %533 = vector.shape_cast %532 : vector<2x8xf32> to vector<2x8x1xf32>
    %534 = vector.broadcast %533 : vector<2x8x1xf32> to vector<2x8x8xf32>
    %535 = arith.subf %531, %534 : vector<2x8x8xf32>
    %536 = math.exp %535 : vector<2x8x8xf32>
    %cst_180 = arith.constant dense<0.000000e+00> : vector<2x8xf32>
    %537 = vector.multi_reduction <add>, %536, %cst_180 [2] : vector<2x8x8xf32> to vector<2x8xf32>
    %538 = vector.shape_cast %537 : vector<2x8xf32> to vector<2x8x1xf32>
    %539 = tpu.reciprocal %538 {approx = true} : vector<2x8x1xf32> -> vector<2x8x1xf32>
    %540 = vector.broadcast %539 : vector<2x8x1xf32> to vector<2x8x8xf32>
    %541 = arith.mulf %536, %540 : vector<2x8x8xf32>
    "tpu.trace_start"() <{level = 10 : i32, message = "bqk,bkd->bqd"}> : () -> ()
    %cst_181 = arith.constant dense<0.000000e+00> : vector<2x8x32xf32>
    %542 = tpu.matmul %541, %530, %cst_181 {dimension_numbers = #tpu.dot_dimension_numbers<[2], [1], [1], [2], [0, 0, 0, 1, 1, 2], [0], [0]>} : vector<2x8x8xf32>, vector<2x8x32xf32>, vector<2x8x32xf32> -> vector<2x8x32xf32>
    "tpu.trace_stop"() : () -> ()
    %543 = arith.addf %527, %542 : vector<2x8x32xf32>
    %544 = vector.extract_strided_slice %526 {offsets = [0, 0, 32], sizes = [2, 8, 32], strides = [1, 1, 1]} : vector<2x8x384xf32> to vector<2x8x32xf32>
    %545 = vector.extract_strided_slice %526 {offsets = [0, 0, 160], sizes = [2, 8, 32], strides = [1, 1, 1]} : vector<2x8x384xf32> to vector<2x8x32xf32>
    %546 = vector.extract_strided_slice %526 {offsets = [0, 0, 288], sizes = [2, 8, 32], strides = [1, 1, 1]} : vector<2x8x384xf32> to vector<2x8x32xf32>
    "tpu.trace_start"() <{level = 10 : i32, message = "bqd,bkd->bqk"}> : () -> ()
    %cst_182 = arith.constant dense<0.000000e+00> : vector<2x8x8xf32>
    %547 = tpu.matmul %544, %545, %cst_182 {dimension_numbers = #tpu.dot_dimension_numbers<[2], [2], [1], [1], [0, 0, 0, 1, 1, 1], [0], [0]>} : vector<2x8x32xf32>, vector<2x8x32xf32>, vector<2x8x8xf32> -> vector<2x8x8xf32>
    "tpu.trace_stop"() : () -> ()
    %cst_183 = arith.constant dense<0xFF800000> : vector<2x8xf32>
    %548 = vector.multi_reduction <maximumf>, %547, %cst_183 [2] : vector<2x8x8xf32> to vector<2x8xf32>
    %549 = vector.shape_cast %548 : vector<2x8xf32> to vector<2x8x1xf32>
    %550 = vector.broadcast %549 : vector<2x8x1xf32> to vector<2x8x8xf32>
    %551 = arith.subf %547, %550 : vector<2x8x8xf32>
    %552 = math.exp %551 : vector<2x8x8xf32>
    %cst_184 = arith.constant dense<0.000000e+00> : vector<2x8xf32>
    %553 = vector.multi_reduction <add>, %552, %cst_184 [2] : vector<2x8x8xf32> to vector<2x8xf32>
    %554 = vector.shape_cast %553 : vector<2x8xf32> to vector<2x8x1xf32>
    %555 = tpu.reciprocal %554 {approx = true} : vector<2x8x1xf32> -> vector<2x8x1xf32>
    %556 = vector.broadcast %555 : vector<2x8x1xf32> to vector<2x8x8xf32>
    %557 = arith.mulf %552, %556 : vector<2x8x8xf32>
    "tpu.trace_start"() <{level = 10 : i32, message = "bqk,bkd->bqd"}> : () -> ()
    %cst_185 = arith.constant dense<0.000000e+00> : vector<2x8x32xf32>
    %558 = tpu.matmul %557, %546, %cst_185 {dimension_numbers = #tpu.dot_dimension_numbers<[2], [1], [1], [2], [0, 0, 0, 1, 1, 2], [0], [0]>} : vector<2x8x8xf32>, vector<2x8x32xf32>, vector<2x8x32xf32> -> vector<2x8x32xf32>
    "tpu.trace_stop"() : () -> ()
    %559 = arith.addf %543, %558 : vector<2x8x32xf32>
    %560 = vector.extract_strided_slice %526 {offsets = [0, 0, 64], sizes = [2, 8, 32], strides = [1, 1, 1]} : vector<2x8x384xf32> to vector<2x8x32xf32>
    %561 = vector.extract_strided_slice %526 {offsets = [0, 0, 192], sizes = [2, 8, 32], strides = [1, 1, 1]} : vector<2x8x384xf32> to vector<2x8x32xf32>
    %562 = vector.extract_strided_slice %526 {offsets = [0, 0, 320], sizes = [2, 8, 32], strides = [1, 1, 1]} : vector<2x8x384xf32> to vector<2x8x32xf32>
    "tpu.trace_start"() <{level = 10 : i32, message = "bqd,bkd->bqk"}> : () -> ()
    %cst_186 = arith.constant dense<0.000000e+00> : vector<2x8x8xf32>
    %563 = tpu.matmul %560, %561, %cst_186 {dimension_numbers = #tpu.dot_dimension_numbers<[2], [2], [1], [1], [0, 0, 0, 1, 1, 1], [0], [0]>} : vector<2x8x32xf32>, vector<2x8x32xf32>, vector<2x8x8xf32> -> vector<2x8x8xf32>
    "tpu.trace_stop"() : () -> ()
    %cst_187 = arith.constant dense<0xFF800000> : vector<2x8xf32>
    %564 = vector.multi_reduction <maximumf>, %563, %cst_187 [2] : vector<2x8x8xf32> to vector<2x8xf32>
    %565 = vector.shape_cast %564 : vector<2x8xf32> to vector<2x8x1xf32>
    %566 = vector.broadcast %565 : vector<2x8x1xf32> to vector<2x8x8xf32>
    %567 = arith.subf %563, %566 : vector<2x8x8xf32>
    %568 = math.exp %567 : vector<2x8x8xf32>
    %cst_188 = arith.constant dense<0.000000e+00> : vector<2x8xf32>
    %569 = vector.multi_reduction <add>, %568, %cst_188 [2] : vector<2x8x8xf32> to vector<2x8xf32>
    %570 = vector.shape_cast %569 : vector<2x8xf32> to vector<2x8x1xf32>
    %571 = tpu.reciprocal %570 {approx = true} : vector<2x8x1xf32> -> vector<2x8x1xf32>
    %572 = vector.broadcast %571 : vector<2x8x1xf32> to vector<2x8x8xf32>
    %573 = arith.mulf %568, %572 : vector<2x8x8xf32>
    "tpu.trace_start"() <{level = 10 : i32, message = "bqk,bkd->bqd"}> : () -> ()
    %cst_189 = arith.constant dense<0.000000e+00> : vector<2x8x32xf32>
    %574 = tpu.matmul %573, %562, %cst_189 {dimension_numbers = #tpu.dot_dimension_numbers<[2], [1], [1], [2], [0, 0, 0, 1, 1, 2], [0], [0]>} : vector<2x8x8xf32>, vector<2x8x32xf32>, vector<2x8x32xf32> -> vector<2x8x32xf32>
    "tpu.trace_stop"() : () -> ()
    %575 = arith.addf %559, %574 : vector<2x8x32xf32>
    %576 = vector.extract_strided_slice %526 {offsets = [0, 0, 96], sizes = [2, 8, 32], strides = [1, 1, 1]} : vector<2x8x384xf32> to vector<2x8x32xf32>
    %577 = vector.extract_strided_slice %526 {offsets = [0, 0, 224], sizes = [2, 8, 32], strides = [1, 1, 1]} : vector<2x8x384xf32> to vector<2x8x32xf32>
    %578 = vector.extract_strided_slice %526 {offsets = [0, 0, 352], sizes = [2, 8, 32], strides = [1, 1, 1]} : vector<2x8x384xf32> to vector<2x8x32xf32>
    "tpu.trace_start"() <{level = 10 : i32, message = "bqd,bkd->bqk"}> : () -> ()
    %cst_190 = arith.constant dense<0.000000e+00> : vector<2x8x8xf32>
    %579 = tpu.matmul %576, %577, %cst_190 {dimension_numbers = #tpu.dot_dimension_numbers<[2], [2], [1], [1], [0, 0, 0, 1, 1, 1], [0], [0]>} : vector<2x8x32xf32>, vector<2x8x32xf32>, vector<2x8x8xf32> -> vector<2x8x8xf32>
    "tpu.trace_stop"() : () -> ()
    %cst_191 = arith.constant dense<0xFF800000> : vector<2x8xf32>
    %580 = vector.multi_reduction <maximumf>, %579, %cst_191 [2] : vector<2x8x8xf32> to vector<2x8xf32>
    %581 = vector.shape_cast %580 : vector<2x8xf32> to vector<2x8x1xf32>
    %582 = vector.broadcast %581 : vector<2x8x1xf32> to vector<2x8x8xf32>
    %583 = arith.subf %579, %582 : vector<2x8x8xf32>
    %584 = math.exp %583 : vector<2x8x8xf32>
    %cst_192 = arith.constant dense<0.000000e+00> : vector<2x8xf32>
    %585 = vector.multi_reduction <add>, %584, %cst_192 [2] : vector<2x8x8xf32> to vector<2x8xf32>
    %586 = vector.shape_cast %585 : vector<2x8xf32> to vector<2x8x1xf32>
    %587 = tpu.reciprocal %586 {approx = true} : vector<2x8x1xf32> -> vector<2x8x1xf32>
    %588 = vector.broadcast %587 : vector<2x8x1xf32> to vector<2x8x8xf32>
    %589 = arith.mulf %584, %588 : vector<2x8x8xf32>
    "tpu.trace_start"() <{level = 10 : i32, message = "bqk,bkd->bqd"}> : () -> ()
    %cst_193 = arith.constant dense<0.000000e+00> : vector<2x8x32xf32>
    %590 = tpu.matmul %589, %578, %cst_193 {dimension_numbers = #tpu.dot_dimension_numbers<[2], [1], [1], [2], [0, 0, 0, 1, 1, 2], [0], [0]>} : vector<2x8x8xf32>, vector<2x8x32xf32>, vector<2x8x32xf32> -> vector<2x8x32xf32>
    "tpu.trace_stop"() : () -> ()
    %591 = arith.addf %575, %590 : vector<2x8x32xf32>
    %cst_194 = arith.constant dense<0.000000e+00> : vector<2x8xf32>
    %592 = vector.multi_reduction <add>, %591, %cst_194 [2] : vector<2x8x32xf32> to vector<2x8xf32>
    %593 = vector.shape_cast %592 : vector<2x8xf32> to vector<2x8x1xf32>
    %cst_195 = arith.constant 3.200000e+01 : f32
    %594 = vector.broadcast %cst_195 : f32 to vector<2x8x1xf32>
    %595 = arith.divf %593, %594 : vector<2x8x1xf32>
    %596 = vector.broadcast %595 : vector<2x8x1xf32> to vector<2x8x32xf32>
    %597 = arith.subf %591, %596 : vector<2x8x32xf32>
    %598 = arith.mulf %597, %597 : vector<2x8x32xf32>
    %cst_196 = arith.constant dense<0.000000e+00> : vector<2x8xf32>
    %599 = vector.multi_reduction <add>, %598, %cst_196 [2] : vector<2x8x32xf32> to vector<2x8xf32>
    %600 = vector.shape_cast %599 : vector<2x8xf32> to vector<2x8x1xf32>
    %cst_197 = arith.constant 3.200000e+01 : f32
    %601 = vector.broadcast %cst_197 : f32 to vector<2x8x1xf32>
    %602 = arith.divf %600, %601 : vector<2x8x1xf32>
    %cst_198 = arith.constant 9.99999974E-6 : f32
    %603 = vector.broadcast %cst_198 : f32 to vector<2x8x1xf32>
    %604 = arith.addf %602, %603 : vector<2x8x1xf32>
    %605 = math.rsqrt %604 : vector<2x8x1xf32>
    %606 = vector.broadcast %605 : vector<2x8x1xf32> to vector<2x8x32xf32>
    %607 = arith.mulf %597, %606 : vector<2x8x32xf32>
    %608 = vector.shape_cast %520 : vector<1x32xf32> to vector<1x1x32xf32>
    %609 = vector.broadcast %608 : vector<1x1x32xf32> to vector<2x8x32xf32>
    %610 = arith.mulf %607, %609 : vector<2x8x32xf32>
    %611 = vector.shape_cast %522 : vector<1x32xf32> to vector<1x1x32xf32>
    %612 = vector.broadcast %611 : vector<1x1x32xf32> to vector<2x8x32xf32>
    %613 = arith.addf %610, %612 : vector<2x8x32xf32>
    %614 = arith.addf %613, %516 : vector<2x8x32xf32>
    %c5 = arith.constant 5 : index
    %c0_199 = arith.constant 0 : index
    %c0_200 = arith.constant 0 : index
    %615 = vector.load %arg0[%c5, %c0_199, %c0_200] : memref<6x32x384xbf16, #tpu.memory_space<vmem>>, vector<1x32x384xbf16>
    %616 = vector.shape_cast %615 : vector<1x32x384xbf16> to vector<32x384xbf16>
    %c5_201 = arith.constant 5 : index
    %c0_202 = arith.constant 0 : index
    %c0_203 = arith.constant 0 : index
    %617 = vector.load %arg1[%c5_201, %c0_202, %c0_203] : memref<6x1x32xf32, #tpu.memory_space<vmem>>, vector<1x1x32xf32>
    %618 = vector.shape_cast %617 : vector<1x1x32xf32> to vector<1x32xf32>
    %c5_204 = arith.constant 5 : index
    %c0_205 = arith.constant 0 : index
    %c0_206 = arith.constant 0 : index
    %619 = vector.load %arg2[%c5_204, %c0_205, %c0_206] : memref<6x1x32xf32, #tpu.memory_space<vmem>>, vector<1x1x32xf32>
    %620 = vector.shape_cast %619 : vector<1x1x32xf32> to vector<1x32xf32>
    %621 = vector.shape_cast %614 : vector<2x8x32xf32> to vector<16x32xf32>
    %622 = arith.truncf %621 : vector<16x32xf32> to vector<16x32xbf16>
    %cst_207 = arith.constant dense<0.000000e+00> : vector<16x384xf32>
    %623 = tpu.matmul %622, %616, %cst_207 {dimension_numbers = #tpu.dot_dimension_numbers<[1], [0], [0], [1], [0, 0, 1, 1], [], []>} : vector<16x32xbf16>, vector<32x384xbf16>, vector<16x384xf32> -> vector<16x384xf32>
    %624 = vector.shape_cast %623 : vector<16x384xf32> to vector<2x8x384xf32>
    %cst_208 = arith.constant 0.000000e+00 : f32
    %625 = vector.broadcast %cst_208 : f32 to vector<2x8x32xf32>
    %626 = vector.extract_strided_slice %624 {offsets = [0, 0, 0], sizes = [2, 8, 32], strides = [1, 1, 1]} : vector<2x8x384xf32> to vector<2x8x32xf32>
    %627 = vector.extract_strided_slice %624 {offsets = [0, 0, 128], sizes = [2, 8, 32], strides = [1, 1, 1]} : vector<2x8x384xf32> to vector<2x8x32xf32>
    %628 = vector.extract_strided_slice %624 {offsets = [0, 0, 256], sizes = [2, 8, 32], strides = [1, 1, 1]} : vector<2x8x384xf32> to vector<2x8x32xf32>
    "tpu.trace_start"() <{level = 10 : i32, message = "bqd,bkd->bqk"}> : () -> ()
    %cst_209 = arith.constant dense<0.000000e+00> : vector<2x8x8xf32>
    %629 = tpu.matmul %626, %627, %cst_209 {dimension_numbers = #tpu.dot_dimension_numbers<[2], [2], [1], [1], [0, 0, 0, 1, 1, 1], [0], [0]>} : vector<2x8x32xf32>, vector<2x8x32xf32>, vector<2x8x8xf32> -> vector<2x8x8xf32>
    "tpu.trace_stop"() : () -> ()
    %cst_210 = arith.constant dense<0xFF800000> : vector<2x8xf32>
    %630 = vector.multi_reduction <maximumf>, %629, %cst_210 [2] : vector<2x8x8xf32> to vector<2x8xf32>
    %631 = vector.shape_cast %630 : vector<2x8xf32> to vector<2x8x1xf32>
    %632 = vector.broadcast %631 : vector<2x8x1xf32> to vector<2x8x8xf32>
    %633 = arith.subf %629, %632 : vector<2x8x8xf32>
    %634 = math.exp %633 : vector<2x8x8xf32>
    %cst_211 = arith.constant dense<0.000000e+00> : vector<2x8xf32>
    %635 = vector.multi_reduction <add>, %634, %cst_211 [2] : vector<2x8x8xf32> to vector<2x8xf32>
    %636 = vector.shape_cast %635 : vector<2x8xf32> to vector<2x8x1xf32>
    %637 = tpu.reciprocal %636 {approx = true} : vector<2x8x1xf32> -> vector<2x8x1xf32>
    %638 = vector.broadcast %637 : vector<2x8x1xf32> to vector<2x8x8xf32>
    %639 = arith.mulf %634, %638 : vector<2x8x8xf32>
    "tpu.trace_start"() <{level = 10 : i32, message = "bqk,bkd->bqd"}> : () -> ()
    %cst_212 = arith.constant dense<0.000000e+00> : vector<2x8x32xf32>
    %640 = tpu.matmul %639, %628, %cst_212 {dimension_numbers = #tpu.dot_dimension_numbers<[2], [1], [1], [2], [0, 0, 0, 1, 1, 2], [0], [0]>} : vector<2x8x8xf32>, vector<2x8x32xf32>, vector<2x8x32xf32> -> vector<2x8x32xf32>
    "tpu.trace_stop"() : () -> ()
    %641 = arith.addf %625, %640 : vector<2x8x32xf32>
    %642 = vector.extract_strided_slice %624 {offsets = [0, 0, 32], sizes = [2, 8, 32], strides = [1, 1, 1]} : vector<2x8x384xf32> to vector<2x8x32xf32>
    %643 = vector.extract_strided_slice %624 {offsets = [0, 0, 160], sizes = [2, 8, 32], strides = [1, 1, 1]} : vector<2x8x384xf32> to vector<2x8x32xf32>
    %644 = vector.extract_strided_slice %624 {offsets = [0, 0, 288], sizes = [2, 8, 32], strides = [1, 1, 1]} : vector<2x8x384xf32> to vector<2x8x32xf32>
    "tpu.trace_start"() <{level = 10 : i32, message = "bqd,bkd->bqk"}> : () -> ()
    %cst_213 = arith.constant dense<0.000000e+00> : vector<2x8x8xf32>
    %645 = tpu.matmul %642, %643, %cst_213 {dimension_numbers = #tpu.dot_dimension_numbers<[2], [2], [1], [1], [0, 0, 0, 1, 1, 1], [0], [0]>} : vector<2x8x32xf32>, vector<2x8x32xf32>, vector<2x8x8xf32> -> vector<2x8x8xf32>
    "tpu.trace_stop"() : () -> ()
    %cst_214 = arith.constant dense<0xFF800000> : vector<2x8xf32>
    %646 = vector.multi_reduction <maximumf>, %645, %cst_214 [2] : vector<2x8x8xf32> to vector<2x8xf32>
    %647 = vector.shape_cast %646 : vector<2x8xf32> to vector<2x8x1xf32>
    %648 = vector.broadcast %647 : vector<2x8x1xf32> to vector<2x8x8xf32>
    %649 = arith.subf %645, %648 : vector<2x8x8xf32>
    %650 = math.exp %649 : vector<2x8x8xf32>
    %cst_215 = arith.constant dense<0.000000e+00> : vector<2x8xf32>
    %651 = vector.multi_reduction <add>, %650, %cst_215 [2] : vector<2x8x8xf32> to vector<2x8xf32>
    %652 = vector.shape_cast %651 : vector<2x8xf32> to vector<2x8x1xf32>
    %653 = tpu.reciprocal %652 {approx = true} : vector<2x8x1xf32> -> vector<2x8x1xf32>
    %654 = vector.broadcast %653 : vector<2x8x1xf32> to vector<2x8x8xf32>
    %655 = arith.mulf %650, %654 : vector<2x8x8xf32>
    "tpu.trace_start"() <{level = 10 : i32, message = "bqk,bkd->bqd"}> : () -> ()
    %cst_216 = arith.constant dense<0.000000e+00> : vector<2x8x32xf32>
    %656 = tpu.matmul %655, %644, %cst_216 {dimension_numbers = #tpu.dot_dimension_numbers<[2], [1], [1], [2], [0, 0, 0, 1, 1, 2], [0], [0]>} : vector<2x8x8xf32>, vector<2x8x32xf32>, vector<2x8x32xf32> -> vector<2x8x32xf32>
    "tpu.trace_stop"() : () -> ()
    %657 = arith.addf %641, %656 : vector<2x8x32xf32>
    %658 = vector.extract_strided_slice %624 {offsets = [0, 0, 64], sizes = [2, 8, 32], strides = [1, 1, 1]} : vector<2x8x384xf32> to vector<2x8x32xf32>
    %659 = vector.extract_strided_slice %624 {offsets = [0, 0, 192], sizes = [2, 8, 32], strides = [1, 1, 1]} : vector<2x8x384xf32> to vector<2x8x32xf32>
    %660 = vector.extract_strided_slice %624 {offsets = [0, 0, 320], sizes = [2, 8, 32], strides = [1, 1, 1]} : vector<2x8x384xf32> to vector<2x8x32xf32>
    "tpu.trace_start"() <{level = 10 : i32, message = "bqd,bkd->bqk"}> : () -> ()
    %cst_217 = arith.constant dense<0.000000e+00> : vector<2x8x8xf32>
    %661 = tpu.matmul %658, %659, %cst_217 {dimension_numbers = #tpu.dot_dimension_numbers<[2], [2], [1], [1], [0, 0, 0, 1, 1, 1], [0], [0]>} : vector<2x8x32xf32>, vector<2x8x32xf32>, vector<2x8x8xf32> -> vector<2x8x8xf32>
    "tpu.trace_stop"() : () -> ()
    %cst_218 = arith.constant dense<0xFF800000> : vector<2x8xf32>
    %662 = vector.multi_reduction <maximumf>, %661, %cst_218 [2] : vector<2x8x8xf32> to vector<2x8xf32>
    %663 = vector.shape_cast %662 : vector<2x8xf32> to vector<2x8x1xf32>
    %664 = vector.broadcast %663 : vector<2x8x1xf32> to vector<2x8x8xf32>
    %665 = arith.subf %661, %664 : vector<2x8x8xf32>
    %666 = math.exp %665 : vector<2x8x8xf32>
    %cst_219 = arith.constant dense<0.000000e+00> : vector<2x8xf32>
    %667 = vector.multi_reduction <add>, %666, %cst_219 [2] : vector<2x8x8xf32> to vector<2x8xf32>
    %668 = vector.shape_cast %667 : vector<2x8xf32> to vector<2x8x1xf32>
    %669 = tpu.reciprocal %668 {approx = true} : vector<2x8x1xf32> -> vector<2x8x1xf32>
    %670 = vector.broadcast %669 : vector<2x8x1xf32> to vector<2x8x8xf32>
    %671 = arith.mulf %666, %670 : vector<2x8x8xf32>
    "tpu.trace_start"() <{level = 10 : i32, message = "bqk,bkd->bqd"}> : () -> ()
    %cst_220 = arith.constant dense<0.000000e+00> : vector<2x8x32xf32>
    %672 = tpu.matmul %671, %660, %cst_220 {dimension_numbers = #tpu.dot_dimension_numbers<[2], [1], [1], [2], [0, 0, 0, 1, 1, 2], [0], [0]>} : vector<2x8x8xf32>, vector<2x8x32xf32>, vector<2x8x32xf32> -> vector<2x8x32xf32>
    "tpu.trace_stop"() : () -> ()
    %673 = arith.addf %657, %672 : vector<2x8x32xf32>
    %674 = vector.extract_strided_slice %624 {offsets = [0, 0, 96], sizes = [2, 8, 32], strides = [1, 1, 1]} : vector<2x8x384xf32> to vector<2x8x32xf32>
    %675 = vector.extract_strided_slice %624 {offsets = [0, 0, 224], sizes = [2, 8, 32], strides = [1, 1, 1]} : vector<2x8x384xf32> to vector<2x8x32xf32>
    %676 = vector.extract_strided_slice %624 {offsets = [0, 0, 352], sizes = [2, 8, 32], strides = [1, 1, 1]} : vector<2x8x384xf32> to vector<2x8x32xf32>
    "tpu.trace_start"() <{level = 10 : i32, message = "bqd,bkd->bqk"}> : () -> ()
    %cst_221 = arith.constant dense<0.000000e+00> : vector<2x8x8xf32>
    %677 = tpu.matmul %674, %675, %cst_221 {dimension_numbers = #tpu.dot_dimension_numbers<[2], [2], [1], [1], [0, 0, 0, 1, 1, 1], [0], [0]>} : vector<2x8x32xf32>, vector<2x8x32xf32>, vector<2x8x8xf32> -> vector<2x8x8xf32>
    "tpu.trace_stop"() : () -> ()
    %cst_222 = arith.constant dense<0xFF800000> : vector<2x8xf32>
    %678 = vector.multi_reduction <maximumf>, %677, %cst_222 [2] : vector<2x8x8xf32> to vector<2x8xf32>
    %679 = vector.shape_cast %678 : vector<2x8xf32> to vector<2x8x1xf32>
    %680 = vector.broadcast %679 : vector<2x8x1xf32> to vector<2x8x8xf32>
    %681 = arith.subf %677, %680 : vector<2x8x8xf32>
    %682 = math.exp %681 : vector<2x8x8xf32>
    %cst_223 = arith.constant dense<0.000000e+00> : vector<2x8xf32>
    %683 = vector.multi_reduction <add>, %682, %cst_223 [2] : vector<2x8x8xf32> to vector<2x8xf32>
    %684 = vector.shape_cast %683 : vector<2x8xf32> to vector<2x8x1xf32>
    %685 = tpu.reciprocal %684 {approx = true} : vector<2x8x1xf32> -> vector<2x8x1xf32>
    %686 = vector.broadcast %685 : vector<2x8x1xf32> to vector<2x8x8xf32>
    %687 = arith.mulf %682, %686 : vector<2x8x8xf32>
    "tpu.trace_start"() <{level = 10 : i32, message = "bqk,bkd->bqd"}> : () -> ()
    %cst_224 = arith.constant dense<0.000000e+00> : vector<2x8x32xf32>
    %688 = tpu.matmul %687, %676, %cst_224 {dimension_numbers = #tpu.dot_dimension_numbers<[2], [1], [1], [2], [0, 0, 0, 1, 1, 2], [0], [0]>} : vector<2x8x8xf32>, vector<2x8x32xf32>, vector<2x8x32xf32> -> vector<2x8x32xf32>
    "tpu.trace_stop"() : () -> ()
    %689 = arith.addf %673, %688 : vector<2x8x32xf32>
    %cst_225 = arith.constant dense<0.000000e+00> : vector<2x8xf32>
    %690 = vector.multi_reduction <add>, %689, %cst_225 [2] : vector<2x8x32xf32> to vector<2x8xf32>
    %691 = vector.shape_cast %690 : vector<2x8xf32> to vector<2x8x1xf32>
    %cst_226 = arith.constant 3.200000e+01 : f32
    %692 = vector.broadcast %cst_226 : f32 to vector<2x8x1xf32>
    %693 = arith.divf %691, %692 : vector<2x8x1xf32>
    %694 = vector.broadcast %693 : vector<2x8x1xf32> to vector<2x8x32xf32>
    %695 = arith.subf %689, %694 : vector<2x8x32xf32>
    %696 = arith.mulf %695, %695 : vector<2x8x32xf32>
    %cst_227 = arith.constant dense<0.000000e+00> : vector<2x8xf32>
    %697 = vector.multi_reduction <add>, %696, %cst_227 [2] : vector<2x8x32xf32> to vector<2x8xf32>
    %698 = vector.shape_cast %697 : vector<2x8xf32> to vector<2x8x1xf32>
    %cst_228 = arith.constant 3.200000e+01 : f32
    %699 = vector.broadcast %cst_228 : f32 to vector<2x8x1xf32>
    %700 = arith.divf %698, %699 : vector<2x8x1xf32>
    %cst_229 = arith.constant 9.99999974E-6 : f32
    %701 = vector.broadcast %cst_229 : f32 to vector<2x8x1xf32>
    %702 = arith.addf %700, %701 : vector<2x8x1xf32>
    %703 = math.rsqrt %702 : vector<2x8x1xf32>
    %704 = vector.broadcast %703 : vector<2x8x1xf32> to vector<2x8x32xf32>
    %705 = arith.mulf %695, %704 : vector<2x8x32xf32>
    %706 = vector.shape_cast %618 : vector<1x32xf32> to vector<1x1x32xf32>
    %707 = vector.broadcast %706 : vector<1x1x32xf32> to vector<2x8x32xf32>
    %708 = arith.mulf %705, %707 : vector<2x8x32xf32>
    %709 = vector.shape_cast %620 : vector<1x32xf32> to vector<1x1x32xf32>
    %710 = vector.broadcast %709 : vector<1x1x32xf32> to vector<2x8x32xf32>
    %711 = arith.addf %708, %710 : vector<2x8x32xf32>
    %712 = arith.addf %711, %614 : vector<2x8x32xf32>
    %713 = arith.negf %712 : vector<2x8x32xf32>
    %714 = math.exp %713 : vector<2x8x32xf32>
    %cst_230 = arith.constant 1.000000e+00 : f32
    %715 = vector.broadcast %cst_230 : f32 to vector<2x8x32xf32>
    %716 = arith.addf %715, %714 : vector<2x8x32xf32>
    %717 = arith.divf %715, %716 : vector<2x8x32xf32>
    %c0_231 = arith.constant 0 : index
    %c0_232 = arith.constant 0 : index
    %c0_233 = arith.constant 0 : index
    %718 = vector.load %arg7[%c0_231, %c0_232, %c0_233] : memref<2x8x32xf32, #tpu.memory_space<vmem>>, vector<2x8x32xf32>
    tpu.vector_store %arg7[%c0_231, %c0_232, %c0_233], %717 {strides = array<i32>} : memref<2x8x32xf32, #tpu.memory_space<vmem>>, vector<2x8x32xf32>,
    %c0_234 = arith.constant 0 : index
    %719 = memref.load %arg8[%c0_234] : memref<1xf32, #tpu.memory_space<smem>>
    memref.store %320, %arg8[%c0_234] : memref<1xf32, #tpu.memory_space<smem>>
    return
  }
}

</mosaic_0001>

<bundles_post_ra>
// kernel: transformer_forward.1
= control target key start
LH: loop header
LB: loop body
LE: loop exit
PB: predicated region body
PF: predicated region fallthrough
CT: control target
= control target key end

     0   :  { %14 = vsyncpa [#allocation3], 0  ;;  %s13608_s0 = inlined_call_operand.hbm [shape: bf16[6,32,384], index: 0, kind: input, shape index: {}]   ;;  %s13609_s1 = inlined_call_operand.hbm [shape: f32[6,1,32], index: 1, kind: input, shape index: {}]   ;;  %s13610_s2 = inlined_call_operand.hbm [shape: f32[6,1,32], index: 2, kind: input, shape index: {}]   ;;  %s13611_s3 = inlined_call_operand.hbm [shape: bf16[2,32,384], index: 3, kind: input, shape index: {}]   ;;  %s13612_s4 = inlined_call_operand.vmem [shape: f32[2,1,32], index: 4, kind: input, shape index: {}]   ;;  %s13613_s5 = inlined_call_operand.vmem [shape: f32[2,1,32], index: 5, kind: input, shape index: {}]   ;;  %s13614_s6 = inlined_call_operand.vmem [shape: f32[2,8,32], index: 6, kind: input, shape index: {}]   ;;  %s13615_s7 = inlined_call_operand.hbm [shape: f32[2,8,32], index: 7, kind: output, shape index: {0}]   ;;  %s13616_s8 = inlined_call_operand.hbm [shape: f32[1], index: 8, kind: output, shape index: {1}]  }
   0x1   :  { %15 = vsyncpa [#allocation7], 0 }
   0x2   :  { %16 = vsyncpa [#allocation10], 0 }
   0x3   :  { %17 = vsyncpa [#allocation4], 0 }
   0x4   :  { %18 = vsyncpa [#allocation5], 0  ;;  %s12292_s27 = smov [#allocation6]   ;;  %s12162_s9 = scalar_lea.hbm %s13609_s1, 96 }
   0x5   :  { %s36_s28 = sshll.u32 %s12292_s27, 4  ;;  %p12163_p0 = scmp.ne.s32.totalorder %s13609_s1, %s12162_s9  ;;  %s37_s28 = int_to_ptr.vmem [resolvable:$true] %s36_s28 }
   0x6   :  { %p12166_p1 = scmp.lt.u32.totalorder %s12162_s9, %s13609_s1 }
   0x8   :  { %p12168_p2 = pnand %p12166_p1, %p12163_p0 }
   0xa   :  { %12171 = shalt.err (!%p12168_p2)
}
   0xb   :  { %s12172_s14 = scalar_lea.vmem %s37_s28, 96  ;;  %p12177_p4 = scmp.lt.s32.totalorder %s37_s28, %s37_s28 }
   0xc   :  { %p12173_p3 = scmp.ne.s32.totalorder %s37_s28, %s12172_s14  ;;  %p12178_p5 = scmp.lt.s32.totalorder %s12172_s14, %s12172_s14 }
   0xe   :  { %p12179_p6 = por %p12178_p5, %p12177_p4 }
  0x10   :  { %p12180_p7 = pnand %p12179_p6, %p12173_p3 }
  0x12   :  { %12183 = shalt.err (!%p12180_p7)
}
  0x13   :  { %s12293_s15 = smov 16   ;;  %s12294_s16 = smov 1  }
  0x14   :  { %42 = dma.hbm_to_vmem [thread:$0]  %s13609_s1, 96, %s37_s28, [#allocation7], %s12293_s15, %s12293_s15, %s12294_s16  }
  0x15   :  { %s12295_s19 = smov [#allocation2]   ;;  %s12184_s23 = scalar_lea.hbm %s13608_s0, 4608 }
  0x16   :  { %s24_s20 = sshll.u32 %s12295_s19, 4  ;;  %p12185_p8 = scmp.ne.s32.totalorder %s13608_s0, %s12184_s23  ;;  %s25_s20 = int_to_ptr.vmem [resolvable:$true] %s24_s20 }
  0x17   :  { %p12188_p9 = scmp.lt.u32.totalorder %s12184_s23, %s13608_s0 }
  0x19   :  { %p12190_p10 = pnand %p12188_p9, %p12185_p8 }
  0x1b   :  { %12193 = shalt.err (!%p12190_p10)
}
  0x1c   :  { %s12194_s29 = scalar_lea.vmem %s25_s20, 4608  ;;  %p12199_p12 = scmp.lt.s32.totalorder %s25_s20, %s25_s20 }
  0x1d   :  { %p12195_p11 = scmp.ne.s32.totalorder %s25_s20, %s12194_s29  ;;  %p12200_p13 = scmp.lt.s32.totalorder %s12194_s29, %s12194_s29 }
  0x1f   :  { %p12201_p0 = por %p12200_p13, %p12199_p12 }
  0x21   :  { %p12202_p1 = pnand %p12201_p0, %p12195_p11 }
  0x23   :  { %12205 = shalt.err (!%p12202_p1)
}
  0x24   :  { %s12296_s1 = smov 192   ;;  %s12297_s28 = smov 12  }
  0x25   :  { %30 = dma.hbm_to_vmem [thread:$0]  %s13608_s0, 4608, %s25_s20, [#allocation3], %s12296_s1, %s12296_s1, %s12297_s28  }
  0x26   :  { %s12298_s10 = smov [#allocation8]   ;;  %s12299_s12 = smov [#allocation9]  }
  0x27   :  { %s48_s11 = sshll.u32 %s12298_s10, 4  ;;  %s60_s13 = sshll.u32 %s12299_s12, 4  ;;  %s49_s11 = int_to_ptr.vmem [resolvable:$true] %s48_s11  ;;  %s12385_s13 = int_to_ptr.vmem [resolvable:$true] %s60_s13 }
  0x28   :  { %s12206_s18 = scalar_lea.hbm %s13610_s2, 96 }
  0x29   :  { %p12207_p2 = scmp.ne.s32.totalorder %s13610_s2, %s12206_s18  ;;  %p12210_p3 = scmp.lt.u32.totalorder %s12206_s18, %s13610_s2 }
  0x2b   :  { %p12212_p4 = pnand %p12210_p3, %p12207_p2 }
  0x2d   :  { %12215 = shalt.err (!%p12212_p4)
}
  0x2e   :  { %s12216_s0 = scalar_lea.vmem %s49_s11, 96  ;;  %p12221_p6 = scmp.lt.s32.totalorder %s49_s11, %s49_s11 }
  0x2f   :  { %p12217_p5 = scmp.ne.s32.totalorder %s49_s11, %s12216_s0  ;;  %p12222_p7 = scmp.lt.s32.totalorder %s12216_s0, %s12216_s0 }
  0x31   :  { %p12223_p8 = por %p12222_p7, %p12221_p6 }
  0x33   :  { %p12224_p9 = pnand %p12223_p8, %p12217_p5 }
  0x35   :  { %12227 = shalt.err (!%p12224_p9)
}
  0x36   :  { %54 = dma.hbm_to_vmem [thread:$0]  %s13610_s2, 96, %s49_s11, [#allocation7], %s12293_s15, %s12293_s15, %s12294_s16  }
  0x37   :  { %s12228_s27 = scalar_lea.hbm %s13611_s3, 1536 }
  0x38   :  { %p12229_p10 = scmp.ne.s32.totalorder %s13611_s3, %s12228_s27  ;;  %p12232_p11 = scmp.lt.u32.totalorder %s12228_s27, %s13611_s3 }
  0x3a   :  { %p12234_p12 = pnand %p12232_p11, %p12229_p10 }
  0x3c   :  { %12237 = shalt.err (!%p12234_p12)
}
  0x3d   :  { %s12238_s12 = scalar_lea.vmem %s12385_s13, 1536  ;;  %p12243_p0 = scmp.lt.s32.totalorder %s12385_s13, %s12385_s13 }
  0x3e   :  { %p12239_p13 = scmp.ne.s32.totalorder %s12385_s13, %s12238_s12  ;;  %p12244_p1 = scmp.lt.s32.totalorder %s12238_s12, %s12238_s12 }
  0x40   :  { %p12245_p2 = por %p12244_p1, %p12243_p0 }
  0x42   :  { %p12246_p3 = pnand %p12245_p2, %p12239_p13 }
  0x44   :  { %12249 = shalt.err (!%p12246_p3)
}
  0x45   :  { %66 = dma.hbm_to_vmem [thread:$0]  %s13611_s3, 1536, %s12385_s13, [#allocation10], %s12296_s1, %s12296_s1, %s12297_s28  }
  0x46   :  { %12282 = dma.done.wait [#allocation3], 4608  }
  0x47   :  { %12283 = vsyncadd [#allocation3], 4294962688 }
  0x48   :  { %12284 = dma.done.wait [#allocation7], 192  }
  0x49   :  { %12285 = vsyncadd [#allocation7], 4294967104 }
  0x4a   :  { %12286 = dma.done.wait [#allocation10], 1536  }
  0x4b   :  { %12287 = vsyncadd [#allocation10], 4294965760  ;;  %v12300_v0 = vmov 0   ;;  %v12301_v1 = vmov 0.0   ;;  %vm12302_vm0 = vmmov 0   ;;  %vm139_vm1 = vcmask 261120  }
  0x4c   :  { %175 = vmatprep.mubr.bf16.mxu0 %v12300_v0  ;;  %11118 = vmatprep.subr.bf16.mxu1 %v12301_v1  ;;  %v11838_v2 = vld [vmem:[#allocation2 + $0x34] ss:$12 sps:$4 sm:$0xff]   ;;  %v11840_v3 = vld [vmem:[#allocation2 + $0x30] ss:$12 sps:$4 sm:$0xff]   ;;  %v11841_v4 = vld [vmem:[#allocation2 + $0x4c] ss:$12 sps:$4 sm:$0xff]  }
  0x4d   :  { %11122 = vmatprep.mubr.msk.bf16.mxu1 %vm12302_vm0, %v12301_v1  ;;  %143 = vmatprep.subr.bf16.mxu0 %v11838_v2  ;;  %v11843_v5 = vld [vmem:[#allocation2 + $0x48] ss:$12 sps:$4 sm:$0xff]   ;;  %v12426_v6 = vld [vmem:[#allocation8] ss:$0 sm:$0xff]  ;;  %v11845_v8 = vld [vmem:[#allocation2 + $0x50] ss:$12 sps:$4 sm:$0xff]  }
  0x4e   :  { %144 = vmatpush1.bf16.msra.mxu0 %v11840_v3  ;;  %v11844_v7 = vld [vmem:[#allocation2 + $0x38] ss:$12 sps:$4 sm:$0xff]   ;;  %v106_v9 = vpack.c.bf16 %v12426_v6, %v12426_v6  ;;  %s12303_s3 = smov 96   ;;  %vm379_vm2 = vcmask 64512   ;;  %s12304_s16 = smov 64  }
  0x4f   :  { %145 = vmatprep.subr.bf16.mxu0 %v11841_v4  ;;  %11119 = vmatpush3.bf16.msra.mxu1 %v11844_v7  ;;  %s12305_s1 = smov 32   ;;  %s12250_s26 = scalar_lea.hbm %s13616_s8, 16 }
  0x50   :  { %11120 = vmatprep.subr.bf16.mxu1 %v12301_v1  ;;  %p12251_p4 = scmp.ne.s32.totalorder %s13616_s8, %s12250_s26  ;;  %p12254_p5 = scmp.lt.u32.totalorder %s12250_s26, %s13616_s8 }
  0x52   :  { %146 = vmatpush1.bf16.msra.mxu0 %v11843_v5  ;;  %p12256_p6 = pnand %p12254_p5, %p12251_p4 }
  0x53   :  { %11126 = vmatprep.subr.mxu0 %v12301_v1  ;;  %11121 = vmatpush3.bf16.msra.mxu1 %v11845_v8 }
  0x54   :  { %11131 = vmatprep.subr.mxu1 %v12301_v1 }
  0x55   :  { %10637 = vmatmul.mubr.msk.bf16.vlgmr.msra.gmra.mrb[0].mxu0 %vm139_vm1, %v106_v9 }
  0x56   :  { %11128 = vmatprep.mubr.msk.f32.mxu0 %vm12302_vm0, %v12301_v1  ;;  %11123 = vmatmul.mubr.msk.bf16.vlgmr.msra.gmra.mrb[0].mxu1 %vm139_vm1, %v106_v9 }
  0x57   :  { %11133 = vmatprep.mubr.msk.f32.mxu1 %vm12302_vm0, %v12301_v1 }
 0x128   :  { %v12439_v10 = vpop.f32.mrb[0].mxu0 }
 0x129   :  { %402 = vrot.lane.b32.xlu1 %v12439_v10, %s12303_s3  ;;  %v12443_v11 = vpop.f32.mrb[1].mxu0  ;;  %v12451_v13 = vpop.f32.mrb[0].mxu1 }
 0x12a   :  { %404 = vrot.lane.b32.xlu0 %v12443_v11, %s12303_s3  ;;  %v12447_v12 = vpop.f32.mrb[2].mxu0  ;;  %11127 = vmatpush3.xpose.msk.msra.mxu0 %vm139_vm1, %v12443_v11  ;;  %v11124_v15 = vpop.f32.mrb[1].mxu1 }
 0x12b   :  { %v12453_v14 = vpop.f32.mrb[3].mxu0  ;;  %11136 = vmatprep.subr.mxu0 %v12301_v1  ;;  %v12458_v16 = vpop.f32.mrb[2].mxu1 }
 0x12c   :  { %11132 = vmatpush3.xpose.msk.msra.mxu1 %vm139_vm1, %v12453_v14  ;;  %v11125_v17 = vpop.f32.mrb[3].mxu1 }
 0x12d   :  { %11129 = vmatmul.mubr.msk.f32.vlgmr.msra.gmra.mrb[4].mxu0 %vm139_vm1, %v12439_v10  ;;  %480 = vrot.lane.b32.xlu1 %v12447_v12, %s12303_s3 }
 0x12e   :  { %482 = vrot.lane.b32.xlu0 %v12453_v14, %s12303_s3  ;;  %11138 = vmatprep.mubr.msk.f32.mxu0 %vm12302_vm0, %v12301_v1 }
 0x12f   :  { %11134 = vmatmul.mubr.msk.f32.vlgmr.msra.gmra.mrb[4].mxu1 %vm139_vm1, %v12447_v12  ;;  %11141 = vmatprep.subr.mxu1 %v12301_v1 }
 0x130   :  { %11143 = vmatprep.mubr.msk.f32.mxu1 %vm12302_vm0, %v12301_v1 }
 0x19b   :  { %v403_v19 = vpop.permute.xlu1 %402 }
 0x19c   :  { %v405_v18 = vpop.permute.xlu0 %404 }
 0x19d   :  { %11137 = vmatpush3.xpose.msk.msra.mxu0 %vm139_vm1, %v405_v18 }
 0x19e   :  { %11146 = vmatprep.subr.mxu0 %v12301_v1 }
 0x19f   :  { %v481_v21 = vpop.permute.xlu1 %480 }
 0x1a0   :  { %11139 = vmatmul.mubr.msk.f32.vlgmr.msra.gmra.mrb[6].mxu0 %vm139_vm1, %v403_v19  ;;  %v483_v20 = vpop.permute.xlu0 %482 }
 0x1a1   :  { %11142 = vmatpush3.xpose.msk.msra.mxu1 %vm139_vm1, %v483_v20  ;;  %11148 = vmatprep.mubr.msk.f32.mxu0 %vm12302_vm0, %v12301_v1 }
 0x1a2   :  { %11151 = vmatprep.subr.mxu1 %v12301_v1 }
 0x1a4   :  { %11144 = vmatmul.mubr.msk.f32.vlgmr.msra.gmra.mrb[6].mxu1 %vm139_vm1, %v481_v21 }
 0x1a5   :  { %11153 = vmatprep.mubr.msk.f32.mxu1 %vm12302_vm0, %v12301_v1 }
 0x200   :  { %v299_v22 = vpop.f32.mrb[4].mxu0 }
 0x201   :  { %v11130_v23 = vpop.f32.mrb[5].mxu0  ;;  %v380_v32 = vsel %vm379_vm2, %v299_v22, -inf }
 0x202   :  { %v375_v24 = vpop.f32.mrb[4].mxu1 }
 0x203   :  { %v11135_v25 = vpop.f32.mrb[5].mxu1  ;;  %v383_v33 = vsel %vm379_vm2, %v375_v24, -inf }
 0x273   :  { %v476_v26 = vpop.f32.mrb[6].mxu0 }
 0x274   :  { %v11140_v27 = vpop.f32.mrb[7].mxu0  ;;  %v558_v28 = vsel %vm379_vm2, %v476_v26, -inf }
 0x275   :  { %559 = vmax.xlane.f32.xlu0 %v558_v28 }
 0x277   :  { %v554_v29 = vpop.f32.mrb[6].mxu1 }
 0x278   :  { %v11145_v30 = vpop.f32.mrb[7].mxu1  ;;  %v561_v31 = vsel %vm379_vm2, %v554_v29, -inf }
 0x279   :  { %562 = vmax.xlane.f32.xlu1 %v561_v31  ;;  %381 = vmax.xlane.f32.xlu0 %v380_v32 }
 0x27d   :  { %384 = vmax.xlane.f32.xlu0 %v383_v33 }
 0x28a   :  { %581 = vrot.lane.b32.xlu1 %v12451_v13, %s12303_s3 }
 0x302   :  { %v560_v34 = vpop.xlane.xlu0 %559 }
 0x303   :  { %v564_v35 = vsub.f32 %v476_v26, %v560_v34 }
 0x305   :  { %v566_v41 = vmul.f32 1.442695, %v564_v35 }
 0x306   :  { %v563_v36 = vpop.xlane.xlu1 %562  ;;  %v382_v37 = vpop.xlane.xlu0 %381 }
 0x307   :  { %v386_v38 = vsub.f32 %v299_v22, %v382_v37  ;;  %v565_v39 = vsub.f32 %v554_v29, %v563_v36 }
 0x309   :  { %v388_v40 = vmul.f32 1.442695, %v386_v38  ;;  %v568_v45 = vmul.f32 1.442695, %v565_v39 }
 0x30a   :  { %v582_v42 = vpop.permute.xlu1 %581  ;;  %v385_v43 = vpop.xlane.xlu0 %384 }
 0x30b   :  { %v387_v44 = vsub.f32 %v375_v24, %v385_v43  ;;  %11147 = vmatpush3.msra.mxu0 %v582_v42  ;;  %11894 = vpow2.f32 %v388_v40 }
 0x30c   :  { %11156 = vmatprep.subr.mxu0 %v12301_v1  ;;  %11896 = vpow2.f32 %v566_v41 }
 0x30d   :  { %v390_v46 = vmul.f32 1.442695, %v387_v44 }
 0x30f   :  { %11898 = vpow2.f32 %v390_v46 }
 0x310   :  { %11900 = vpow2.f32 %v568_v45 }
 0x315   :  { %v11895_v47 = vpop.eup %11894 }
 0x316   :  { %v392_v48 = vsel %vm379_vm2, %v11895_v47, 0.0  ;;  %v11897_v49 = vpop.eup %11896 }
 0x317   :  { %393 = vadd.xlane.f32.xlu1 %v392_v48  ;;  %v570_v53 = vsel %vm379_vm2, %v11897_v49, 0.0 }
 0x319   :  { %v11899_v50 = vpop.eup %11898 }
 0x31a   :  { %v395_v51 = vsel %vm379_vm2, %v11899_v50, 0.0  ;;  %v11901_v52 = vpop.eup %11900 }
 0x31b   :  { %396 = vadd.xlane.f32.xlu0 %v395_v51  ;;  %571 = vadd.xlane.f32.xlu1 %v570_v53  ;;  %v573_v54 = vsel %vm379_vm2, %v11901_v52, 0.0 }
 0x31f   :  { %574 = vadd.xlane.f32.xlu0 %v573_v54 }
 0x32c   :  { %882 = vrot.lane.b32.xlu1 %v12443_v11, %s12304_s16 }
 0x330   :  { %960 = vrot.lane.b32.xlu1 %v12453_v14, %s12304_s16 }
 0x334   :  { %958 = vrot.lane.b32.xlu1 %v12447_v12, %s12304_s16 }
 0x335   :  { %658 = vrot.lane.b32.xlu0 %v12458_v16, %s12303_s3 }
 0x339   :  { %880 = vrot.lane.b32.xlu0 %v12439_v10, %s12304_s16 }
 0x3a4   :  { %v394_v55 = vpop.xlane.xlu1 %393 }
 0x3a8   :  { %v397_v56 = vpop.xlane.xlu0 %396  ;;  %v572_v57 = vpop.xlane.xlu1 %571 }
 0x3a9   :  { %11902 = vrcp.f32 %v572_v57 }
 0x3ac   :  { %v575_v58 = vpop.xlane.xlu0 %574  ;;  %v883_v2 = vpop.permute.xlu1 %882 }
 0x3ad   :  { %11904 = vrcp.f32 %v575_v58 }
 0x3ae   :  { %11906 = vrcp.f32 %v394_v55 }
 0x3af   :  { %11908 = vrcp.f32 %v397_v56 }
 0x3b0   :  { %v659_v59 = vpop.permute.xlu0 %658  ;;  %v961_v7 = vpop.permute.xlu1 %960 }
 0x3b1   :  { %11152 = vmatpush3.msra.mxu1 %v659_v59 }
 0x3b2   :  { %11161 = vmatprep.subr.mxu1 %v12301_v1 }
 0x3b3   :  { %v11903_v60 = vpop.eup %11902 }
 0x3b4   :  { %v578_v61 = vmul.f32 %v11903_v60, %v11897_v49  ;;  %v881_v9 = vpop.permute.xlu0 %880  ;;  %v959_v15 = vpop.permute.xlu1 %958 }
 0x3b6   :  { %11149 = vmatmul.mubr.msk.f32.vlgmr.msra.gmra.mrb[8].mxu0 %vm379_vm2, %v578_v61 }
 0x3b7   :  { %v11905_v62 = vpop.eup %11904  ;;  %11157 = vmatpush3.msra.mxu0 %v12451_v13  ;;  %11158 = vmatprep.mubr.msk.f32.mxu0 %vm12302_vm0, %v12301_v1 }
 0x3b8   :  { %v579_v63 = vmul.f32 %v11905_v62, %v11901_v52  ;;  %11166 = vmatprep.subr.mxu0 %v12301_v1  ;;  %v11907_v3 = vpop.eup %11906 }
 0x3b9   :  { %v11909_v4 = vpop.eup %11908  ;;  %v400_v5 = vmul.f32 %v11907_v3, %v11895_v47 }
 0x3ba   :  { %11154 = vmatmul.mubr.msk.f32.vlgmr.msra.gmra.mrb[8].mxu1 %vm379_vm2, %v579_v63  ;;  %v401_v8 = vmul.f32 %v11909_v4, %v11899_v50 }
 0x3bb   :  { %11162 = vmatpush3.msra.mxu1 %v12458_v16  ;;  %11163 = vmatprep.mubr.msk.f32.mxu1 %vm12302_vm0, %v12301_v1 }
 0x3bc   :  { %11171 = vmatprep.subr.mxu1 %v12301_v1 }
 0x3be   :  { %11159 = vmatmul.mubr.msk.f32.vlgmr.msra.gmra.mrb[8].mxu0 %vm379_vm2, %v400_v5 }
 0x3bf   :  { %11167 = vmatpush3.xpose.msk.msra.mxu0 %vm139_vm1, %v883_v2  ;;  %11168 = vmatprep.mubr.msk.f32.mxu0 %vm12302_vm0, %v12301_v1 }
 0x3c0   :  { %11176 = vmatprep.subr.mxu0 %v12301_v1 }
 0x3c2   :  { %11164 = vmatmul.mubr.msk.f32.vlgmr.msra.gmra.mrb[8].mxu1 %vm379_vm2, %v401_v8  ;;  %11169 = vmatmul.mubr.msk.f32.vlgmr.msra.gmra.mrb[10].mxu0 %vm139_vm1, %v881_v9 }
 0x3c3   :  { %11172 = vmatpush3.xpose.msk.msra.mxu1 %vm139_vm1, %v961_v7  ;;  %11173 = vmatprep.mubr.msk.f32.mxu1 %vm12302_vm0, %v12301_v1 }
 0x3c4   :  { %11181 = vmatprep.subr.mxu1 %v12301_v1  ;;  %11178 = vmatprep.mubr.msk.f32.mxu0 %vm12302_vm0, %v12301_v1 }
 0x3c6   :  { %11174 = vmatmul.mubr.msk.f32.vlgmr.msra.gmra.mrb[10].mxu1 %vm139_vm1, %v959_v15 }
 0x3c7   :  { %11183 = vmatprep.mubr.msk.f32.mxu1 %vm12302_vm0, %v12301_v1 }
 0x495   :  { %v954_v17 = vpop.f32.mrb[10].mxu0 }
 0x496   :  { %v11170_v18 = vpop.f32.mrb[11].mxu0  ;;  %v1036_v19 = vsel %vm379_vm2, %v954_v17, -inf }
 0x497   :  { %1037 = vmax.xlane.f32.xlu0 %v1036_v19 }
 0x499   :  { %v1032_v20 = vpop.f32.mrb[10].mxu1 }
 0x49a   :  { %v11175_v21 = vpop.f32.mrb[11].mxu1  ;;  %v1039_v22 = vsel %vm379_vm2, %v1032_v20, -inf }
 0x49b   :  { %1040 = vmax.xlane.f32.xlu1 %v1039_v22 }
 0x4ac   :  { %1058 = vrot.lane.b32.xlu1 %v12451_v13, %s12304_s16 }
 0x4ad   :  { %1134 = vrot.lane.b32.xlu0 %v12458_v16, %s12304_s16 }
 0x4b0   :  { %1214 = vrot.lane.b32.xlu1 %v12443_v11, %s12305_s1 }
 0x4b4   :  { %1292 = vrot.lane.b32.xlu1 %v12453_v14, %s12305_s1 }
 0x4b8   :  { %1290 = vrot.lane.b32.xlu1 %v12447_v12, %s12305_s1 }
 0x524   :  { %v1038_v23 = vpop.xlane.xlu0 %1037 }
 0x525   :  { %v1042_v24 = vsub.f32 %v954_v17, %v1038_v23 }
 0x527   :  { %v1044_v25 = vmul.f32 1.442695, %v1042_v24  ;;  %v11848_v24 = vld [vmem:[#allocation9 + $0x4] ss:$12 sps:$4 sm:$0xff]  }
 0x528   :  { %v1041_v26 = vpop.xlane.xlu1 %1040  ;;  %v1135_v28 = vpop.permute.xlu0 %1134 }
 0x529   :  { %v1043_v27 = vsub.f32 %v1032_v20, %v1041_v26  ;;  %11910 = vpow2.f32 %v1044_v25  ;;  %11182 = vmatpush3.msra.mxu1 %v1135_v28  ;;  %v11846_v25 = vld [vmem:[#allocation9] ss:$12 sps:$4 sm:$0xff]   ;;  %v11849_v26 = vld [vmem:[#allocation9 + $0x8] ss:$12 sps:$4 sm:$0xff]  }
 0x52a   :  { %11191 = vmatprep.subr.mxu1 %v12301_v1  ;;  %v11852_v28 = vld [vmem:[#allocation9 + $0x1c] ss:$12 sps:$4 sm:$0xff]  }
 0x52b   :  { %v1046_v29 = vmul.f32 1.442695, %v1043_v27  ;;  %v11850_v27 = vld [vmem:[#allocation9 + $0x18] ss:$12 sps:$4 sm:$0xff]  }
 0x52c   :  { %v1059_v30 = vpop.permute.xlu1 %1058 }
 0x52d   :  { %11912 = vpow2.f32 %v1046_v29  ;;  %11177 = vmatpush3.msra.mxu0 %v1059_v30  ;;  %v11853_v29 = vld [vmem:[#allocation9 + $0x20] ss:$12 sps:$4 sm:$0xff]  }
 0x52e   :  { %11186 = vmatprep.subr.mxu0 %v12301_v1 }
 0x530   :  { %v1215_v34 = vpop.permute.xlu1 %1214 }
 0x533   :  { %v11911_v11 = vpop.eup %11910 }
 0x534   :  { %v1048_v14 = vsel %vm379_vm2, %v11911_v11, 0.0  ;;  %v1293_v38 = vpop.permute.xlu1 %1292 }
 0x535   :  { %1049 = vadd.xlane.f32.xlu0 %v1048_v14 }
 0x537   :  { %v11913_v12 = vpop.eup %11912 }
 0x538   :  { %v1051_v31 = vsel %vm379_vm2, %v11913_v12, 0.0  ;;  %v1291_v40 = vpop.permute.xlu1 %1290 }
 0x539   :  { %1052 = vadd.xlane.f32.xlu0 %v1051_v31 }
 0x54f   :  { %1212 = vrot.lane.b32.xlu0 %v12439_v10, %s12305_s1 }
 0x5c2   :  { %v1050_v32 = vpop.xlane.xlu0 %1049 }
 0x5c3   :  { %11914 = vrcp.f32 %v1050_v32 }
 0x5c6   :  { %v1053_v33 = vpop.xlane.xlu0 %1052 }
 0x5c7   :  { %11916 = vrcp.f32 %v1053_v33 }
 0x5ca   :  { %v1213_v10 = vpop.permute.xlu0 %1212 }
 0x5cd   :  { %v11915_v35 = vpop.eup %11914 }
 0x5ce   :  { %v1056_v36 = vmul.f32 %v11915_v35, %v11911_v11 }
 0x5d0   :  { %11179 = vmatmul.mubr.msk.f32.vlgmr.msra.gmra.mrb[8].mxu0 %vm379_vm2, %v1056_v36 }
 0x5d1   :  { %v11917_v37 = vpop.eup %11916  ;;  %11187 = vmatpush3.xpose.msk.msra.mxu0 %vm139_vm1, %v1215_v34  ;;  %11188 = vmatprep.mubr.msk.f32.mxu0 %vm12302_vm0, %v12301_v1  ;;  %v10663_v34 = vld [vmem:[#allocation6 + $0x1] ss:$0 sm:$0xff] }
 0x5d2   :  { %v1057_v39 = vmul.f32 %v11917_v37, %v11913_v12  ;;  %11196 = vmatprep.subr.mxu0 %v12301_v1 }
 0x5d4   :  { %11184 = vmatmul.mubr.msk.f32.vlgmr.msra.gmra.mrb[8].mxu1 %vm379_vm2, %v1057_v39  ;;  %11189 = vmatmul.mubr.msk.f32.vlgmr.msra.gmra.mrb[12].mxu0 %vm139_vm1, %v1213_v10 }
 0x5d5   :  { %11192 = vmatpush3.xpose.msk.msra.mxu1 %vm139_vm1, %v1293_v38  ;;  %11193 = vmatprep.mubr.msk.f32.mxu1 %vm12302_vm0, %v12301_v1  ;;  %v10664_v38 = vld [vmem:[#allocation8 + $0x1] ss:$0 sm:$0xff] }
 0x5d6   :  { %11201 = vmatprep.subr.mxu1 %v12301_v1  ;;  %11198 = vmatprep.mubr.msk.f32.mxu0 %vm12302_vm0, %v12301_v1 }
 0x5d8   :  { %11194 = vmatmul.mubr.msk.f32.vlgmr.msra.gmra.mrb[12].mxu1 %vm139_vm1, %v1291_v40 }
 0x5d9   :  { %11203 = vmatprep.mubr.msk.f32.mxu1 %vm12302_vm0, %v12301_v1 }
 0x6a7   :  { %v1286_v41 = vpop.f32.mrb[12].mxu0 }
 0x6a8   :  { %v11190_v42 = vpop.f32.mrb[13].mxu0  ;;  %v1368_v43 = vsel %vm379_vm2, %v1286_v41, -inf }
 0x6a9   :  { %1369 = vmax.xlane.f32.xlu0 %v1368_v43 }
 0x6ab   :  { %v1364_v44 = vpop.f32.mrb[12].mxu1 }
 0x6ac   :  { %v11195_v45 = vpop.f32.mrb[13].mxu1  ;;  %v1371_v46 = vsel %vm379_vm2, %v1364_v44, -inf }
 0x6ad   :  { %1372 = vmax.xlane.f32.xlu1 %v1371_v46 }
 0x6be   :  { %1390 = vrot.lane.b32.xlu1 %v12451_v13, %s12305_s1 }
 0x736   :  { %v1370_v47 = vpop.xlane.xlu0 %1369 }
 0x737   :  { %v1374_v48 = vsub.f32 %v1286_v41, %v1370_v47 }
 0x739   :  { %v1376_v49 = vmul.f32 1.442695, %v1374_v48 }
 0x73a   :  { %v1373_v50 = vpop.xlane.xlu1 %1372 }
 0x73b   :  { %11918 = vpow2.f32 %v1376_v49  ;;  %v1375_v51 = vsub.f32 %v1364_v44, %v1373_v50 }
 0x73d   :  { %v1378_v52 = vmul.f32 1.442695, %v1375_v51 }
 0x73e   :  { %v1391_v53 = vpop.permute.xlu1 %1390 }
 0x73f   :  { %11920 = vpow2.f32 %v1378_v52  ;;  %11197 = vmatpush3.msra.mxu0 %v1391_v53 }
 0x740   :  { %1635 = vmatprep.subr.bf16.mxu0 %v11848_v24 }
 0x745   :  { %v11919_v54 = vpop.eup %11918 }
 0x746   :  { %v1380_v55 = vsel %vm379_vm2, %v11919_v54, 0.0 }
 0x747   :  { %1381 = vadd.xlane.f32.xlu0 %v1380_v55 }
 0x749   :  { %v11921_v56 = vpop.eup %11920 }
 0x74a   :  { %v1383_v57 = vsel %vm379_vm2, %v11921_v56, 0.0 }
 0x74b   :  { %1384 = vadd.xlane.f32.xlu0 %v1383_v57 }
 0x761   :  { %1466 = vrot.lane.b32.xlu0 %v12458_v16, %s12305_s1 }
 0x7d4   :  { %v1382_v13 = vpop.xlane.xlu0 %1381 }
 0x7d5   :  { %11922 = vrcp.f32 %v1382_v13 }
 0x7d8   :  { %v1385_v58 = vpop.xlane.xlu0 %1384 }
 0x7d9   :  { %11924 = vrcp.f32 %v1385_v58 }
 0x7dc   :  { %v1467_v59 = vpop.permute.xlu0 %1466 }
 0x7dd   :  { %11202 = vmatpush3.msra.mxu1 %v1467_v59 }
 0x7de   :  { %11206 = vmatprep.subr.bf16.mxu1 %v12301_v1 }
 0x7df   :  { %v11923_v60 = vpop.eup %11922 }
 0x7e0   :  { %v1388_v61 = vmul.f32 %v11923_v60, %v11919_v54 }
 0x7e2   :  { %11199 = vmatmul.mubr.msk.f32.vlgmr.msra.gmra.mrb[8].mxu0 %vm379_vm2, %v1388_v61 }
 0x7e3   :  { %v11925_v62 = vpop.eup %11924  ;;  %1667 = vmatprep.mubr.bf16.mxu0 %v12300_v0  ;;  %1636 = vmatpush1.bf16.msra.mxu0 %v11846_v25 }
 0x7e4   :  { %v1389_v63 = vmul.f32 %v11925_v62, %v11921_v56  ;;  %1637 = vmatprep.subr.bf16.mxu0 %v11852_v28 }
 0x7e6   :  { %11204 = vmatmul.mubr.msk.f32.vlgmr.msra.gmra.mrb[8].mxu1 %vm379_vm2, %v1389_v63 }
 0x7e7   :  { %11210 = vmatprep.mubr.msk.bf16.mxu1 %vm12302_vm0, %v12301_v1  ;;  %11207 = vmatpush3.bf16.msra.mxu1 %v11849_v26 }
 0x7e8   :  { %11208 = vmatprep.subr.bf16.mxu1 %v12301_v1  ;;  %1638 = vmatpush1.bf16.msra.mxu0 %v11850_v27 }
 0x7e9   :  { %11214 = vmatprep.subr.mxu0 %v12301_v1 }
 0x7eb   :  { %11209 = vmatpush3.bf16.msra.mxu1 %v11853_v29 }
 0x7ec   :  { %11219 = vmatprep.subr.mxu1 %v12301_v1 }
 0x8b5   :  { %v1462_v16 = vpop.f32.mrb[8].mxu0 }
 0x8b6   :  { %v11200_v2 = vpop.f32.mrb[9].mxu0  ;;  %v1544_v3 = vsel %vm139_vm1, %v1462_v16, 0.0 }
 0x8b7   :  { %1545 = vadd.xlane.f32.xlu1 %v1544_v3 }
 0x8b9   :  { %v1538_v4 = vpop.f32.mrb[8].mxu1 }
 0x8ba   :  { %v11205_v5 = vpop.f32.mrb[9].mxu1  ;;  %v1547_v7 = vsel %vm139_vm1, %v1538_v4, 0.0 }
 0x8bb   :  { %1548 = vadd.xlane.f32.xlu0 %v1547_v7 }
 0x944   :  { %v1546_v8 = vpop.xlane.xlu1 %1545 }
 0x945   :  { %v1551_v9 = vmul.f32 0.03125, %v1546_v8 }
 0x947   :  { %v1553_v15 = vsub.f32 %v1462_v16, %v1551_v9 }
 0x948   :  { %v1549_v17 = vpop.xlane.xlu0 %1548 }
 0x949   :  { %v1552_v18 = vmul.f32 0.03125, %v1549_v17  ;;  %v1555_v19 = vmul.f32 %v1553_v15, %v1553_v15 }
 0x94b   :  { %v1554_v20 = vsub.f32 %v1538_v4, %v1552_v18  ;;  %v1557_v21 = vsel %vm139_vm1, %v1555_v19, 0.0 }
 0x94c   :  { %1558 = vadd.xlane.f32.xlu1 %v1557_v21 }
 0x94d   :  { %v1556_v22 = vmul.f32 %v1554_v20, %v1554_v20 }
 0x94f   :  { %v1560_v23 = vsel %vm139_vm1, %v1556_v22, 0.0 }
 0x950   :  { %1561 = vadd.xlane.f32.xlu0 %v1560_v23 }
 0x9d9   :  { %v1559_v30 = vpop.xlane.xlu1 %1558 }
 0x9da   :  { %v1563_v11 = vmul.f32 0.03125, %v1559_v30 }
 0x9dc   :  { %v1565_v14 = vadd.f32 1e-05, %v1563_v11 }
 0x9dd   :  { %v1562_v12 = vpop.xlane.xlu0 %1561 }
 0x9de   :  { %11926 = vrsqrt.f32 %v1565_v14  ;;  %v1564_v31 = vmul.f32 0.03125, %v1562_v12 }
 0x9e0   :  { %v1566_v32 = vadd.f32 1e-05, %v1564_v31 }
 0x9e2   :  { %11928 = vrsqrt.f32 %v1566_v32 }
 0x9e8   :  { %v11927_v33 = vpop.eup %11926 }
 0x9e9   :  { %v1569_v35 = vmul.f32 %v11927_v33, %v1553_v15 }
 0x9eb   :  { %v1577_v36 = vmul.f32 %v10663_v34, %v1569_v35 }
 0x9ec   :  { %v11929_v37 = vpop.eup %11928 }
 0x9ed   :  { %v1570_v39 = vmul.f32 %v11929_v37, %v1554_v20  ;;  %v1585_v10 = vadd.f32 %v10664_v38, %v1577_v36 }
 0x9ef   :  { %v1578_v40 = vmul.f32 %v10663_v34, %v1570_v39  ;;  %v12587_v42 = vadd.f32 %v12426_v6, %v1585_v10 }
 0x9f1   :  { %v1586_v41 = vadd.f32 %v10664_v38, %v1578_v40 }
 0x9f3   :  { %v12590_v43 = vadd.f32 %v12426_v6, %v1586_v41 }
 0x9f5   :  { %v12594_v44 = vpack.c.bf16 %v12590_v43, %v12587_v42 }
 0x9f7   :  { %10671 = vmatmul.mubr.msk.bf16.vlgmr.msra.gmra.mrb[16].mxu0 %vm139_vm1, %v12594_v44  ;;  %11211 = vmatmul.mubr.msk.bf16.vlgmr.msra.gmra.mrb[16].mxu1 %vm139_vm1, %v12594_v44 }
 0x9f8   :  { %11216 = vmatprep.mubr.msk.f32.mxu0 %vm12302_vm0, %v12301_v1  ;;  %11221 = vmatprep.mubr.msk.f32.mxu1 %vm12302_vm0, %v12301_v1 }
 0xaca   :  { %v12604_v45 = vpop.f32.mrb[16].mxu0  ;;  %v12606_v6 = vpop.f32.mrb[16].mxu1 }
 0xacb   :  { %v11212_v46 = vpop.f32.mrb[17].mxu1  ;;  %1893 = vrot.lane.b32.xlu0 %v12604_v45, %s12303_s3  ;;  %v12610_v47 = vpop.f32.mrb[17].mxu0 }
 0xacc   :  { %v12612_v48 = vpop.f32.mrb[18].mxu1  ;;  %1895 = vrot.lane.b32.xlu1 %v12610_v47, %s12303_s3  ;;  %v12616_v49 = vpop.f32.mrb[18].mxu0  ;;  %11215 = vmatpush3.xpose.msk.msra.mxu0 %vm139_vm1, %v12610_v47 }
 0xacd   :  { %v12620_v50 = vpop.f32.mrb[19].mxu0  ;;  %v11213_v51 = vpop.f32.mrb[19].mxu1  ;;  %11224 = vmatprep.subr.mxu0 %v12301_v1 }
 0xace   :  { %11220 = vmatpush3.xpose.msk.msra.mxu1 %vm139_vm1, %v12620_v50 }
 0xacf   :  { %11217 = vmatmul.mubr.msk.f32.vlgmr.msra.gmra.mrb[14].mxu0 %vm139_vm1, %v12604_v45  ;;  %11229 = vmatprep.subr.mxu1 %v12301_v1 }
 0xad0   :  { %1973 = vrot.lane.b32.xlu1 %v12620_v50, %s12303_s3  ;;  %11226 = vmatprep.mubr.msk.f32.mxu0 %vm12302_vm0, %v12301_v1 }
 0xad1   :  { %11222 = vmatmul.mubr.msk.f32.vlgmr.msra.gmra.mrb[14].mxu1 %vm139_vm1, %v12616_v49 }
 0xad2   :  { %11231 = vmatprep.mubr.msk.f32.mxu1 %vm12302_vm0, %v12301_v1 }
 0xad4   :  { %1971 = vrot.lane.b32.xlu1 %v12616_v49, %s12303_s3 }
 0xb3d   :  { %v1894_v53 = vpop.permute.xlu0 %1893 }
 0xb3e   :  { %v1896_v52 = vpop.permute.xlu1 %1895 }
 0xb3f   :  { %11225 = vmatpush3.xpose.msk.msra.mxu0 %vm139_vm1, %v1896_v52 }
 0xb40   :  { %11234 = vmatprep.subr.mxu0 %v12301_v1 }
 0xb42   :  { %11227 = vmatmul.mubr.msk.f32.vlgmr.msra.gmra.mrb[20].mxu0 %vm139_vm1, %v1894_v53  ;;  %v1974_v54 = vpop.permute.xlu1 %1973 }
 0xb43   :  { %11230 = vmatpush3.xpose.msk.msra.mxu1 %vm139_vm1, %v1974_v54  ;;  %11236 = vmatprep.mubr.msk.f32.mxu0 %vm12302_vm0, %v12301_v1 }
 0xb44   :  { %11239 = vmatprep.subr.mxu1 %v12301_v1 }
 0xb46   :  { %v1972_v55 = vpop.permute.xlu1 %1971 }
 0xb47   :  { %11232 = vmatmul.mubr.msk.f32.vlgmr.msra.gmra.mrb[20].mxu1 %vm139_vm1, %v1972_v55 }
 0xb48   :  { %11241 = vmatprep.mubr.msk.f32.mxu1 %vm12302_vm0, %v12301_v1 }
 0xba2   :  { %v1791_v56 = vpop.f32.mrb[14].mxu0 }
 0xba3   :  { %v11218_v57 = vpop.f32.mrb[15].mxu0  ;;  %v1871_v13 = vsel %vm379_vm2, %v1791_v56, -inf }
 0xba4   :  { %v12649_v58 = vpop.f32.mrb[14].mxu1  ;;  %1872 = vmax.xlane.f32.xlu1 %v1871_v13 }
 0xba5   :  { %v11223_v59 = vpop.f32.mrb[15].mxu1  ;;  %v1874_v25 = vsel %vm379_vm2, %v12649_v58, -inf }
 0xbb5   :  { %2072 = vrot.lane.b32.xlu1 %v12606_v6, %s12303_s3 }
 0xbb9   :  { %2371 = vrot.lane.b32.xlu1 %v12604_v45, %s12304_s16 }
 0xc15   :  { %v1967_v60 = vpop.f32.mrb[20].mxu0 }
 0xc16   :  { %v11228_v61 = vpop.f32.mrb[21].mxu0  ;;  %v2049_v62 = vsel %vm379_vm2, %v1967_v60, -inf }
 0xc17   :  { %2050 = vmax.xlane.f32.xlu0 %v2049_v62 }
 0xc1a   :  { %v2045_v63 = vpop.f32.mrb[20].mxu1 }
 0xc1b   :  { %v11233_v16 = vpop.f32.mrb[21].mxu1  ;;  %v2052_v2 = vsel %vm379_vm2, %v2045_v63, -inf }
 0xc1c   :  { %2053 = vmax.xlane.f32.xlu1 %v2052_v2 }
 0xc31   :  { %v1873_v3 = vpop.xlane.xlu1 %1872 }
 0xc32   :  { %v1877_v5 = vsub.f32 %v1791_v56, %v1873_v3 }
 0xc34   :  { %v1879_v9 = vmul.f32 1.442695, %v1877_v5 }
 0xc35   :  { %v2073_v4 = vpop.permute.xlu1 %2072 }
 0xc36   :  { %11235 = vmatpush3.msra.mxu0 %v2073_v4 }
 0xc37   :  { %11244 = vmatprep.subr.mxu0 %v12301_v1 }
 0xc39   :  { %v2372_v21 = vpop.permute.xlu1 %2371 }
 0xca4   :  { %v2051_v7 = vpop.xlane.xlu0 %2050 }
 0xca5   :  { %v2055_v8 = vsub.f32 %v1967_v60, %v2051_v7 }
 0xca7   :  { %v2057_v15 = vmul.f32 1.442695, %v2055_v8 }
 0xca9   :  { %11930 = vpow2.f32 %v2057_v15  ;;  %v2054_v22 = vpop.xlane.xlu1 %2053 }
 0xcaa   :  { %11932 = vpow2.f32 %v1879_v9  ;;  %v2056_v23 = vsub.f32 %v2045_v63, %v2054_v22 }
 0xcac   :  { %v2059_v24 = vmul.f32 1.442695, %v2056_v23 }
 0xcae   :  { %11934 = vpow2.f32 %v2059_v24 }
 0xcb3   :  { %v11931_v17 = vpop.eup %11930 }
 0xcb4   :  { %v2061_v18 = vsel %vm379_vm2, %v11931_v17, 0.0  ;;  %v11933_v19 = vpop.eup %11932 }
 0xcb5   :  { %2062 = vadd.xlane.f32.xlu0 %v2061_v18  ;;  %v1883_v20 = vsel %vm379_vm2, %v11933_v19, 0.0 }
 0xcb8   :  { %v11935_v26 = vpop.eup %11934 }
 0xcb9   :  { %1884 = vadd.xlane.f32.xlu0 %v1883_v20  ;;  %v2064_v27 = vsel %vm379_vm2, %v11935_v26, 0.0 }
 0xccf   :  { %2373 = vrot.lane.b32.xlu0 %v12610_v47, %s12304_s16 }
 0xcee   :  { %1875 = vmax.xlane.f32.xlu0 %v1874_v25 }
 0xcf2   :  { %2065 = vadd.xlane.f32.xlu0 %v2064_v27 }
 0xd08   :  { %2149 = vrot.lane.b32.xlu0 %v12612_v48, %s12303_s3 }
 0xd42   :  { %v2063_v28 = vpop.xlane.xlu0 %2062 }
 0xd43   :  { %11936 = vrcp.f32 %v2063_v28 }
 0xd46   :  { %v1885_v29 = vpop.xlane.xlu0 %1884 }
 0xd47   :  { %11938 = vrcp.f32 %v1885_v29  ;;  %v11856_v29 = vld [vmem:[#allocation9 + $0x34] ss:$12 sps:$4 sm:$0xff]  }
 0xd4a   :  { %v2374_v31 = vpop.permute.xlu0 %2373 }
 0xd4d   :  { %v11937_v30 = vpop.eup %11936 }
 0xd4e   :  { %v2069_v11 = vmul.f32 %v11937_v30, %v11931_v17 }
 0xd50   :  { %11237 = vmatmul.mubr.msk.f32.vlgmr.msra.gmra.mrb[22].mxu0 %vm379_vm2, %v2069_v11 }
 0xd51   :  { %11245 = vmatpush3.msra.mxu0 %v12606_v6  ;;  %11246 = vmatprep.mubr.msk.f32.mxu0 %vm12302_vm0, %v12301_v1  ;;  %v11939_v14 = vpop.eup %11938 }
 0xd52   :  { %11254 = vmatprep.subr.mxu0 %v12301_v1  ;;  %v1891_v12 = vmul.f32 %v11939_v14, %v11933_v19 }
 0xd58   :  { %11247 = vmatmul.mubr.msk.f32.vlgmr.msra.gmra.mrb[22].mxu0 %vm379_vm2, %v1891_v12 }
 0xd59   :  { %11255 = vmatpush3.xpose.msk.msra.mxu0 %vm139_vm1, %v2374_v31  ;;  %11256 = vmatprep.mubr.msk.f32.mxu0 %vm12302_vm0, %v12301_v1  ;;  %v11854_v31 = vld [vmem:[#allocation9 + $0x30] ss:$12 sps:$4 sm:$0xff]  }
 0xd5a   :  { %11264 = vmatprep.subr.mxu0 %v12301_v1 }
 0xd5c   :  { %11257 = vmatmul.mubr.msk.f32.vlgmr.msra.gmra.mrb[24].mxu0 %vm139_vm1, %v2372_v21 }
 0xd5d   :  { %11266 = vmatprep.mubr.msk.f32.mxu0 %vm12302_vm0, %v12301_v1 }
 0xd7b   :  { %v1876_v32 = vpop.xlane.xlu0 %1875 }
 0xd7c   :  { %v1878_v33 = vsub.f32 %v12649_v58, %v1876_v32 }
 0xd7e   :  { %v1881_v34 = vmul.f32 1.442695, %v1878_v33  ;;  %v11859_v33 = vld [vmem:[#allocation9 + $0x4c] ss:$12 sps:$4 sm:$0xff]  }
 0xd7f   :  { %v2066_v35 = vpop.xlane.xlu0 %2065 }
 0xd80   :  { %11940 = vpow2.f32 %v1881_v34  ;;  %v11857_v34 = vld [vmem:[#allocation9 + $0x48] ss:$12 sps:$4 sm:$0xff]  }
 0xd81   :  { %11942 = vrcp.f32 %v2066_v35 }
 0xd83   :  { %v2150_v36 = vpop.permute.xlu0 %2149 }
 0xd84   :  { %11240 = vmatpush3.msra.mxu1 %v2150_v36 }
 0xd85   :  { %11249 = vmatprep.subr.mxu1 %v12301_v1 }
 0xd8a   :  { %v11941_v37 = vpop.eup %11940 }
 0xd8b   :  { %v11943_v38 = vpop.eup %11942  ;;  %v1886_v39 = vsel %vm379_vm2, %v11941_v37, 0.0 }
 0xd8c   :  { %1887 = vadd.xlane.f32.xlu1 %v1886_v39  ;;  %v2070_v10 = vmul.f32 %v11943_v38, %v11935_v26 }
 0xd8e   :  { %11242 = vmatmul.mubr.msk.f32.vlgmr.msra.gmra.mrb[22].mxu1 %vm379_vm2, %v2070_v10 }
 0xd8f   :  { %11250 = vmatpush3.msra.mxu1 %v12612_v48  ;;  %11251 = vmatprep.mubr.msk.f32.mxu1 %vm12302_vm0, %v12301_v1 }
 0xd90   :  { %11259 = vmatprep.subr.mxu1 %v12301_v1 }
 0xd9d   :  { %2451 = vrot.lane.b32.xlu1 %v12620_v50, %s12304_s16 }
 0xda1   :  { %2449 = vrot.lane.b32.xlu1 %v12616_v49, %s12304_s16 }
 0xe19   :  { %v1888_v40 = vpop.xlane.xlu1 %1887 }
 0xe1a   :  { %11944 = vrcp.f32 %v1888_v40 }
 0xe1d   :  { %v2452_v46 = vpop.permute.xlu1 %2451 }
 0xe21   :  { %v2450_v52 = vpop.permute.xlu1 %2449 }
 0xe24   :  { %v11945_v41 = vpop.eup %11944 }
 0xe25   :  { %v1892_v51 = vmul.f32 %v11945_v41, %v11941_v37 }
 0xe27   :  { %11252 = vmatmul.mubr.msk.f32.vlgmr.msra.gmra.mrb[22].mxu1 %vm379_vm2, %v1892_v51 }
 0xe28   :  { %11260 = vmatpush3.xpose.msk.msra.mxu1 %vm139_vm1, %v2452_v46  ;;  %11261 = vmatprep.mubr.msk.f32.mxu1 %vm12302_vm0, %v12301_v1  ;;  %v11860_v46 = vld [vmem:[#allocation9 + $0x38] ss:$12 sps:$4 sm:$0xff]  }
 0xe29   :  { %11269 = vmatprep.subr.mxu1 %v12301_v1 }
 0xe2b   :  { %11262 = vmatmul.mubr.msk.f32.vlgmr.msra.gmra.mrb[24].mxu1 %vm139_vm1, %v2450_v52 }
 0xe2c   :  { %11271 = vmatprep.mubr.msk.f32.mxu1 %vm12302_vm0, %v12301_v1 }
 0xe2f   :  { %v2445_v53 = vpop.f32.mrb[24].mxu0 }
 0xe30   :  { %v11258_v54 = vpop.f32.mrb[25].mxu0  ;;  %v2527_v55 = vsel %vm379_vm2, %v2445_v53, -inf }
 0xe31   :  { %2528 = vmax.xlane.f32.xlu0 %v2527_v55  ;;  %v11861_v54 = vld [vmem:[#allocation9 + $0x50] ss:$12 sps:$4 sm:$0xff]  }
 0xe47   :  { %2549 = vrot.lane.b32.xlu0 %v12606_v6, %s12304_s16 }
 0xe4b   :  { %2703 = vrot.lane.b32.xlu0 %v12604_v45, %s12305_s1 }
 0xebe   :  { %v2529_v56 = vpop.xlane.xlu0 %2528 }
 0xebf   :  { %v2533_v57 = vsub.f32 %v2445_v53, %v2529_v56 }
 0xec1   :  { %v2535_v13 = vmul.f32 1.442695, %v2533_v57 }
 0xec2   :  { %v2550_v58 = vpop.permute.xlu0 %2549 }
 0xec3   :  { %11946 = vpow2.f32 %v2535_v13  ;;  %11265 = vmatpush3.msra.mxu0 %v2550_v58 }
 0xec4   :  { %11274 = vmatprep.subr.mxu0 %v12301_v1 }
 0xecd   :  { %v11947_v59 = vpop.eup %11946 }
 0xece   :  { %v2539_v60 = vsel %vm379_vm2, %v11947_v59, 0.0 }
 0xecf   :  { %2540 = vadd.xlane.f32.xlu1 %v2539_v60 }
 0xee0   :  { %2705 = vrot.lane.b32.xlu1 %v12610_v47, %s12305_s1  ;;  %v2704_v47 = vpop.permute.xlu0 %2703 }
 0xefe   :  { %v2523_v61 = vpop.f32.mrb[24].mxu1 }
 0xeff   :  { %v11263_v62 = vpop.f32.mrb[25].mxu1  ;;  %v2530_v63 = vsel %vm379_vm2, %v2523_v61, -inf }
 0xf04   :  { %2531 = vmax.xlane.f32.xlu1 %v2530_v63 }
 0xf15   :  { %2783 = vrot.lane.b32.xlu1 %v12620_v50, %s12305_s1 }
 0xf19   :  { %2781 = vrot.lane.b32.xlu1 %v12616_v49, %s12305_s1 }
 0xf5c   :  { %v2541_v45 = vpop.xlane.xlu1 %2540 }
 0xf5d   :  { %11948 = vrcp.f32 %v2541_v45 }
 0xf60   :  { %v2706_v3 = vpop.permute.xlu1 %2705 }
 0xf67   :  { %v11949_v16 = vpop.eup %11948 }
 0xf68   :  { %v2547_v2 = vmul.f32 %v11949_v16, %v11947_v59 }
 0xf6a   :  { %11267 = vmatmul.mubr.msk.f32.vlgmr.msra.gmra.mrb[22].mxu0 %vm379_vm2, %v2547_v2 }
 0xf6b   :  { %11275 = vmatpush3.xpose.msk.msra.mxu0 %vm139_vm1, %v2706_v3  ;;  %11276 = vmatprep.mubr.msk.f32.mxu0 %vm12302_vm0, %v12301_v1 }
 0xf6c   :  { %11284 = vmatprep.subr.mxu0 %v12301_v1 }
 0xf6e   :  { %11277 = vmatmul.mubr.msk.f32.vlgmr.msra.gmra.mrb[26].mxu0 %vm139_vm1, %v2704_v47 }
 0xf6f   :  { %11286 = vmatprep.mubr.msk.f32.mxu0 %vm12302_vm0, %v12301_v1 }
 0xf91   :  { %v2532_v49 = vpop.xlane.xlu1 %2531 }
 0xf92   :  { %v2534_v50 = vsub.f32 %v2523_v61, %v2532_v49 }
 0xf94   :  { %v2537_v4 = vmul.f32 1.442695, %v2534_v50 }
 0xf95   :  { %v2784_v17 = vpop.permute.xlu1 %2783 }
 0xf96   :  { %11950 = vpow2.f32 %v2537_v4 }
 0xf99   :  { %v2782_v19 = vpop.permute.xlu1 %2781 }
 0xfa0   :  { %v11951_v5 = vpop.eup %11950 }
 0xfa1   :  { %v2542_v7 = vsel %vm379_vm2, %v11951_v5, 0.0 }
 0xfa2   :  { %2543 = vadd.xlane.f32.xlu0 %v2542_v7 }
 0xfb8   :  { %2625 = vrot.lane.b32.xlu0 %v12612_v48, %s12304_s16 }
0x102f   :  { %v2544_v8 = vpop.xlane.xlu0 %2543 }
0x1030   :  { %11952 = vrcp.f32 %v2544_v8 }
0x1033   :  { %v2626_v9 = vpop.permute.xlu0 %2625 }
0x1034   :  { %11270 = vmatpush3.msra.mxu1 %v2626_v9 }
0x1035   :  { %11279 = vmatprep.subr.mxu1 %v12301_v1 }
0x103a   :  { %v11953_v15 = vpop.eup %11952 }
0x103b   :  { %v2548_v18 = vmul.f32 %v11953_v15, %v11951_v5 }
0x103d   :  { %11272 = vmatmul.mubr.msk.f32.vlgmr.msra.gmra.mrb[22].mxu1 %vm379_vm2, %v2548_v18 }
0x103e   :  { %11280 = vmatpush3.xpose.msk.msra.mxu1 %vm139_vm1, %v2784_v17  ;;  %11281 = vmatprep.mubr.msk.f32.mxu1 %vm12302_vm0, %v12301_v1 }
0x103f   :  { %11289 = vmatprep.subr.mxu1 %v12301_v1 }
0x1041   :  { %v2777_v20 = vpop.f32.mrb[26].mxu0  ;;  %11282 = vmatmul.mubr.msk.f32.vlgmr.msra.gmra.mrb[26].mxu1 %vm139_vm1, %v2782_v19 }
0x1042   :  { %v11278_v21 = vpop.f32.mrb[27].mxu0  ;;  %v2859_v22 = vsel %vm379_vm2, %v2777_v20, -inf  ;;  %11291 = vmatprep.mubr.msk.f32.mxu1 %vm12302_vm0, %v12301_v1 }
0x1043   :  { %2860 = vmax.xlane.f32.xlu0 %v2859_v22 }
0x1059   :  { %2881 = vrot.lane.b32.xlu0 %v12606_v6, %s12305_s1 }
0x10d0   :  { %v2861_v23 = vpop.xlane.xlu0 %2860 }
0x10d1   :  { %v2865_v24 = vsub.f32 %v2777_v20, %v2861_v23 }
0x10d3   :  { %v2867_v25 = vmul.f32 1.442695, %v2865_v24 }
0x10d4   :  { %v2882_v26 = vpop.permute.xlu0 %2881 }
0x10d5   :  { %11954 = vpow2.f32 %v2867_v25  ;;  %11285 = vmatpush3.msra.mxu0 %v2882_v26 }
0x10d6   :  { %3124 = vmatprep.subr.bf16.mxu0 %v11856_v29 }
0x10df   :  { %v11955_v27 = vpop.eup %11954 }
0x10e0   :  { %v2871_v28 = vsel %vm379_vm2, %v11955_v27, 0.0 }
0x10e1   :  { %2872 = vadd.xlane.f32.xlu1 %v2871_v28 }
0x1114   :  { %v2855_v30 = vpop.f32.mrb[26].mxu1 }
0x1115   :  { %v11283_v11 = vpop.f32.mrb[27].mxu1  ;;  %v2862_v14 = vsel %vm379_vm2, %v2855_v30, -inf }
0x1116   :  { %2863 = vmax.xlane.f32.xlu1 %v2862_v14 }
0x116e   :  { %v2873_v12 = vpop.xlane.xlu1 %2872 }
0x116f   :  { %11956 = vrcp.f32 %v2873_v12 }
0x1179   :  { %v11957_v6 = vpop.eup %11956 }
0x117a   :  { %v2879_v32 = vmul.f32 %v11957_v6, %v11955_v27 }
0x117c   :  { %11287 = vmatmul.mubr.msk.f32.vlgmr.msra.gmra.mrb[22].mxu0 %vm379_vm2, %v2879_v32 }
0x117d   :  { %3125 = vmatpush1.bf16.msra.mxu0 %v11854_v31  ;;  %3156 = vmatprep.mubr.bf16.mxu0 %v12300_v0 }
0x117e   :  { %3126 = vmatprep.subr.bf16.mxu0 %v11859_v33 }
0x1181   :  { %3127 = vmatpush1.bf16.msra.mxu0 %v11857_v34 }
0x1182   :  { %11302 = vmatprep.subr.mxu0 %v12301_v1 }
0x1184   :  { %10707 = vmatmul.mubr.msk.bf16.vlgmr.msra.gmra.mrb[28].mxu0 %vm139_vm1, %v12594_v44 }
0x1185   :  { %11304 = vmatprep.mubr.msk.f32.mxu0 %vm12302_vm0, %v12301_v1 }
0x11a3   :  { %v2864_v35 = vpop.xlane.xlu1 %2863 }
0x11a4   :  { %v2866_v36 = vsub.f32 %v2855_v30, %v2864_v35 }
0x11a6   :  { %v2869_v37 = vmul.f32 1.442695, %v2866_v36 }
0x11a8   :  { %11958 = vpow2.f32 %v2869_v37 }
0x11b2   :  { %v11959_v38 = vpop.eup %11958 }
0x11b3   :  { %v2874_v39 = vsel %vm379_vm2, %v11959_v38, 0.0 }
0x11b4   :  { %2875 = vadd.xlane.f32.xlu1 %v2874_v39 }
0x11c5   :  { %2957 = vrot.lane.b32.xlu1 %v12612_v48, %s12305_s1 }
0x1241   :  { %v2876_v10 = vpop.xlane.xlu1 %2875 }
0x1242   :  { %11960 = vrcp.f32 %v2876_v10 }
0x1245   :  { %v2958_v40 = vpop.permute.xlu1 %2957 }
0x1246   :  { %11290 = vmatpush3.msra.mxu1 %v2958_v40 }
0x1247   :  { %11294 = vmatprep.subr.bf16.mxu1 %v12301_v1 }
0x124c   :  { %v11961_v41 = vpop.eup %11960 }
0x124d   :  { %v2880_v51 = vmul.f32 %v11961_v41, %v11959_v38 }
0x124f   :  { %v12750_v52 = vpop.f32.mrb[22].mxu0  ;;  %11292 = vmatmul.mubr.msk.f32.vlgmr.msra.gmra.mrb[22].mxu1 %vm379_vm2, %v2880_v51 }
0x1250   :  { %11295 = vmatpush3.bf16.msra.mxu1 %v11860_v46  ;;  %v11288_v53 = vpop.f32.mrb[23].mxu0  ;;  %11298 = vmatprep.mubr.msk.bf16.mxu1 %vm12302_vm0, %v12301_v1 }
0x1251   :  { %11296 = vmatprep.subr.bf16.mxu1 %v12301_v1 }
0x1254   :  { %11297 = vmatpush3.bf16.msra.mxu1 %v11861_v54 }
0x1255   :  { %11307 = vmatprep.subr.mxu1 %v12301_v1 }
0x1257   :  { %v12757_v48 = vpop.f32.mrb[28].mxu0  ;;  %11299 = vmatmul.mubr.msk.bf16.vlgmr.msra.gmra.mrb[28].mxu1 %vm139_vm1, %v12594_v44 }
0x1258   :  { %v12761_v55 = vpop.f32.mrb[29].mxu0  ;;  %11309 = vmatprep.mubr.msk.f32.mxu1 %vm12302_vm0, %v12301_v1 }
0x1259   :  { %3384 = vrot.lane.b32.xlu0 %v12761_v55, %s12303_s3  ;;  %v12767_v56 = vpop.f32.mrb[30].mxu0  ;;  %11303 = vmatpush3.xpose.msk.msra.mxu0 %vm139_vm1, %v12761_v55 }
0x125a   :  { %3460 = vrot.lane.b32.xlu1 %v12767_v56, %s12303_s3  ;;  %v12773_v57 = vpop.f32.mrb[31].mxu0  ;;  %11312 = vmatprep.subr.mxu0 %v12301_v1 }
0x125c   :  { %11305 = vmatmul.mubr.msk.f32.vlgmr.msra.gmra.mrb[32].mxu0 %vm139_vm1, %v12757_v48 }
0x125d   :  { %3462 = vrot.lane.b32.xlu0 %v12773_v57, %s12303_s3  ;;  %11308 = vmatpush3.xpose.msk.msra.mxu1 %vm139_vm1, %v12773_v57 }
0x125e   :  { %11317 = vmatprep.subr.mxu1 %v12301_v1  ;;  %11314 = vmatprep.mubr.msk.f32.mxu0 %vm12302_vm0, %v12301_v1 }
0x1260   :  { %11310 = vmatmul.mubr.msk.f32.vlgmr.msra.gmra.mrb[32].mxu1 %vm139_vm1, %v12767_v56 }
0x1261   :  { %3382 = vrot.lane.b32.xlu0 %v12757_v48, %s12303_s3  ;;  %11319 = vmatprep.mubr.msk.f32.mxu1 %vm12302_vm0, %v12301_v1 }
0x12cb   :  { %v3385_v44 = vpop.permute.xlu0 %3384 }
0x12cc   :  { %11313 = vmatpush3.xpose.msk.msra.mxu0 %vm139_vm1, %v3385_v44  ;;  %v3461_v58 = vpop.permute.xlu1 %3460 }
0x12cd   :  { %11322 = vmatprep.subr.mxu0 %v12301_v1 }
0x12cf   :  { %v3463_v13 = vpop.permute.xlu0 %3462 }
0x12d0   :  { %11318 = vmatpush3.xpose.msk.msra.mxu1 %vm139_vm1, %v3463_v13 }
0x12d1   :  { %11327 = vmatprep.subr.mxu1 %v12301_v1 }
0x12d3   :  { %v3383_v59 = vpop.permute.xlu0 %3382  ;;  %11320 = vmatmul.mubr.msk.f32.vlgmr.msra.gmra.mrb[34].mxu1 %vm139_vm1, %v3461_v58 }
0x12d4   :  { %11315 = vmatmul.mubr.msk.f32.vlgmr.msra.gmra.mrb[34].mxu0 %vm139_vm1, %v3383_v59  ;;  %11329 = vmatprep.mubr.msk.f32.mxu1 %vm12302_vm0, %v12301_v1 }
0x12d5   :  { %11324 = vmatprep.mubr.msk.f32.mxu0 %vm12302_vm0, %v12301_v1 }
0x1322   :  { %v12801_v60 = vpop.f32.mrb[22].mxu1 }
0x1323   :  { %v11293_v61 = vpop.f32.mrb[23].mxu1 }
0x132a   :  { %v12803_v62 = vpop.f32.mrb[28].mxu1 }
0x132b   :  { %v11300_v63 = vpop.f32.mrb[29].mxu1 }
0x132c   :  { %v12805_v45 = vpop.f32.mrb[30].mxu1 }
0x132d   :  { %v11301_v16 = vpop.f32.mrb[31].mxu1 }
0x132f   :  { %v3280_v2 = vpop.f32.mrb[32].mxu0 }
0x1330   :  { %v11306_v3 = vpop.f32.mrb[33].mxu0  ;;  %v3360_v15 = vsel %vm379_vm2, %v3280_v2, -inf }
0x1333   :  { %v3356_v47 = vpop.f32.mrb[32].mxu1 }
0x1334   :  { %v11311_v49 = vpop.f32.mrb[33].mxu1  ;;  %v3363_v17 = vsel %vm379_vm2, %v3356_v47, -inf }
0x13a6   :  { %v3534_v50 = vpop.f32.mrb[34].mxu1 }
0x13a7   :  { %v3456_v4 = vpop.f32.mrb[34].mxu0  ;;  %v11321_v5 = vpop.f32.mrb[35].mxu1  ;;  %v3541_v7 = vsel %vm379_vm2, %v3534_v50, -inf }
0x13a8   :  { %3542 = vmax.xlane.f32.xlu1 %v3541_v7  ;;  %v11316_v8 = vpop.f32.mrb[35].mxu0  ;;  %v3538_v9 = vsel %vm379_vm2, %v3456_v4, -inf }
0x13a9   :  { %3539 = vmax.xlane.f32.xlu0 %v3538_v9 }
0x13ad   :  { %3361 = vmax.xlane.f32.xlu0 %v3360_v15 }
0x13b1   :  { %3364 = vmax.xlane.f32.xlu0 %v3363_v17 }
0x13b9   :  { %3561 = vrot.lane.b32.xlu1 %v12803_v62, %s12303_s3 }
0x1435   :  { %v3543_v18 = vpop.xlane.xlu1 %3542 }
0x1436   :  { %v3540_v19 = vpop.xlane.xlu0 %3539  ;;  %v3545_v24 = vsub.f32 %v3534_v50, %v3543_v18 }
0x1437   :  { %v3544_v20 = vsub.f32 %v3456_v4, %v3540_v19 }
0x1438   :  { %v3548_v29 = vmul.f32 1.442695, %v3545_v24 }
0x1439   :  { %v3562_v21 = vpop.permute.xlu1 %3561  ;;  %v3546_v25 = vmul.f32 1.442695, %v3544_v20 }
0x143a   :  { %11323 = vmatpush3.msra.mxu0 %v3562_v21  ;;  %v3362_v22 = vpop.xlane.xlu0 %3361 }
0x143b   :  { %v3366_v23 = vsub.f32 %v3280_v2, %v3362_v22  ;;  %11332 = vmatprep.subr.mxu0 %v12301_v1 }
0x143d   :  { %v3368_v26 = vmul.f32 1.442695, %v3366_v23 }
0x143e   :  { %v3365_v27 = vpop.xlane.xlu0 %3364 }
0x143f   :  { %11962 = vpow2.f32 %v3368_v26  ;;  %v3367_v28 = vsub.f32 %v3356_v47, %v3365_v27 }
0x1440   :  { %11964 = vpow2.f32 %v3546_v25 }
0x1441   :  { %v3370_v30 = vmul.f32 1.442695, %v3367_v28 }
0x1443   :  { %11966 = vpow2.f32 %v3370_v30 }
0x1444   :  { %11968 = vpow2.f32 %v3548_v29 }
0x1449   :  { %v11963_v11 = vpop.eup %11962 }
0x144a   :  { %v3372_v14 = vsel %vm379_vm2, %v11963_v11, 0.0  ;;  %v11965_v12 = vpop.eup %11964 }
0x144b   :  { %3373 = vadd.xlane.f32.xlu1 %v3372_v14  ;;  %v3550_v31 = vsel %vm379_vm2, %v11965_v12, 0.0 }
0x144d   :  { %v11967_v6 = vpop.eup %11966 }
0x144e   :  { %v3375_v32 = vsel %vm379_vm2, %v11967_v6, 0.0  ;;  %v11969_v33 = vpop.eup %11968 }
0x144f   :  { %3551 = vadd.xlane.f32.xlu1 %v3550_v31  ;;  %3376 = vadd.xlane.f32.xlu0 %v3375_v32  ;;  %v3553_v34 = vsel %vm379_vm2, %v11969_v33, 0.0 }
0x1453   :  { %3554 = vadd.xlane.f32.xlu0 %v3553_v34 }
0x1460   :  { %3862 = vrot.lane.b32.xlu1 %v12761_v55, %s12304_s16 }
0x1464   :  { %3940 = vrot.lane.b32.xlu1 %v12773_v57, %s12304_s16 }
0x1468   :  { %3938 = vrot.lane.b32.xlu1 %v12767_v56, %s12304_s16 }
0x1469   :  { %3638 = vrot.lane.b32.xlu0 %v12805_v45, %s12303_s3 }
0x146d   :  { %3860 = vrot.lane.b32.xlu0 %v12757_v48, %s12304_s16 }
0x14d8   :  { %v3374_v35 = vpop.xlane.xlu1 %3373 }
0x14dc   :  { %v3552_v36 = vpop.xlane.xlu1 %3551  ;;  %v3377_v37 = vpop.xlane.xlu0 %3376 }
0x14dd   :  { %11970 = vrcp.f32 %v3552_v36 }
0x14e0   :  { %v3555_v38 = vpop.xlane.xlu0 %3554  ;;  %v3863_v53 = vpop.permute.xlu1 %3862 }
0x14e1   :  { %11972 = vrcp.f32 %v3555_v38 }
0x14e2   :  { %11974 = vrcp.f32 %v3374_v35 }
0x14e3   :  { %11976 = vrcp.f32 %v3377_v37 }
0x14e4   :  { %v3639_v39 = vpop.permute.xlu0 %3638  ;;  %v3941_v13 = vpop.permute.xlu1 %3940 }
0x14e5   :  { %11328 = vmatpush3.msra.mxu1 %v3639_v39 }
0x14e6   :  { %11337 = vmatprep.subr.mxu1 %v12301_v1 }
0x14e7   :  { %v11971_v10 = vpop.eup %11970 }
0x14e8   :  { %v3558_v40 = vmul.f32 %v11971_v10, %v11965_v12  ;;  %v3861_v59 = vpop.permute.xlu0 %3860  ;;  %v3939_v61 = vpop.permute.xlu1 %3938 }
0x14ea   :  { %11325 = vmatmul.mubr.msk.f32.vlgmr.msra.gmra.mrb[36].mxu0 %vm379_vm2, %v3558_v40 }
0x14eb   :  { %v11973_v41 = vpop.eup %11972  ;;  %11333 = vmatpush3.msra.mxu0 %v12803_v62  ;;  %11334 = vmatprep.mubr.msk.f32.mxu0 %vm12302_vm0, %v12301_v1 }
0x14ec   :  { %v3559_v46 = vmul.f32 %v11973_v41, %v11969_v33  ;;  %11342 = vmatprep.subr.mxu0 %v12301_v1  ;;  %v11975_v51 = vpop.eup %11974 }
0x14ed   :  { %v3380_v54 = vmul.f32 %v11975_v51, %v11963_v11  ;;  %v11977_v44 = vpop.eup %11976 }
0x14ee   :  { %11330 = vmatmul.mubr.msk.f32.vlgmr.msra.gmra.mrb[36].mxu1 %vm379_vm2, %v3559_v46  ;;  %v3381_v58 = vmul.f32 %v11977_v44, %v11967_v6 }
0x14ef   :  { %11338 = vmatpush3.msra.mxu1 %v12805_v45  ;;  %11339 = vmatprep.mubr.msk.f32.mxu1 %vm12302_vm0, %v12301_v1 }
0x14f0   :  { %11347 = vmatprep.subr.mxu1 %v12301_v1 }
0x14f2   :  { %11335 = vmatmul.mubr.msk.f32.vlgmr.msra.gmra.mrb[36].mxu0 %vm379_vm2, %v3380_v54 }
0x14f3   :  { %11343 = vmatpush3.xpose.msk.msra.mxu0 %vm139_vm1, %v3863_v53  ;;  %11344 = vmatprep.mubr.msk.f32.mxu0 %vm12302_vm0, %v12301_v1 }
0x14f4   :  { %11352 = vmatprep.subr.mxu0 %v12301_v1 }
0x14f6   :  { %11340 = vmatmul.mubr.msk.f32.vlgmr.msra.gmra.mrb[36].mxu1 %vm379_vm2, %v3381_v58  ;;  %11345 = vmatmul.mubr.msk.f32.vlgmr.msra.gmra.mrb[38].mxu0 %vm139_vm1, %v3861_v59 }
0x14f7   :  { %11348 = vmatpush3.xpose.msk.msra.mxu1 %vm139_vm1, %v3941_v13  ;;  %11349 = vmatprep.mubr.msk.f32.mxu1 %vm12302_vm0, %v12301_v1 }
0x14f8   :  { %11357 = vmatprep.subr.mxu1 %v12301_v1  ;;  %11354 = vmatprep.mubr.msk.f32.mxu0 %vm12302_vm0, %v12301_v1 }
0x14fa   :  { %11350 = vmatmul.mubr.msk.f32.vlgmr.msra.gmra.mrb[38].mxu1 %vm139_vm1, %v3939_v61 }
0x14fb   :  { %11359 = vmatprep.mubr.msk.f32.mxu1 %vm12302_vm0, %v12301_v1 }
0x15c9   :  { %v3934_v63 = vpop.f32.mrb[38].mxu0 }
0x15ca   :  { %v11346_v16 = vpop.f32.mrb[39].mxu0  ;;  %v4016_v2 = vsel %vm379_vm2, %v3934_v63, -inf }
0x15cb   :  { %4017 = vmax.xlane.f32.xlu0 %v4016_v2  ;;  %v3038_v16 = vsel %vm139_vm1, %v12801_v60, 0.0 }
0x15cd   :  { %v4012_v3 = vpop.f32.mrb[38].mxu1 }
0x15ce   :  { %v11351_v47 = vpop.f32.mrb[39].mxu1  ;;  %v4019_v49 = vsel %vm379_vm2, %v4012_v3, -inf }
0x15cf   :  { %4020 = vmax.xlane.f32.xlu1 %v4019_v49 }
0x15e0   :  { %4038 = vrot.lane.b32.xlu1 %v12803_v62, %s12304_s16 }
0x15e1   :  { %4114 = vrot.lane.b32.xlu0 %v12805_v45, %s12304_s16 }
0x15e4   :  { %4194 = vrot.lane.b32.xlu1 %v12761_v55, %s12305_s1 }
0x15e8   :  { %4272 = vrot.lane.b32.xlu1 %v12773_v57, %s12305_s1 }
0x15ec   :  { %4270 = vrot.lane.b32.xlu1 %v12767_v56, %s12305_s1 }
0x1658   :  { %v4018_v50 = vpop.xlane.xlu0 %4017 }
0x1659   :  { %v4022_v4 = vsub.f32 %v3934_v63, %v4018_v50  ;;  %v3035_v63 = vsel %vm139_vm1, %v12750_v52, 0.0 }
0x165b   :  { %v4024_v5 = vmul.f32 1.442695, %v4022_v4 }
0x165c   :  { %v4021_v7 = vpop.xlane.xlu1 %4020  ;;  %v4115_v8 = vpop.permute.xlu0 %4114 }
0x165d   :  { %11978 = vpow2.f32 %v4024_v5  ;;  %v4023_v9 = vsub.f32 %v4012_v3, %v4021_v7  ;;  %11358 = vmatpush3.msra.mxu1 %v4115_v8 }
0x165e   :  { %11367 = vmatprep.subr.mxu1 %v12301_v1 }
0x165f   :  { %v4026_v15 = vmul.f32 1.442695, %v4023_v9 }
0x1660   :  { %v4039_v17 = vpop.permute.xlu1 %4038 }
0x1661   :  { %11980 = vpow2.f32 %v4026_v15  ;;  %11353 = vmatpush3.msra.mxu0 %v4039_v17 }
0x1662   :  { %11362 = vmatprep.subr.mxu0 %v12301_v1 }
0x1664   :  { %v4195_v21 = vpop.permute.xlu1 %4194 }
0x1667   :  { %v11979_v55 = vpop.eup %11978 }
0x1668   :  { %v4028_v57 = vsel %vm379_vm2, %v11979_v55, 0.0  ;;  %v4273_v25 = vpop.permute.xlu1 %4272 }
0x1669   :  { %4029 = vadd.xlane.f32.xlu0 %v4028_v57 }
0x166b   :  { %v11981_v56 = vpop.eup %11980 }
0x166c   :  { %v4031_v18 = vsel %vm379_vm2, %v11981_v56, 0.0  ;;  %v4271_v27 = vpop.permute.xlu1 %4270 }
0x166d   :  { %4032 = vadd.xlane.f32.xlu0 %v4031_v18 }
0x1683   :  { %4192 = vrot.lane.b32.xlu0 %v12757_v48, %s12305_s1 }
0x16f6   :  { %v4030_v19 = vpop.xlane.xlu0 %4029 }
0x16f7   :  { %11982 = vrcp.f32 %v4030_v19 }
0x16fa   :  { %v4033_v20 = vpop.xlane.xlu0 %4032 }
0x16fb   :  { %11984 = vrcp.f32 %v4033_v20 }
0x16fe   :  { %v4193_v48 = vpop.permute.xlu0 %4192 }
0x1701   :  { %v11983_v22 = vpop.eup %11982 }
0x1702   :  { %v4036_v23 = vmul.f32 %v11983_v22, %v11979_v55 }
0x1704   :  { %11355 = vmatmul.mubr.msk.f32.vlgmr.msra.gmra.mrb[36].mxu0 %vm379_vm2, %v4036_v23  ;;  %v11864_v23 = vld [vmem:[#allocation2 + $0x64] ss:$12 sps:$4 sm:$0xff]  }
0x1705   :  { %v11985_v24 = vpop.eup %11984  ;;  %11363 = vmatpush3.xpose.msk.msra.mxu0 %vm139_vm1, %v4195_v21  ;;  %11364 = vmatprep.mubr.msk.f32.mxu0 %vm12302_vm0, %v12301_v1 }
0x1706   :  { %v4037_v26 = vmul.f32 %v11985_v24, %v11981_v56  ;;  %11372 = vmatprep.subr.mxu0 %v12301_v1  ;;  %v11865_v24 = vld [vmem:[#allocation2 + $0x68] ss:$12 sps:$4 sm:$0xff]  }
0x1708   :  { %11360 = vmatmul.mubr.msk.f32.vlgmr.msra.gmra.mrb[36].mxu1 %vm379_vm2, %v4037_v26  ;;  %11365 = vmatmul.mubr.msk.f32.vlgmr.msra.gmra.mrb[40].mxu0 %vm139_vm1, %v4193_v48  ;;  %v11869_v26 = vld [vmem:[#allocation2 + $0x80] ss:$12 sps:$4 sm:$0xff]   ;;  %v11866_v48 = vld [vmem:[#allocation2 + $0x78] ss:$12 sps:$4 sm:$0xff]  }
0x1709   :  { %11368 = vmatpush3.xpose.msk.msra.mxu1 %vm139_vm1, %v4273_v25  ;;  %11369 = vmatprep.mubr.msk.f32.mxu1 %vm12302_vm0, %v12301_v1  ;;  %v11868_v25 = vld [vmem:[#allocation2 + $0x7c] ss:$12 sps:$4 sm:$0xff]  }
0x170a   :  { %11377 = vmatprep.subr.mxu1 %v12301_v1  ;;  %11374 = vmatprep.mubr.msk.f32.mxu0 %vm12302_vm0, %v12301_v1 }
0x170c   :  { %11370 = vmatmul.mubr.msk.f32.vlgmr.msra.gmra.mrb[40].mxu1 %vm139_vm1, %v4271_v27 }
0x170d   :  { %11379 = vmatprep.mubr.msk.f32.mxu1 %vm12302_vm0, %v12301_v1 }
0x17db   :  { %v4266_v28 = vpop.f32.mrb[40].mxu0 }
0x17dc   :  { %v11366_v29 = vpop.f32.mrb[41].mxu0  ;;  %v4348_v30 = vsel %vm379_vm2, %v4266_v28, -inf }
0x17dd   :  { %4349 = vmax.xlane.f32.xlu0 %v4348_v30 }
0x17df   :  { %v4344_v11 = vpop.f32.mrb[40].mxu1 }
0x17e0   :  { %v11371_v14 = vpop.f32.mrb[41].mxu1  ;;  %v4351_v12 = vsel %vm379_vm2, %v4344_v11, -inf }
0x17e1   :  { %4352 = vmax.xlane.f32.xlu1 %v4351_v12 }
0x17f2   :  { %4370 = vrot.lane.b32.xlu1 %v12803_v62, %s12305_s1 }
0x186a   :  { %v4350_v6 = vpop.xlane.xlu0 %4349 }
0x186b   :  { %v4354_v31 = vsub.f32 %v4266_v28, %v4350_v6 }
0x186d   :  { %v4356_v32 = vmul.f32 1.442695, %v4354_v31 }
0x186e   :  { %v4353_v33 = vpop.xlane.xlu1 %4352 }
0x186f   :  { %11986 = vpow2.f32 %v4356_v32  ;;  %v4355_v34 = vsub.f32 %v4344_v11, %v4353_v33 }
0x1871   :  { %v4358_v35 = vmul.f32 1.442695, %v4355_v34 }
0x1872   :  { %v4371_v36 = vpop.permute.xlu1 %4370 }
0x1873   :  { %11988 = vpow2.f32 %v4358_v35  ;;  %11373 = vmatpush3.msra.mxu0 %v4371_v36  ;;  %v10733_v35 = vld [vmem:[%s13612_s4 + $0x1] ss:$0 sm:$0xff] }
0x1874   :  { %4659 = vmatprep.subr.bf16.mxu0 %v11864_v23 }
0x1879   :  { %v11987_v37 = vpop.eup %11986 }
0x187a   :  { %v4360_v38 = vsel %vm379_vm2, %v11987_v37, 0.0 }
0x187b   :  { %4361 = vadd.xlane.f32.xlu0 %v4360_v38 }
0x187d   :  { %v11989_v39 = vpop.eup %11988 }
0x187e   :  { %v4363_v10 = vsel %vm379_vm2, %v11989_v39, 0.0 }
0x187f   :  { %4364 = vadd.xlane.f32.xlu0 %v4363_v10 }
0x1895   :  { %4446 = vrot.lane.b32.xlu0 %v12805_v45, %s12305_s1 }
0x1908   :  { %v4362_v62 = vpop.xlane.xlu0 %4361 }
0x1909   :  { %11990 = vrcp.f32 %v4362_v62 }
0x190c   :  { %v4365_v40 = vpop.xlane.xlu0 %4364 }
0x190d   :  { %11992 = vrcp.f32 %v4365_v40 }
0x1910   :  { %v4447_v41 = vpop.permute.xlu0 %4446 }
0x1911   :  { %11378 = vmatpush3.msra.mxu1 %v4447_v41  ;;  %v10697_v41 = vld [vmem:[%s13612_s4] ss:$0 sm:$0xff] }
0x1912   :  { %11382 = vmatprep.subr.bf16.mxu1 %v12301_v1 }
0x1913   :  { %v11991_v46 = vpop.eup %11990 }
0x1914   :  { %v4368_v51 = vmul.f32 %v11991_v46, %v11987_v37  ;;  %v10734_v37 = vld [vmem:[%s13613_s5 + $0x1] ss:$0 sm:$0xff] }
0x1916   :  { %11375 = vmatmul.mubr.msk.f32.vlgmr.msra.gmra.mrb[36].mxu0 %vm379_vm2, %v4368_v51 }
0x1917   :  { %v11993_v53 = vpop.eup %11992  ;;  %4691 = vmatprep.mubr.bf16.mxu0 %v12300_v0 }
0x1918   :  { %v4369_v54 = vmul.f32 %v11993_v53, %v11989_v39 }
0x191a   :  { %11380 = vmatmul.mubr.msk.f32.vlgmr.msra.gmra.mrb[36].mxu1 %vm379_vm2, %v4369_v54  ;;  %v10698_v54 = vld [vmem:[%s13613_s5] ss:$0 sm:$0xff] }
0x191b   :  { %11386 = vmatprep.mubr.msk.bf16.mxu1 %vm12302_vm0, %v12301_v1  ;;  %11383 = vmatpush3.bf16.msra.mxu1 %v11865_v24 }
0x191c   :  { %11384 = vmatprep.subr.bf16.mxu1 %v12301_v1 }
0x191f   :  { %11385 = vmatpush3.bf16.msra.mxu1 %v11869_v26 }
0x1920   :  { %11395 = vmatprep.subr.mxu1 %v12301_v1 }
0x19e9   :  { %v4442_v45 = vpop.f32.mrb[36].mxu0 }
0x19ea   :  { %v11376_v44 = vpop.f32.mrb[37].mxu0  ;;  %v4524_v13 = vsel %vm139_vm1, %v4442_v45, 0.0 }
0x19eb   :  { %4525 = vadd.xlane.f32.xlu1 %v4524_v13 }
0x19ed   :  { %v4518_v58 = vpop.f32.mrb[36].mxu1 }
0x19ee   :  { %v11381_v59 = vpop.f32.mrb[37].mxu1  ;;  %v4527_v61 = vsel %vm139_vm1, %v4518_v58, 0.0 }
0x19ef   :  { %4528 = vadd.xlane.f32.xlu0 %v4527_v61  ;;  %3036 = vadd.xlane.f32.xlu1 %v3035_v63 }
0x19f3   :  { %3039 = vadd.xlane.f32.xlu0 %v3038_v16 }
0x1a78   :  { %v4526_v2 = vpop.xlane.xlu1 %4525 }
0x1a79   :  { %v4530_v3 = vmul.f32 0.03125, %v4526_v2 }
0x1a7b   :  { %v4532_v47 = vsub.f32 %v4442_v45, %v4530_v3 }
0x1a7c   :  { %v4529_v49 = vpop.xlane.xlu0 %4528  ;;  %v3037_v50 = vpop.xlane.xlu1 %3036 }
0x1a7d   :  { %v4531_v4 = vmul.f32 0.03125, %v4529_v49  ;;  %v3041_v5 = vmul.f32 0.03125, %v3037_v50  ;;  %v4534_v7 = vmul.f32 %v4532_v47, %v4532_v47 }
0x1a7f   :  { %v4533_v8 = vsub.f32 %v4518_v58, %v4531_v4  ;;  %v3043_v9 = vsub.f32 %v12750_v52, %v3041_v5  ;;  %v4536_v15 = vsel %vm139_vm1, %v4534_v7, 0.0  ;;  %v11862_v52 = vld [vmem:[#allocation2 + $0x60] ss:$12 sps:$4 sm:$0xff]  }
0x1a80   :  { %v3040_v17 = vpop.xlane.xlu0 %3039  ;;  %4537 = vadd.xlane.f32.xlu1 %v4536_v15  ;;  %4660 = vmatpush1.bf16.msra.mxu0 %v11862_v52 }
0x1a81   :  { %v3042_v55 = vmul.f32 0.03125, %v3040_v17  ;;  %v4535_v57 = vmul.f32 %v4533_v8, %v4533_v8  ;;  %v3045_v56 = vmul.f32 %v3043_v9, %v3043_v9  ;;  %4661 = vmatprep.subr.bf16.mxu0 %v11868_v25 }
0x1a83   :  { %v3044_v18 = vsub.f32 %v12801_v60, %v3042_v55  ;;  %v4539_v19 = vsel %vm139_vm1, %v4535_v57, 0.0  ;;  %v3047_v20 = vsel %vm139_vm1, %v3045_v56, 0.0 }
0x1a84   :  { %4540 = vadd.xlane.f32.xlu0 %v4539_v19  ;;  %3048 = vadd.xlane.f32.xlu1 %v3047_v20 }
0x1a85   :  { %v3046_v21 = vmul.f32 %v3044_v18, %v3044_v18  ;;  %4662 = vmatpush1.bf16.msra.mxu0 %v11866_v48 }
0x1a86   :  { %11390 = vmatprep.subr.mxu0 %v12301_v1 }
0x1a87   :  { %v3050_v22 = vsel %vm139_vm1, %v3046_v21, 0.0  ;;  %v4577_v21 = vld [vmem:[%s13614_s6 + $0x8] sm:$0xff] }
0x1a88   :  { %3051 = vadd.xlane.f32.xlu0 %v3050_v22 }
0x1b0d   :  { %v4538_v60 = vpop.xlane.xlu1 %4537 }
0x1b0e   :  { %v4542_v27 = vmul.f32 0.03125, %v4538_v60 }
0x1b10   :  { %v4544_v28 = vadd.f32 1e-05, %v4542_v27 }
0x1b11   :  { %v4541_v29 = vpop.xlane.xlu0 %4540  ;;  %v3049_v30 = vpop.xlane.xlu1 %3048 }
0x1b12   :  { %11994 = vrsqrt.f32 %v4544_v28  ;;  %v4543_v11 = vmul.f32 0.03125, %v4541_v29  ;;  %v3053_v14 = vmul.f32 0.03125, %v3049_v30 }
0x1b14   :  { %v4545_v12 = vadd.f32 1e-05, %v4543_v11  ;;  %v3055_v6 = vadd.f32 1e-05, %v3053_v14 }
0x1b15   :  { %v3052_v31 = vpop.xlane.xlu0 %3051 }
0x1b16   :  { %11996 = vrsqrt.f32 %v4545_v12  ;;  %v3054_v32 = vmul.f32 0.03125, %v3052_v31 }
0x1b17   :  { %11998 = vrsqrt.f32 %v3055_v6 }
0x1b18   :  { %v3056_v33 = vadd.f32 1e-05, %v3054_v32 }
0x1b1a   :  { %12000 = vrsqrt.f32 %v3056_v33 }
0x1b1c   :  { %v11995_v34 = vpop.eup %11994 }
0x1b1d   :  { %v4548_v36 = vmul.f32 %v11995_v34, %v4532_v47 }
0x1b1f   :  { %v4556_v38 = vmul.f32 %v10733_v35, %v4548_v36 }
0x1b20   :  { %v11997_v39 = vpop.eup %11996 }
0x1b21   :  { %v11999_v10 = vpop.eup %11998  ;;  %v4564_v62 = vadd.f32 %v10734_v37, %v4556_v38  ;;  %v4549_v40 = vmul.f32 %v11997_v39, %v4533_v8 }
0x1b22   :  { %v3059_v46 = vmul.f32 %v11999_v10, %v3043_v9 }
0x1b23   :  { %v4566_v51 = vadd.f32 %v4564_v62, %v12587_v42  ;;  %v4557_v53 = vmul.f32 %v10733_v35, %v4549_v40 }
0x1b24   :  { %v12001_v45 = vpop.eup %12000  ;;  %v3067_v44 = vmul.f32 %v10697_v41, %v3059_v46 }
0x1b25   :  { %v4568_v13 = vmul.f32 0.5, %v4566_v51  ;;  %v4565_v58 = vadd.f32 %v10734_v37, %v4557_v53  ;;  %v3060_v59 = vmul.f32 %v12001_v45, %v3044_v18  ;;  %v4590_v63 = vmul.f32 1.442695, %v4566_v51 }
0x1b26   :  { %v3075_v61 = vadd.f32 %v10698_v54, %v3067_v44  ;;  %v4584_v4 = vadd.f32 1.0, %v4566_v51 }
0x1b27   :  { %v4570_v16 = vmul.f32 1.442695, %v4568_v13  ;;  %v4567_v2 = vadd.f32 %v4565_v58, %v12590_v43  ;;  %v3068_v3 = vmul.f32 %v10697_v41, %v3060_v59  ;;  %12002 = vpow2.f32 %v4590_v63 }
0x1b28   :  { %v3077_v47 = vadd.f32 %v3075_v61, %v12587_v42  ;;  %v4576_v42 = vld [vmem:[%s13614_s6] sm:$0xff] }
0x1b29   :  { %12004 = vpow2.f32 %v4570_v16  ;;  %v4569_v49 = vmul.f32 0.5, %v4567_v2  ;;  %v3076_v50 = vadd.f32 %v10698_v54, %v3068_v3  ;;  %v4592_v7 = vmul.f32 1.442695, %v4567_v2 }
0x1b2a   :  { %v4586_v5 = vmul.f32 %v3077_v47, %v3077_v47  ;;  %v4585_v17 = vadd.f32 1.0, %v4567_v2  ;;  %v4574_v48 = vmul.f32 0.0, %v3077_v47 }
0x1b2b   :  { %v4572_v8 = vmul.f32 1.442695, %v4569_v49  ;;  %v3078_v9 = vadd.f32 %v3076_v50, %v12590_v43  ;;  %12006 = vpow2.f32 %v4592_v7 }
0x1b2c   :  { %v4588_v15 = vsub.f32 %v4584_v4, %v4586_v5 }
0x1b2d   :  { %12008 = vpow2.f32 %v4572_v8  ;;  %v4587_v55 = vmul.f32 %v3078_v9, %v3078_v9  ;;  %v4575_v60 = vmul.f32 0.0, %v3078_v9 }
0x1b2f   :  { %v4589_v57 = vsub.f32 %v4585_v17, %v4587_v55 }
0x1b31   :  { %v12003_v56 = vpop.eup %12002 }
0x1b32   :  { %v4594_v19 = vsub.f32 %v4588_v15, %v12003_v56 }
0x1b33   :  { %v12005_v18 = vpop.eup %12004 }
0x1b34   :  { %v4578_v20 = vmul.f32 %v12005_v18, %v4576_v42  ;;  %v4596_v25 = vsel %vm139_vm1, %v4594_v19, 0.0 }
0x1b35   :  { %v12007_v22 = vpop.eup %12006 }
0x1b36   :  { %v4595_v52 = vsub.f32 %v4589_v57, %v12007_v22  ;;  %v4580_v24 = vadd.f32 %v4578_v20, %v3077_v47 }
0x1b37   :  { %v12009_v43 = vpop.eup %12008 }
0x1b38   :  { %v4579_v23 = vmul.f32 %v12009_v43, %v4577_v21  ;;  %v4597_v26 = vsel %vm139_vm1, %v4595_v52, 0.0  ;;  %v12944_v29 = vadd.f32 %v4580_v24, %v4574_v48 }
0x1b39   :  { %v12942_v28 = vadd.f32 %v4597_v26, %v4596_v25 }
0x1b3a   :  { %v4581_v27 = vadd.f32 %v4579_v23, %v3078_v9 }
0x1b3c   :  { %v12946_v30 = vadd.f32 %v4581_v27, %v4575_v60 }
0x1b3e   :  { %v4623_v11 = vpack.c.bf16 %v12946_v30, %v12944_v29 }
0x1b40   :  { %10741 = vmatmul.mubr.msk.bf16.vlgmr.msra.gmra.mrb[44].mxu0 %vm139_vm1, %v4623_v11  ;;  %11387 = vmatmul.mubr.msk.bf16.vlgmr.msra.gmra.mrb[44].mxu1 %vm139_vm1, %v4623_v11 }
0x1b41   :  { %11392 = vmatprep.mubr.msk.f32.mxu0 %vm12302_vm0, %v12301_v1  ;;  %11397 = vmatprep.mubr.msk.f32.mxu1 %vm12302_vm0, %v12301_v1 }
0x1c13   :  { %v12956_v14 = vpop.f32.mrb[44].mxu0  ;;  %v12958_v12 = vpop.f32.mrb[44].mxu1 }
0x1c14   :  { %v12960_v6 = vpop.f32.mrb[45].mxu0  ;;  %v11388_v31 = vpop.f32.mrb[45].mxu1 }
0x1c15   :  { %v12962_v32 = vpop.f32.mrb[46].mxu1  ;;  %4919 = vrot.lane.b32.xlu1 %v12960_v6, %s12303_s3  ;;  %v12966_v33 = vpop.f32.mrb[46].mxu0  ;;  %11391 = vmatpush3.xpose.msk.msra.mxu0 %vm139_vm1, %v12960_v6 }
0x1c16   :  { %v12970_v34 = vpop.f32.mrb[47].mxu0  ;;  %v11389_v35 = vpop.f32.mrb[47].mxu1  ;;  %11400 = vmatprep.subr.mxu0 %v12301_v1 }
0x1c17   :  { %4997 = vrot.lane.b32.xlu0 %v12970_v34, %s12303_s3  ;;  %11396 = vmatpush3.xpose.msk.msra.mxu1 %vm139_vm1, %v12970_v34 }
0x1c18   :  { %11393 = vmatmul.mubr.msk.f32.vlgmr.msra.gmra.mrb[42].mxu0 %vm139_vm1, %v12956_v14  ;;  %11405 = vmatprep.subr.mxu1 %v12301_v1 }
0x1c19   :  { %4917 = vrot.lane.b32.xlu1 %v12956_v14, %s12303_s3  ;;  %11402 = vmatprep.mubr.msk.f32.mxu0 %vm12302_vm0, %v12301_v1 }
0x1c1a   :  { %11398 = vmatmul.mubr.msk.f32.vlgmr.msra.gmra.mrb[42].mxu1 %vm139_vm1, %v12966_v33 }
0x1c1b   :  { %11407 = vmatprep.mubr.msk.f32.mxu1 %vm12302_vm0, %v12301_v1 }
0x1c1d   :  { %4995 = vrot.lane.b32.xlu1 %v12966_v33, %s12303_s3 }
0x1c87   :  { %v4920_v36 = vpop.permute.xlu1 %4919 }
0x1c88   :  { %11401 = vmatpush3.xpose.msk.msra.mxu0 %vm139_vm1, %v4920_v36 }
0x1c89   :  { %v4998_v37 = vpop.permute.xlu0 %4997  ;;  %11410 = vmatprep.subr.mxu0 %v12301_v1 }
0x1c8a   :  { %11406 = vmatpush3.xpose.msk.msra.mxu1 %vm139_vm1, %v4998_v37 }
0x1c8b   :  { %v4918_v38 = vpop.permute.xlu1 %4917  ;;  %11415 = vmatprep.subr.mxu1 %v12301_v1 }
0x1c8c   :  { %11403 = vmatmul.mubr.msk.f32.vlgmr.msra.gmra.mrb[48].mxu0 %vm139_vm1, %v4918_v38 }
0x1c8d   :  { %11412 = vmatprep.mubr.msk.f32.mxu0 %vm12302_vm0, %v12301_v1 }
0x1c8f   :  { %v4996_v39 = vpop.permute.xlu1 %4995 }
0x1c90   :  { %11408 = vmatmul.mubr.msk.f32.vlgmr.msra.gmra.mrb[48].mxu1 %vm139_vm1, %v4996_v39 }
0x1c91   :  { %11417 = vmatprep.mubr.msk.f32.mxu1 %vm12302_vm0, %v12301_v1 }
0x1ceb   :  { %v4815_v10 = vpop.f32.mrb[42].mxu0 }
0x1cec   :  { %v11394_v62 = vpop.f32.mrb[43].mxu0  ;;  %v4895_v13 = vsel %vm379_vm2, %v4815_v10, -inf }
0x1ced   :  { %v4891_v40 = vpop.f32.mrb[42].mxu1 }
0x1cee   :  { %v11399_v41 = vpop.f32.mrb[43].mxu1  ;;  %v4898_v58 = vsel %vm379_vm2, %v4891_v40, -inf }
0x1d5f   :  { %v4991_v46 = vpop.f32.mrb[48].mxu0 }
0x1d60   :  { %v11404_v51 = vpop.f32.mrb[49].mxu0  ;;  %v5073_v53 = vsel %vm379_vm2, %v4991_v46, -inf }
0x1d61   :  { %5074 = vmax.xlane.f32.xlu0 %v5073_v53 }
0x1d63   :  { %v5069_v54 = vpop.f32.mrb[48].mxu1 }
0x1d64   :  { %v11409_v45 = vpop.f32.mrb[49].mxu1  ;;  %v5076_v44 = vsel %vm379_vm2, %v5069_v54, -inf }
0x1d65   :  { %5077 = vmax.xlane.f32.xlu1 %v5076_v44  ;;  %4896 = vmax.xlane.f32.xlu0 %v4895_v13 }
0x1d69   :  { %4899 = vmax.xlane.f32.xlu0 %v4898_v58 }
0x1d76   :  { %5096 = vrot.lane.b32.xlu1 %v12958_v12, %s12303_s3 }
0x1dee   :  { %v5075_v59 = vpop.xlane.xlu0 %5074 }
0x1def   :  { %v5079_v61 = vsub.f32 %v4991_v46, %v5075_v59 }
0x1df1   :  { %v5081_v49 = vmul.f32 1.442695, %v5079_v61 }
0x1df2   :  { %v5078_v63 = vpop.xlane.xlu1 %5077  ;;  %v4897_v16 = vpop.xlane.xlu0 %4896 }
0x1df3   :  { %v4901_v2 = vsub.f32 %v4815_v10, %v4897_v16  ;;  %v5080_v3 = vsub.f32 %v5069_v54, %v5078_v63 }
0x1df5   :  { %v4903_v47 = vmul.f32 1.442695, %v4901_v2  ;;  %v5083_v7 = vmul.f32 1.442695, %v5080_v3 }
0x1df6   :  { %v5097_v50 = vpop.permute.xlu1 %5096  ;;  %v4900_v4 = vpop.xlane.xlu0 %4899 }
0x1df7   :  { %v4902_v5 = vsub.f32 %v4891_v40, %v4900_v4  ;;  %11411 = vmatpush3.msra.mxu0 %v5097_v50  ;;  %12010 = vpow2.f32 %v4903_v47 }
0x1df8   :  { %11420 = vmatprep.subr.mxu0 %v12301_v1  ;;  %12012 = vpow2.f32 %v5081_v49 }
0x1df9   :  { %v4905_v8 = vmul.f32 1.442695, %v4902_v5 }
0x1dfb   :  { %12014 = vpow2.f32 %v4905_v8 }
0x1dfc   :  { %12016 = vpow2.f32 %v5083_v7 }
0x1e01   :  { %v12011_v9 = vpop.eup %12010 }
0x1e02   :  { %v4907_v15 = vsel %vm379_vm2, %v12011_v9, 0.0  ;;  %v12013_v17 = vpop.eup %12012 }
0x1e03   :  { %4908 = vadd.xlane.f32.xlu1 %v4907_v15  ;;  %v5085_v56 = vsel %vm379_vm2, %v12013_v17, 0.0 }
0x1e05   :  { %v12015_v55 = vpop.eup %12014 }
0x1e06   :  { %v4910_v57 = vsel %vm379_vm2, %v12015_v55, 0.0  ;;  %v12017_v42 = vpop.eup %12016 }
0x1e07   :  { %4911 = vadd.xlane.f32.xlu0 %v4910_v57  ;;  %5086 = vadd.xlane.f32.xlu1 %v5085_v56  ;;  %v5088_v18 = vsel %vm379_vm2, %v12017_v42, 0.0 }
0x1e0b   :  { %5089 = vadd.xlane.f32.xlu0 %v5088_v18 }
0x1e18   :  { %5397 = vrot.lane.b32.xlu1 %v12960_v6, %s12304_s16 }
0x1e1c   :  { %5475 = vrot.lane.b32.xlu1 %v12970_v34, %s12304_s16 }
0x1e20   :  { %5473 = vrot.lane.b32.xlu1 %v12966_v33, %s12304_s16 }
0x1e21   :  { %5173 = vrot.lane.b32.xlu0 %v12962_v32, %s12303_s3 }
0x1e25   :  { %5395 = vrot.lane.b32.xlu0 %v12956_v14, %s12304_s16 }
0x1e90   :  { %v4909_v19 = vpop.xlane.xlu1 %4908 }
0x1e94   :  { %v4912_v20 = vpop.xlane.xlu0 %4911  ;;  %v5087_v21 = vpop.xlane.xlu1 %5086 }
0x1e95   :  { %12018 = vrcp.f32 %v5087_v21 }
0x1e98   :  { %v5090_v22 = vpop.xlane.xlu0 %5089  ;;  %v5398_v26 = vpop.permute.xlu1 %5397 }
0x1e99   :  { %12020 = vrcp.f32 %v5090_v22 }
0x1e9a   :  { %12022 = vrcp.f32 %v4909_v19 }
0x1e9b   :  { %12024 = vrcp.f32 %v4912_v20 }
0x1e9c   :  { %v5174_v43 = vpop.permute.xlu0 %5173  ;;  %v5476_v11 = vpop.permute.xlu1 %5475 }
0x1e9d   :  { %11416 = vmatpush3.msra.mxu1 %v5174_v43 }
0x1e9e   :  { %11425 = vmatprep.subr.mxu1 %v12301_v1 }
0x1e9f   :  { %v12019_v52 = vpop.eup %12018 }
0x1ea0   :  { %v5093_v23 = vmul.f32 %v12019_v52, %v12013_v17  ;;  %v5396_v35 = vpop.permute.xlu0 %5395  ;;  %v5474_v36 = vpop.permute.xlu1 %5473 }
0x1ea2   :  { %11413 = vmatmul.mubr.msk.f32.vlgmr.msra.gmra.mrb[50].mxu0 %vm379_vm2, %v5093_v23 }
0x1ea3   :  { %v12021_v24 = vpop.eup %12020  ;;  %11421 = vmatpush3.msra.mxu0 %v12958_v12  ;;  %11422 = vmatprep.mubr.msk.f32.mxu0 %vm12302_vm0, %v12301_v1 }
0x1ea4   :  { %v5094_v25 = vmul.f32 %v12021_v24, %v12017_v42  ;;  %11430 = vmatprep.subr.mxu0 %v12301_v1  ;;  %v12023_v48 = vpop.eup %12022 }
0x1ea5   :  { %v12025_v60 = vpop.eup %12024  ;;  %v4915_v27 = vmul.f32 %v12023_v48, %v12011_v9 }
0x1ea6   :  { %11418 = vmatmul.mubr.msk.f32.vlgmr.msra.gmra.mrb[50].mxu1 %vm379_vm2, %v5094_v25  ;;  %v4916_v31 = vmul.f32 %v12025_v60, %v12015_v55 }
0x1ea7   :  { %11426 = vmatpush3.msra.mxu1 %v12962_v32  ;;  %11427 = vmatprep.mubr.msk.f32.mxu1 %vm12302_vm0, %v12301_v1 }
0x1ea8   :  { %11435 = vmatprep.subr.mxu1 %v12301_v1 }
0x1eaa   :  { %11423 = vmatmul.mubr.msk.f32.vlgmr.msra.gmra.mrb[50].mxu0 %vm379_vm2, %v4915_v27 }
0x1eab   :  { %11431 = vmatpush3.xpose.msk.msra.mxu0 %vm139_vm1, %v5398_v26  ;;  %11432 = vmatprep.mubr.msk.f32.mxu0 %vm12302_vm0, %v12301_v1 }
0x1eac   :  { %11440 = vmatprep.subr.mxu0 %v12301_v1 }
0x1eae   :  { %11428 = vmatmul.mubr.msk.f32.vlgmr.msra.gmra.mrb[50].mxu1 %vm379_vm2, %v4916_v31  ;;  %11433 = vmatmul.mubr.msk.f32.vlgmr.msra.gmra.mrb[52].mxu0 %vm139_vm1, %v5396_v35 }
0x1eaf   :  { %11436 = vmatpush3.xpose.msk.msra.mxu1 %vm139_vm1, %v5476_v11  ;;  %11437 = vmatprep.mubr.msk.f32.mxu1 %vm12302_vm0, %v12301_v1 }
0x1eb0   :  { %11445 = vmatprep.subr.mxu1 %v12301_v1  ;;  %11442 = vmatprep.mubr.msk.f32.mxu0 %vm12302_vm0, %v12301_v1 }
0x1eb2   :  { %11438 = vmatmul.mubr.msk.f32.vlgmr.msra.gmra.mrb[52].mxu1 %vm139_vm1, %v5474_v36 }
0x1eb3   :  { %11447 = vmatprep.mubr.msk.f32.mxu1 %vm12302_vm0, %v12301_v1 }
0x1f81   :  { %v5469_v37 = vpop.f32.mrb[52].mxu0 }
0x1f82   :  { %v11434_v38 = vpop.f32.mrb[53].mxu0  ;;  %v5551_v39 = vsel %vm379_vm2, %v5469_v37, -inf }
0x1f83   :  { %5552 = vmax.xlane.f32.xlu0 %v5551_v39 }
0x1f85   :  { %v5547_v10 = vpop.f32.mrb[52].mxu1 }
0x1f86   :  { %v11439_v62 = vpop.f32.mrb[53].mxu1  ;;  %v5554_v40 = vsel %vm379_vm2, %v5547_v10, -inf }
0x1f87   :  { %5555 = vmax.xlane.f32.xlu1 %v5554_v40 }
0x1f98   :  { %5573 = vrot.lane.b32.xlu1 %v12958_v12, %s12304_s16 }
0x1f99   :  { %5649 = vrot.lane.b32.xlu0 %v12962_v32, %s12304_s16 }
0x1f9c   :  { %5729 = vrot.lane.b32.xlu1 %v12960_v6, %s12305_s1 }
0x1fa0   :  { %5807 = vrot.lane.b32.xlu1 %v12970_v34, %s12305_s1 }
0x1fa4   :  { %5805 = vrot.lane.b32.xlu1 %v12966_v33, %s12305_s1 }
0x2010   :  { %v5553_v41 = vpop.xlane.xlu0 %5552 }
0x2011   :  { %v5557_v46 = vsub.f32 %v5469_v37, %v5553_v41 }
0x2013   :  { %v5559_v51 = vmul.f32 1.442695, %v5557_v46 }
0x2014   :  { %v5556_v53 = vpop.xlane.xlu1 %5555  ;;  %v5650_v45 = vpop.permute.xlu0 %5649 }
0x2015   :  { %v5558_v54 = vsub.f32 %v5547_v10, %v5556_v53  ;;  %12026 = vpow2.f32 %v5559_v51  ;;  %11446 = vmatpush3.msra.mxu1 %v5650_v45  ;;  %v11872_v53 = vld [vmem:[#allocation2 + $0x94] ss:$12 sps:$4 sm:$0xff]   ;;  %v11873_v45 = vld [vmem:[#allocation2 + $0x98] ss:$12 sps:$4 sm:$0xff]  }
0x2016   :  { %11455 = vmatprep.subr.mxu1 %v12301_v1 }
0x2017   :  { %v5561_v44 = vmul.f32 1.442695, %v5558_v54  ;;  %v11870_v54 = vld [vmem:[#allocation2 + $0x90] ss:$12 sps:$4 sm:$0xff]  }
0x2018   :  { %v5574_v13 = vpop.permute.xlu1 %5573 }
0x2019   :  { %12028 = vpow2.f32 %v5561_v44  ;;  %11441 = vmatpush3.msra.mxu0 %v5574_v13  ;;  %v11876_v44 = vld [vmem:[#allocation2 + $0xac] ss:$12 sps:$4 sm:$0xff]   ;;  %v11874_v13 = vld [vmem:[#allocation2 + $0xa8] ss:$12 sps:$4 sm:$0xff]  }
0x201a   :  { %11450 = vmatprep.subr.mxu0 %v12301_v1 }
0x201c   :  { %v5730_v63 = vpop.permute.xlu1 %5729 }
0x201f   :  { %v12027_v6 = vpop.eup %12026 }
0x2020   :  { %v5563_v34 = vsel %vm379_vm2, %v12027_v6, 0.0  ;;  %v5808_v47 = vpop.permute.xlu1 %5807 }
0x2021   :  { %5564 = vadd.xlane.f32.xlu0 %v5563_v34 }
0x2023   :  { %v12029_v33 = vpop.eup %12028 }
0x2024   :  { %v5566_v58 = vsel %vm379_vm2, %v12029_v33, 0.0  ;;  %v5806_v50 = vpop.permute.xlu1 %5805 }
0x2025   :  { %5567 = vadd.xlane.f32.xlu0 %v5566_v58 }
0x203b   :  { %5727 = vrot.lane.b32.xlu0 %v12956_v14, %s12305_s1 }
0x20ae   :  { %v5565_v59 = vpop.xlane.xlu0 %5564 }
0x20af   :  { %12030 = vrcp.f32 %v5565_v59 }
0x20b2   :  { %v5568_v61 = vpop.xlane.xlu0 %5567 }
0x20b3   :  { %12032 = vrcp.f32 %v5568_v61 }
0x20b6   :  { %v5728_v14 = vpop.permute.xlu0 %5727 }
0x20b9   :  { %v12031_v16 = vpop.eup %12030 }
0x20ba   :  { %v5571_v2 = vmul.f32 %v12031_v16, %v12027_v6  ;;  %v11877_v6 = vld [vmem:[#allocation2 + $0xb0] ss:$12 sps:$4 sm:$0xff]  }
0x20bc   :  { %11443 = vmatmul.mubr.msk.f32.vlgmr.msra.gmra.mrb[50].mxu0 %vm379_vm2, %v5571_v2  ;;  %v10767_v2 = vld [vmem:[#allocation6 + $0x2] ss:$0 sm:$0xff] }
0x20bd   :  { %v12033_v3 = vpop.eup %12032  ;;  %11451 = vmatpush3.xpose.msk.msra.mxu0 %vm139_vm1, %v5730_v63  ;;  %11452 = vmatprep.mubr.msk.f32.mxu0 %vm12302_vm0, %v12301_v1 }
0x20be   :  { %v5572_v49 = vmul.f32 %v12033_v3, %v12029_v33  ;;  %11460 = vmatprep.subr.mxu0 %v12301_v1 }
0x20c0   :  { %11448 = vmatmul.mubr.msk.f32.vlgmr.msra.gmra.mrb[50].mxu1 %vm379_vm2, %v5572_v49  ;;  %11453 = vmatmul.mubr.msk.f32.vlgmr.msra.gmra.mrb[54].mxu0 %vm139_vm1, %v5728_v14  ;;  %v10768_v14 = vld [vmem:[#allocation8 + $0x2] ss:$0 sm:$0xff] }
0x20c1   :  { %11456 = vmatpush3.xpose.msk.msra.mxu1 %vm139_vm1, %v5808_v47  ;;  %11457 = vmatprep.mubr.msk.f32.mxu1 %vm12302_vm0, %v12301_v1 }
0x20c2   :  { %11465 = vmatprep.subr.mxu1 %v12301_v1  ;;  %11462 = vmatprep.mubr.msk.f32.mxu0 %vm12302_vm0, %v12301_v1 }
0x20c4   :  { %11458 = vmatmul.mubr.msk.f32.vlgmr.msra.gmra.mrb[54].mxu1 %vm139_vm1, %v5806_v50 }
0x20c5   :  { %11467 = vmatprep.mubr.msk.f32.mxu1 %vm12302_vm0, %v12301_v1 }
0x2193   :  { %v5801_v4 = vpop.f32.mrb[54].mxu0 }
0x2194   :  { %v11454_v5 = vpop.f32.mrb[55].mxu0  ;;  %v5883_v7 = vsel %vm379_vm2, %v5801_v4, -inf }
0x2195   :  { %5884 = vmax.xlane.f32.xlu0 %v5883_v7 }
0x2197   :  { %v5879_v8 = vpop.f32.mrb[54].mxu1 }
0x2198   :  { %v11459_v9 = vpop.f32.mrb[55].mxu1  ;;  %v5886_v15 = vsel %vm379_vm2, %v5879_v8, -inf }
0x2199   :  { %5887 = vmax.xlane.f32.xlu1 %v5886_v15 }
0x21aa   :  { %5905 = vrot.lane.b32.xlu1 %v12958_v12, %s12305_s1 }
0x2222   :  { %v5885_v17 = vpop.xlane.xlu0 %5884 }
0x2223   :  { %v5889_v55 = vsub.f32 %v5801_v4, %v5885_v17 }
0x2225   :  { %v5891_v57 = vmul.f32 1.442695, %v5889_v55 }
0x2226   :  { %v5888_v42 = vpop.xlane.xlu1 %5887 }
0x2227   :  { %12034 = vpow2.f32 %v5891_v57  ;;  %v5890_v56 = vsub.f32 %v5879_v8, %v5888_v42 }
0x2229   :  { %v5893_v18 = vmul.f32 1.442695, %v5890_v56 }
0x222a   :  { %v5906_v19 = vpop.permute.xlu1 %5905 }
0x222b   :  { %12036 = vpow2.f32 %v5893_v18  ;;  %11461 = vmatpush3.msra.mxu0 %v5906_v19 }
0x222c   :  { %6152 = vmatprep.subr.bf16.mxu0 %v11872_v53 }
0x2231   :  { %v12035_v20 = vpop.eup %12034 }
0x2232   :  { %v5895_v21 = vsel %vm379_vm2, %v12035_v20, 0.0 }
0x2233   :  { %5896 = vadd.xlane.f32.xlu0 %v5895_v21 }
0x2235   :  { %v12037_v22 = vpop.eup %12036 }
0x2236   :  { %v5898_v43 = vsel %vm379_vm2, %v12037_v22, 0.0 }
0x2237   :  { %5899 = vadd.xlane.f32.xlu0 %v5898_v43 }
0x224d   :  { %5981 = vrot.lane.b32.xlu0 %v12962_v32, %s12305_s1 }
0x22c0   :  { %v5897_v12 = vpop.xlane.xlu0 %5896 }
0x22c1   :  { %12038 = vrcp.f32 %v5897_v12 }
0x22c4   :  { %v5900_v52 = vpop.xlane.xlu0 %5899 }
0x22c5   :  { %12040 = vrcp.f32 %v5900_v52 }
0x22c8   :  { %v5982_v23 = vpop.permute.xlu0 %5981 }
0x22c9   :  { %11466 = vmatpush3.msra.mxu1 %v5982_v23 }
0x22ca   :  { %11470 = vmatprep.subr.bf16.mxu1 %v12301_v1 }
0x22cb   :  { %v12039_v24 = vpop.eup %12038 }
0x22cc   :  { %v5903_v25 = vmul.f32 %v12039_v24, %v12035_v20 }
0x22ce   :  { %11463 = vmatmul.mubr.msk.f32.vlgmr.msra.gmra.mrb[50].mxu0 %vm379_vm2, %v5903_v25 }
0x22cf   :  { %v12041_v26 = vpop.eup %12040  ;;  %6184 = vmatprep.mubr.bf16.mxu0 %v12300_v0  ;;  %6153 = vmatpush1.bf16.msra.mxu0 %v11870_v54 }
0x22d0   :  { %v5904_v48 = vmul.f32 %v12041_v26, %v12037_v22  ;;  %6154 = vmatprep.subr.bf16.mxu0 %v11876_v44 }
0x22d2   :  { %11468 = vmatmul.mubr.msk.f32.vlgmr.msra.gmra.mrb[50].mxu1 %vm379_vm2, %v5904_v48 }
0x22d3   :  { %11474 = vmatprep.mubr.msk.bf16.mxu1 %vm12302_vm0, %v12301_v1  ;;  %11471 = vmatpush3.bf16.msra.mxu1 %v11873_v45 }
0x22d4   :  { %11472 = vmatprep.subr.bf16.mxu1 %v12301_v1  ;;  %6155 = vmatpush1.bf16.msra.mxu0 %v11874_v13 }
0x22d5   :  { %11478 = vmatprep.subr.mxu0 %v12301_v1 }
0x22d7   :  { %11473 = vmatpush3.bf16.msra.mxu1 %v11877_v6 }
0x22d8   :  { %11483 = vmatprep.subr.mxu1 %v12301_v1 }
0x23a1   :  { %v5977_v32 = vpop.f32.mrb[50].mxu0 }
0x23a2   :  { %v11464_v60 = vpop.f32.mrb[51].mxu0  ;;  %v6059_v27 = vsel %vm139_vm1, %v5977_v32, 0.0 }
0x23a3   :  { %6060 = vadd.xlane.f32.xlu1 %v6059_v27 }
0x23a5   :  { %v6053_v11 = vpop.f32.mrb[50].mxu1 }
0x23a6   :  { %v11469_v31 = vpop.f32.mrb[51].mxu1  ;;  %v6062_v35 = vsel %vm139_vm1, %v6053_v11, 0.0 }
0x23a7   :  { %6063 = vadd.xlane.f32.xlu0 %v6062_v35 }
0x2430   :  { %v6061_v36 = vpop.xlane.xlu1 %6060 }
0x2431   :  { %v6065_v37 = vmul.f32 0.03125, %v6061_v36 }
0x2433   :  { %v6067_v38 = vsub.f32 %v5977_v32, %v6065_v37 }
0x2434   :  { %v6064_v39 = vpop.xlane.xlu0 %6063 }
0x2435   :  { %v6066_v10 = vmul.f32 0.03125, %v6064_v39  ;;  %v6069_v62 = vmul.f32 %v6067_v38, %v6067_v38 }
0x2437   :  { %v6068_v40 = vsub.f32 %v6053_v11, %v6066_v10  ;;  %v6071_v41 = vsel %vm139_vm1, %v6069_v62, 0.0 }
0x2438   :  { %6072 = vadd.xlane.f32.xlu1 %v6071_v41 }
0x2439   :  { %v6070_v46 = vmul.f32 %v6068_v40, %v6068_v40 }
0x243b   :  { %v6074_v51 = vsel %vm139_vm1, %v6070_v46, 0.0 }
0x243c   :  { %6075 = vadd.xlane.f32.xlu0 %v6074_v51 }
0x24c5   :  { %v6073_v34 = vpop.xlane.xlu1 %6072 }
0x24c6   :  { %v6077_v33 = vmul.f32 0.03125, %v6073_v34 }
0x24c8   :  { %v6079_v58 = vadd.f32 1e-05, %v6077_v33 }
0x24c9   :  { %v6076_v59 = vpop.xlane.xlu0 %6075 }
0x24ca   :  { %12042 = vrsqrt.f32 %v6079_v58  ;;  %v6078_v61 = vmul.f32 0.03125, %v6076_v59 }
0x24cc   :  { %v6080_v63 = vadd.f32 1e-05, %v6078_v61 }
0x24ce   :  { %12044 = vrsqrt.f32 %v6080_v63 }
0x24d4   :  { %v12043_v16 = vpop.eup %12042 }
0x24d5   :  { %v6083_v3 = vmul.f32 %v12043_v16, %v6067_v38 }
0x24d7   :  { %v6091_v47 = vmul.f32 %v10767_v2, %v6083_v3 }
0x24d8   :  { %v12045_v49 = vpop.eup %12044 }
0x24d9   :  { %v6084_v50 = vmul.f32 %v12045_v49, %v6068_v40  ;;  %v6099_v5 = vadd.f32 %v10768_v14, %v6091_v47 }
0x24db   :  { %v6092_v4 = vmul.f32 %v10767_v2, %v6084_v50  ;;  %v13104_v8 = vadd.f32 %v6099_v5, %v12944_v29 }
0x24dd   :  { %v6100_v7 = vadd.f32 %v10768_v14, %v6092_v4 }
0x24df   :  { %v13107_v9 = vadd.f32 %v6100_v7, %v12946_v30 }
0x24e1   :  { %v6116_v15 = vpack.c.bf16 %v13107_v9, %v13104_v8 }
0x24e3   :  { %10775 = vmatmul.mubr.msk.bf16.vlgmr.msra.gmra.mrb[56].mxu0 %vm139_vm1, %v6116_v15  ;;  %11475 = vmatmul.mubr.msk.bf16.vlgmr.msra.gmra.mrb[56].mxu1 %vm139_vm1, %v6116_v15 }
0x24e4   :  { %11480 = vmatprep.mubr.msk.f32.mxu0 %vm12302_vm0, %v12301_v1  ;;  %11485 = vmatprep.mubr.msk.f32.mxu1 %vm12302_vm0, %v12301_v1 }
0x25b6   :  { %v13117_v17 = vpop.f32.mrb[56].mxu0  ;;  %v13119_v29 = vpop.f32.mrb[56].mxu1 }
0x25b7   :  { %v13121_v55 = vpop.f32.mrb[57].mxu0  ;;  %v11476_v30 = vpop.f32.mrb[57].mxu1 }
0x25b8   :  { %v13123_v57 = vpop.f32.mrb[58].mxu1  ;;  %6412 = vrot.lane.b32.xlu1 %v13121_v55, %s12303_s3  ;;  %v13127_v42 = vpop.f32.mrb[58].mxu0  ;;  %11479 = vmatpush3.xpose.msk.msra.mxu0 %vm139_vm1, %v13121_v55 }
0x25b9   :  { %v13131_v56 = vpop.f32.mrb[59].mxu0  ;;  %v11477_v18 = vpop.f32.mrb[59].mxu1  ;;  %11488 = vmatprep.subr.mxu0 %v12301_v1 }
0x25ba   :  { %6490 = vrot.lane.b32.xlu0 %v13131_v56, %s12303_s3  ;;  %11484 = vmatpush3.xpose.msk.msra.mxu1 %vm139_vm1, %v13131_v56 }
0x25bb   :  { %11481 = vmatmul.mubr.msk.f32.vlgmr.msra.gmra.mrb[60].mxu0 %vm139_vm1, %v13117_v17  ;;  %11493 = vmatprep.subr.mxu1 %v12301_v1 }
0x25bc   :  { %6410 = vrot.lane.b32.xlu1 %v13117_v17, %s12303_s3  ;;  %11490 = vmatprep.mubr.msk.f32.mxu0 %vm12302_vm0, %v12301_v1 }
0x25bd   :  { %11486 = vmatmul.mubr.msk.f32.vlgmr.msra.gmra.mrb[60].mxu1 %vm139_vm1, %v13127_v42 }
0x25be   :  { %11495 = vmatprep.mubr.msk.f32.mxu1 %vm12302_vm0, %v12301_v1 }
0x25c0   :  { %6488 = vrot.lane.b32.xlu1 %v13127_v42, %s12303_s3 }
0x262a   :  { %v6413_v19 = vpop.permute.xlu1 %6412 }
0x262b   :  { %11489 = vmatpush3.xpose.msk.msra.mxu0 %vm139_vm1, %v6413_v19 }
0x262c   :  { %v6491_v20 = vpop.permute.xlu0 %6490  ;;  %11498 = vmatprep.subr.mxu0 %v12301_v1 }
0x262d   :  { %11494 = vmatpush3.xpose.msk.msra.mxu1 %vm139_vm1, %v6491_v20 }
0x262e   :  { %v6411_v21 = vpop.permute.xlu1 %6410  ;;  %11503 = vmatprep.subr.mxu1 %v12301_v1 }
0x262f   :  { %11491 = vmatmul.mubr.msk.f32.vlgmr.msra.gmra.mrb[62].mxu0 %vm139_vm1, %v6411_v21 }
0x2630   :  { %11500 = vmatprep.mubr.msk.f32.mxu0 %vm12302_vm0, %v12301_v1 }
0x2632   :  { %v6489_v22 = vpop.permute.xlu1 %6488 }
0x2633   :  { %11496 = vmatmul.mubr.msk.f32.vlgmr.msra.gmra.mrb[62].mxu1 %vm139_vm1, %v6489_v22 }
0x2634   :  { %11505 = vmatprep.mubr.msk.f32.mxu1 %vm12302_vm0, %v12301_v1 }
0x268e   :  { %v6308_v43 = vpop.f32.mrb[60].mxu0 }
0x268f   :  { %v11482_v12 = vpop.f32.mrb[61].mxu0  ;;  %v6388_v27 = vsel %vm379_vm2, %v6308_v43, -inf }
0x2690   :  { %v6384_v52 = vpop.f32.mrb[60].mxu1 }
0x2691   :  { %v11487_v23 = vpop.f32.mrb[61].mxu1  ;;  %v6391_v11 = vsel %vm379_vm2, %v6384_v52, -inf }
0x2702   :  { %v6484_v24 = vpop.f32.mrb[62].mxu0 }
0x2703   :  { %v11492_v25 = vpop.f32.mrb[63].mxu0  ;;  %v6566_v26 = vsel %vm379_vm2, %v6484_v24, -inf }
0x2704   :  { %6567 = vmax.xlane.f32.xlu0 %v6566_v26 }
0x2706   :  { %v6562_v48 = vpop.f32.mrb[62].mxu1 }
0x2707   :  { %v11497_v32 = vpop.f32.mrb[63].mxu1  ;;  %v6569_v60 = vsel %vm379_vm2, %v6562_v48, -inf }
0x2708   :  { %6570 = vmax.xlane.f32.xlu1 %v6569_v60  ;;  %6389 = vmax.xlane.f32.xlu0 %v6388_v27 }
0x270c   :  { %6392 = vmax.xlane.f32.xlu0 %v6391_v11 }
0x2719   :  { %6589 = vrot.lane.b32.xlu1 %v13119_v29, %s12303_s3 }
0x2791   :  { %v6568_v31 = vpop.xlane.xlu0 %6567 }
0x2792   :  { %v6572_v35 = vsub.f32 %v6484_v24, %v6568_v31 }
0x2794   :  { %v6574_v62 = vmul.f32 1.442695, %v6572_v35 }
0x2795   :  { %v6571_v36 = vpop.xlane.xlu1 %6570  ;;  %v6390_v37 = vpop.xlane.xlu0 %6389 }
0x2796   :  { %v6394_v38 = vsub.f32 %v6308_v43, %v6390_v37  ;;  %v6573_v39 = vsub.f32 %v6562_v48, %v6571_v36 }
0x2798   :  { %v6396_v10 = vmul.f32 1.442695, %v6394_v38  ;;  %v6576_v51 = vmul.f32 1.442695, %v6573_v39 }
0x2799   :  { %v6590_v40 = vpop.permute.xlu1 %6589  ;;  %v6393_v41 = vpop.xlane.xlu0 %6392 }
0x279a   :  { %v6395_v46 = vsub.f32 %v6384_v52, %v6393_v41  ;;  %11499 = vmatpush3.msra.mxu0 %v6590_v40  ;;  %12046 = vpow2.f32 %v6396_v10 }
0x279b   :  { %11508 = vmatprep.subr.mxu0 %v12301_v1  ;;  %12048 = vpow2.f32 %v6574_v62 }
0x279c   :  { %v6398_v53 = vmul.f32 1.442695, %v6395_v46 }
0x279e   :  { %12050 = vpow2.f32 %v6398_v53 }
0x279f   :  { %12052 = vpow2.f32 %v6576_v51 }
0x27a4   :  { %v12047_v54 = vpop.eup %12046 }
0x27a5   :  { %v6400_v45 = vsel %vm379_vm2, %v12047_v54, 0.0  ;;  %v12049_v44 = vpop.eup %12048 }
0x27a6   :  { %6401 = vadd.xlane.f32.xlu1 %v6400_v45  ;;  %v6578_v33 = vsel %vm379_vm2, %v12049_v44, 0.0 }
0x27a8   :  { %v12051_v13 = vpop.eup %12050 }
0x27a9   :  { %v6403_v6 = vsel %vm379_vm2, %v12051_v13, 0.0  ;;  %v12053_v34 = vpop.eup %12052 }
0x27aa   :  { %6404 = vadd.xlane.f32.xlu0 %v6403_v6  ;;  %6579 = vadd.xlane.f32.xlu1 %v6578_v33  ;;  %v6581_v58 = vsel %vm379_vm2, %v12053_v34, 0.0 }
0x27ae   :  { %6582 = vadd.xlane.f32.xlu0 %v6581_v58 }
0x27bb   :  { %6890 = vrot.lane.b32.xlu1 %v13121_v55, %s12304_s16 }
0x27bf   :  { %6968 = vrot.lane.b32.xlu1 %v13131_v56, %s12304_s16 }
0x27c3   :  { %6966 = vrot.lane.b32.xlu1 %v13127_v42, %s12304_s16 }
0x27c4   :  { %6666 = vrot.lane.b32.xlu0 %v13123_v57, %s12303_s3 }
0x27c8   :  { %6888 = vrot.lane.b32.xlu0 %v13117_v17, %s12304_s16 }
0x2833   :  { %v6402_v59 = vpop.xlane.xlu1 %6401 }
0x2837   :  { %v6405_v61 = vpop.xlane.xlu0 %6404  ;;  %v6580_v63 = vpop.xlane.xlu1 %6579 }
0x2838   :  { %12054 = vrcp.f32 %v6580_v63 }
0x283b   :  { %v6583_v16 = vpop.xlane.xlu0 %6582  ;;  %v6891_v50 = vpop.permute.xlu1 %6890 }
0x283c   :  { %12056 = vrcp.f32 %v6583_v16 }
0x283d   :  { %12058 = vrcp.f32 %v6402_v59 }
0x283e   :  { %12060 = vrcp.f32 %v6405_v61 }
0x283f   :  { %v6667_v2 = vpop.permute.xlu0 %6666  ;;  %v6969_v15 = vpop.permute.xlu1 %6968 }
0x2840   :  { %11504 = vmatpush3.msra.mxu1 %v6667_v2 }
0x2841   :  { %11513 = vmatprep.subr.mxu1 %v12301_v1 }
0x2842   :  { %v12055_v3 = vpop.eup %12054 }
0x2843   :  { %v6586_v47 = vmul.f32 %v12055_v3, %v12049_v44  ;;  %v6889_v18 = vpop.permute.xlu0 %6888  ;;  %v6967_v19 = vpop.permute.xlu1 %6966 }
0x2845   :  { %11501 = vmatmul.mubr.msk.f32.vlgmr.msra.gmra.mrb[64].mxu0 %vm379_vm2, %v6586_v47 }
0x2846   :  { %v12057_v49 = vpop.eup %12056  ;;  %11509 = vmatpush3.msra.mxu0 %v13119_v29  ;;  %11510 = vmatprep.mubr.msk.f32.mxu0 %vm12302_vm0, %v12301_v1 }
0x2847   :  { %v6587_v14 = vmul.f32 %v12057_v49, %v12053_v34  ;;  %11518 = vmatprep.subr.mxu0 %v12301_v1  ;;  %v12059_v4 = vpop.eup %12058 }
0x2848   :  { %v12061_v5 = vpop.eup %12060  ;;  %v6408_v7 = vmul.f32 %v12059_v4, %v12047_v54 }
0x2849   :  { %11506 = vmatmul.mubr.msk.f32.vlgmr.msra.gmra.mrb[64].mxu1 %vm379_vm2, %v6587_v14  ;;  %v6409_v30 = vmul.f32 %v12061_v5, %v12051_v13 }
0x284a   :  { %11514 = vmatpush3.msra.mxu1 %v13123_v57  ;;  %11515 = vmatprep.mubr.msk.f32.mxu1 %vm12302_vm0, %v12301_v1 }
0x284b   :  { %11523 = vmatprep.subr.mxu1 %v12301_v1 }
0x284d   :  { %11511 = vmatmul.mubr.msk.f32.vlgmr.msra.gmra.mrb[64].mxu0 %vm379_vm2, %v6408_v7 }
0x284e   :  { %11519 = vmatpush3.xpose.msk.msra.mxu0 %vm139_vm1, %v6891_v50  ;;  %11520 = vmatprep.mubr.msk.f32.mxu0 %vm12302_vm0, %v12301_v1 }
0x284f   :  { %11528 = vmatprep.subr.mxu0 %v12301_v1 }
0x2851   :  { %11516 = vmatmul.mubr.msk.f32.vlgmr.msra.gmra.mrb[64].mxu1 %vm379_vm2, %v6409_v30  ;;  %11521 = vmatmul.mubr.msk.f32.vlgmr.msra.gmra.mrb[66].mxu0 %vm139_vm1, %v6889_v18 }
0x2852   :  { %11524 = vmatpush3.xpose.msk.msra.mxu1 %vm139_vm1, %v6969_v15  ;;  %11525 = vmatprep.mubr.msk.f32.mxu1 %vm12302_vm0, %v12301_v1 }
0x2853   :  { %11533 = vmatprep.subr.mxu1 %v12301_v1  ;;  %11530 = vmatprep.mubr.msk.f32.mxu0 %vm12302_vm0, %v12301_v1 }
0x2855   :  { %11526 = vmatmul.mubr.msk.f32.vlgmr.msra.gmra.mrb[66].mxu1 %vm139_vm1, %v6967_v19 }
0x2856   :  { %11535 = vmatprep.mubr.msk.f32.mxu1 %vm12302_vm0, %v12301_v1 }
0x2924   :  { %v6962_v20 = vpop.f32.mrb[66].mxu0 }
0x2925   :  { %v11522_v21 = vpop.f32.mrb[67].mxu0  ;;  %v7044_v22 = vsel %vm379_vm2, %v6962_v20, -inf }
0x2926   :  { %7045 = vmax.xlane.f32.xlu0 %v7044_v22 }
0x2928   :  { %v7040_v43 = vpop.f32.mrb[66].mxu1 }
0x2929   :  { %v11527_v12 = vpop.f32.mrb[67].mxu1  ;;  %v7047_v52 = vsel %vm379_vm2, %v7040_v43, -inf }
0x292a   :  { %7048 = vmax.xlane.f32.xlu1 %v7047_v52 }
0x293b   :  { %7066 = vrot.lane.b32.xlu1 %v13119_v29, %s12304_s16 }
0x293c   :  { %7142 = vrot.lane.b32.xlu0 %v13123_v57, %s12304_s16 }
0x293f   :  { %7222 = vrot.lane.b32.xlu1 %v13121_v55, %s12305_s1 }
0x2943   :  { %7300 = vrot.lane.b32.xlu1 %v13131_v56, %s12305_s1 }
0x2947   :  { %7298 = vrot.lane.b32.xlu1 %v13127_v42, %s12305_s1 }
0x29b3   :  { %v7046_v23 = vpop.xlane.xlu0 %7045 }
0x29b4   :  { %v7050_v24 = vsub.f32 %v6962_v20, %v7046_v23 }
0x29b6   :  { %v7052_v25 = vmul.f32 1.442695, %v7050_v24 }
0x29b7   :  { %v7049_v26 = vpop.xlane.xlu1 %7048  ;;  %v7143_v32 = vpop.permute.xlu0 %7142 }
0x29b8   :  { %v7051_v48 = vsub.f32 %v7040_v43, %v7049_v26  ;;  %12062 = vpow2.f32 %v7052_v25  ;;  %11534 = vmatpush3.msra.mxu1 %v7143_v32  ;;  %v11880_v26 = vld [vmem:[#allocation2 + $0xc4] ss:$12 sps:$4 sm:$0xff]   ;;  %v11881_v32 = vld [vmem:[#allocation2 + $0xc8] ss:$12 sps:$4 sm:$0xff]  }
0x29b9   :  { %11543 = vmatprep.subr.mxu1 %v12301_v1 }
0x29ba   :  { %v7054_v60 = vmul.f32 1.442695, %v7051_v48  ;;  %v11878_v48 = vld [vmem:[#allocation2 + $0xc0] ss:$12 sps:$4 sm:$0xff]  }
0x29bb   :  { %v7067_v27 = vpop.permute.xlu1 %7066 }
0x29bc   :  { %12064 = vpow2.f32 %v7054_v60  ;;  %11529 = vmatpush3.msra.mxu0 %v7067_v27  ;;  %v11884_v60 = vld [vmem:[#allocation2 + $0xdc] ss:$12 sps:$4 sm:$0xff]   ;;  %v11882_v27 = vld [vmem:[#allocation2 + $0xd8] ss:$12 sps:$4 sm:$0xff]  }
0x29bd   :  { %11538 = vmatprep.subr.mxu0 %v12301_v1 }
0x29bf   :  { %v7223_v36 = vpop.permute.xlu1 %7222 }
0x29c2   :  { %v12063_v55 = vpop.eup %12062 }
0x29c3   :  { %v7056_v56 = vsel %vm379_vm2, %v12063_v55, 0.0  ;;  %v7301_v10 = vpop.permute.xlu1 %7300 }
0x29c4   :  { %7057 = vadd.xlane.f32.xlu0 %v7056_v56 }
0x29c6   :  { %v12065_v42 = vpop.eup %12064 }
0x29c7   :  { %v7059_v11 = vsel %vm379_vm2, %v12065_v42, 0.0  ;;  %v7299_v40 = vpop.permute.xlu1 %7298 }
0x29c8   :  { %7060 = vadd.xlane.f32.xlu0 %v7059_v11 }
0x29de   :  { %7220 = vrot.lane.b32.xlu0 %v13117_v17, %s12305_s1 }
0x2a51   :  { %v7058_v31 = vpop.xlane.xlu0 %7057 }
0x2a52   :  { %12066 = vrcp.f32 %v7058_v31 }
0x2a55   :  { %v7061_v35 = vpop.xlane.xlu0 %7060 }
0x2a56   :  { %12068 = vrcp.f32 %v7061_v35 }
0x2a59   :  { %v7221_v17 = vpop.permute.xlu0 %7220 }
0x2a5c   :  { %v12067_v37 = vpop.eup %12066 }
0x2a5d   :  { %v7064_v38 = vmul.f32 %v12067_v37, %v12063_v55  ;;  %v11885_v55 = vld [vmem:[#allocation2 + $0xe0] ss:$12 sps:$4 sm:$0xff]  }
0x2a5f   :  { %11531 = vmatmul.mubr.msk.f32.vlgmr.msra.gmra.mrb[64].mxu0 %vm379_vm2, %v7064_v38  ;;  %v10801_v38 = vld [vmem:[#allocation6 + $0x3] ss:$0 sm:$0xff] }
0x2a60   :  { %v12069_v39 = vpop.eup %12068  ;;  %11539 = vmatpush3.xpose.msk.msra.mxu0 %vm139_vm1, %v7223_v36  ;;  %11540 = vmatprep.mubr.msk.f32.mxu0 %vm12302_vm0, %v12301_v1 }
0x2a61   :  { %v7065_v62 = vmul.f32 %v12069_v39, %v12065_v42  ;;  %11548 = vmatprep.subr.mxu0 %v12301_v1 }
0x2a63   :  { %11536 = vmatmul.mubr.msk.f32.vlgmr.msra.gmra.mrb[64].mxu1 %vm379_vm2, %v7065_v62  ;;  %11541 = vmatmul.mubr.msk.f32.vlgmr.msra.gmra.mrb[68].mxu0 %vm139_vm1, %v7221_v17  ;;  %v10802_v17 = vld [vmem:[#allocation8 + $0x3] ss:$0 sm:$0xff] }
0x2a64   :  { %11544 = vmatpush3.xpose.msk.msra.mxu1 %vm139_vm1, %v7301_v10  ;;  %11545 = vmatprep.mubr.msk.f32.mxu1 %vm12302_vm0, %v12301_v1 }
0x2a65   :  { %11553 = vmatprep.subr.mxu1 %v12301_v1  ;;  %11550 = vmatprep.mubr.msk.f32.mxu0 %vm12302_vm0, %v12301_v1 }
0x2a67   :  { %11546 = vmatmul.mubr.msk.f32.vlgmr.msra.gmra.mrb[68].mxu1 %vm139_vm1, %v7299_v40 }
0x2a68   :  { %11555 = vmatprep.mubr.msk.f32.mxu1 %vm12302_vm0, %v12301_v1 }
0x2b36   :  { %v7294_v41 = vpop.f32.mrb[68].mxu0 }
0x2b37   :  { %v11542_v46 = vpop.f32.mrb[69].mxu0  ;;  %v7376_v51 = vsel %vm379_vm2, %v7294_v41, -inf }
0x2b38   :  { %7377 = vmax.xlane.f32.xlu0 %v7376_v51 }
0x2b3a   :  { %v7372_v53 = vpop.f32.mrb[68].mxu1 }
0x2b3b   :  { %v11547_v54 = vpop.f32.mrb[69].mxu1  ;;  %v7379_v45 = vsel %vm379_vm2, %v7372_v53, -inf }
0x2b3c   :  { %7380 = vmax.xlane.f32.xlu1 %v7379_v45 }
0x2b4d   :  { %7398 = vrot.lane.b32.xlu1 %v13119_v29, %s12305_s1 }
0x2bc5   :  { %v7378_v44 = vpop.xlane.xlu0 %7377 }
0x2bc6   :  { %v7382_v13 = vsub.f32 %v7294_v41, %v7378_v44 }
0x2bc8   :  { %v7384_v6 = vmul.f32 1.442695, %v7382_v13 }
0x2bc9   :  { %v7381_v34 = vpop.xlane.xlu1 %7380 }
0x2bca   :  { %12070 = vpow2.f32 %v7384_v6  ;;  %v7383_v33 = vsub.f32 %v7372_v53, %v7381_v34 }
0x2bcc   :  { %v7386_v58 = vmul.f32 1.442695, %v7383_v33 }
0x2bcd   :  { %v7399_v59 = vpop.permute.xlu1 %7398 }
0x2bce   :  { %12072 = vpow2.f32 %v7386_v58  ;;  %11549 = vmatpush3.msra.mxu0 %v7399_v59 }
0x2bcf   :  { %7645 = vmatprep.subr.bf16.mxu0 %v11880_v26 }
0x2bd4   :  { %v12071_v61 = vpop.eup %12070 }
0x2bd5   :  { %v7388_v63 = vsel %vm379_vm2, %v12071_v61, 0.0 }
0x2bd6   :  { %7389 = vadd.xlane.f32.xlu0 %v7388_v63 }
0x2bd8   :  { %v12073_v16 = vpop.eup %12072 }
0x2bd9   :  { %v7391_v2 = vsel %vm379_vm2, %v12073_v16, 0.0 }
0x2bda   :  { %7392 = vadd.xlane.f32.xlu0 %v7391_v2 }
0x2bf0   :  { %7474 = vrot.lane.b32.xlu0 %v13123_v57, %s12305_s1 }
0x2c63   :  { %v7390_v29 = vpop.xlane.xlu0 %7389 }
0x2c64   :  { %12074 = vrcp.f32 %v7390_v29 }
0x2c67   :  { %v7393_v3 = vpop.xlane.xlu0 %7392 }
0x2c68   :  { %12076 = vrcp.f32 %v7393_v3 }
0x2c6b   :  { %v7475_v47 = vpop.permute.xlu0 %7474 }
0x2c6c   :  { %11554 = vmatpush3.msra.mxu1 %v7475_v47 }
0x2c6d   :  { %11558 = vmatprep.subr.bf16.mxu1 %v12301_v1 }
0x2c6e   :  { %v12075_v49 = vpop.eup %12074 }
0x2c6f   :  { %v7396_v14 = vmul.f32 %v12075_v49, %v12071_v61 }
0x2c71   :  { %11551 = vmatmul.mubr.msk.f32.vlgmr.msra.gmra.mrb[64].mxu0 %vm379_vm2, %v7396_v14 }
0x2c72   :  { %v12077_v50 = vpop.eup %12076  ;;  %7677 = vmatprep.mubr.bf16.mxu0 %v12300_v0  ;;  %7646 = vmatpush1.bf16.msra.mxu0 %v11878_v48 }
0x2c73   :  { %v7397_v4 = vmul.f32 %v12077_v50, %v12073_v16  ;;  %7647 = vmatprep.subr.bf16.mxu0 %v11884_v60 }
0x2c75   :  { %11556 = vmatmul.mubr.msk.f32.vlgmr.msra.gmra.mrb[64].mxu1 %vm379_vm2, %v7397_v4 }
0x2c76   :  { %11562 = vmatprep.mubr.msk.bf16.mxu1 %vm12302_vm0, %v12301_v1  ;;  %11559 = vmatpush3.bf16.msra.mxu1 %v11881_v32 }
0x2c77   :  { %11560 = vmatprep.subr.bf16.mxu1 %v12301_v1  ;;  %7648 = vmatpush1.bf16.msra.mxu0 %v11882_v27 }
0x2c78   :  { %11566 = vmatprep.subr.mxu0 %v12301_v1 }
0x2c7a   :  { %11561 = vmatpush3.bf16.msra.mxu1 %v11885_v55 }
0x2c7b   :  { %11571 = vmatprep.subr.mxu1 %v12301_v1 }
0x2d44   :  { %v7470_v57 = vpop.f32.mrb[64].mxu0 }
0x2d45   :  { %v11552_v5 = vpop.f32.mrb[65].mxu0  ;;  %v7552_v7 = vsel %vm139_vm1, %v7470_v57, 0.0 }
0x2d46   :  { %7553 = vadd.xlane.f32.xlu1 %v7552_v7 }
0x2d48   :  { %v7546_v15 = vpop.f32.mrb[64].mxu1 }
0x2d49   :  { %v11557_v30 = vpop.f32.mrb[65].mxu1  ;;  %v7555_v18 = vsel %vm139_vm1, %v7546_v15, 0.0 }
0x2d4a   :  { %7556 = vadd.xlane.f32.xlu0 %v7555_v18 }
0x2dd3   :  { %v7554_v19 = vpop.xlane.xlu1 %7553 }
0x2dd4   :  { %v7558_v20 = vmul.f32 0.03125, %v7554_v19 }
0x2dd6   :  { %v7560_v21 = vsub.f32 %v7470_v57, %v7558_v20 }
0x2dd7   :  { %v7557_v22 = vpop.xlane.xlu0 %7556 }
0x2dd8   :  { %v7559_v43 = vmul.f32 0.03125, %v7557_v22  ;;  %v7562_v12 = vmul.f32 %v7560_v21, %v7560_v21 }
0x2dda   :  { %v7561_v52 = vsub.f32 %v7546_v15, %v7559_v43  ;;  %v7564_v23 = vsel %vm139_vm1, %v7562_v12, 0.0 }
0x2ddb   :  { %7565 = vadd.xlane.f32.xlu1 %v7564_v23 }
0x2ddc   :  { %v7563_v24 = vmul.f32 %v7561_v52, %v7561_v52 }
0x2dde   :  { %v7567_v25 = vsel %vm139_vm1, %v7563_v24, 0.0 }
0x2ddf   :  { %7568 = vadd.xlane.f32.xlu0 %v7567_v25 }
0x2e68   :  { %v7566_v56 = vpop.xlane.xlu1 %7565 }
0x2e69   :  { %v7570_v42 = vmul.f32 0.03125, %v7566_v56 }
0x2e6b   :  { %v7572_v11 = vadd.f32 1e-05, %v7570_v42 }
0x2e6c   :  { %v7569_v31 = vpop.xlane.xlu0 %7568 }
0x2e6d   :  { %12078 = vrsqrt.f32 %v7572_v11  ;;  %v7571_v35 = vmul.f32 0.03125, %v7569_v31 }
0x2e6f   :  { %v7573_v36 = vadd.f32 1e-05, %v7571_v35 }
0x2e71   :  { %12080 = vrsqrt.f32 %v7573_v36 }
0x2e77   :  { %v12079_v37 = vpop.eup %12078 }
0x2e78   :  { %v7576_v39 = vmul.f32 %v12079_v37, %v7560_v21 }
0x2e7a   :  { %v7584_v10 = vmul.f32 %v10801_v38, %v7576_v39 }
0x2e7b   :  { %v12081_v62 = vpop.eup %12080 }
0x2e7c   :  { %v7577_v40 = vmul.f32 %v12081_v62, %v7561_v52  ;;  %v7592_v46 = vadd.f32 %v10802_v17, %v7584_v10 }
0x2e7e   :  { %v7585_v41 = vmul.f32 %v10801_v38, %v7577_v40  ;;  %v13265_v53 = vadd.f32 %v7592_v46, %v13104_v8 }
0x2e80   :  { %v7593_v51 = vadd.f32 %v10802_v17, %v7585_v41 }
0x2e82   :  { %v13268_v54 = vadd.f32 %v7593_v51, %v13107_v9 }
0x2e84   :  { %v7609_v45 = vpack.c.bf16 %v13268_v54, %v13265_v53 }
0x2e86   :  { %10809 = vmatmul.mubr.msk.bf16.vlgmr.msra.gmra.mrb[72].mxu0 %vm139_vm1, %v7609_v45  ;;  %11563 = vmatmul.mubr.msk.bf16.vlgmr.msra.gmra.mrb[72].mxu1 %vm139_vm1, %v7609_v45 }
0x2e87   :  { %11568 = vmatprep.mubr.msk.f32.mxu0 %vm12302_vm0, %v12301_v1  ;;  %11573 = vmatprep.mubr.msk.f32.mxu1 %vm12302_vm0, %v12301_v1 }
0x2f59   :  { %v13278_v44 = vpop.f32.mrb[72].mxu0  ;;  %v13280_v8 = vpop.f32.mrb[72].mxu1 }
0x2f5a   :  { %v13282_v13 = vpop.f32.mrb[73].mxu0  ;;  %v11564_v9 = vpop.f32.mrb[73].mxu1 }
0x2f5b   :  { %v13284_v6 = vpop.f32.mrb[74].mxu1  ;;  %7905 = vrot.lane.b32.xlu1 %v13282_v13, %s12303_s3  ;;  %v13288_v34 = vpop.f32.mrb[74].mxu0  ;;  %11567 = vmatpush3.xpose.msk.msra.mxu0 %vm139_vm1, %v13282_v13 }
0x2f5c   :  { %v13292_v33 = vpop.f32.mrb[75].mxu0  ;;  %v11565_v58 = vpop.f32.mrb[75].mxu1  ;;  %11576 = vmatprep.subr.mxu0 %v12301_v1 }
0x2f5d   :  { %7983 = vrot.lane.b32.xlu0 %v13292_v33, %s12303_s3  ;;  %11572 = vmatpush3.xpose.msk.msra.mxu1 %vm139_vm1, %v13292_v33 }
0x2f5e   :  { %11569 = vmatmul.mubr.msk.f32.vlgmr.msra.gmra.mrb[70].mxu0 %vm139_vm1, %v13278_v44  ;;  %11581 = vmatprep.subr.mxu1 %v12301_v1 }
0x2f5f   :  { %7903 = vrot.lane.b32.xlu1 %v13278_v44, %s12303_s3  ;;  %11578 = vmatprep.mubr.msk.f32.mxu0 %vm12302_vm0, %v12301_v1 }
0x2f60   :  { %11574 = vmatmul.mubr.msk.f32.vlgmr.msra.gmra.mrb[70].mxu1 %vm139_vm1, %v13288_v34 }
0x2f61   :  { %11583 = vmatprep.mubr.msk.f32.mxu1 %vm12302_vm0, %v12301_v1 }
0x2f63   :  { %7981 = vrot.lane.b32.xlu1 %v13288_v34, %s12303_s3 }
0x2fcd   :  { %v7906_v59 = vpop.permute.xlu1 %7905 }
0x2fce   :  { %11577 = vmatpush3.xpose.msk.msra.mxu0 %vm139_vm1, %v7906_v59 }
0x2fcf   :  { %v7984_v61 = vpop.permute.xlu0 %7983  ;;  %11586 = vmatprep.subr.mxu0 %v12301_v1 }
0x2fd0   :  { %11582 = vmatpush3.xpose.msk.msra.mxu1 %vm139_vm1, %v7984_v61 }
0x2fd1   :  { %v7904_v63 = vpop.permute.xlu1 %7903  ;;  %11591 = vmatprep.subr.mxu1 %v12301_v1 }
0x2fd2   :  { %11579 = vmatmul.mubr.msk.f32.vlgmr.msra.gmra.mrb[76].mxu0 %vm139_vm1, %v7904_v63 }
0x2fd3   :  { %11588 = vmatprep.mubr.msk.f32.mxu0 %vm12302_vm0, %v12301_v1 }
0x2fd5   :  { %v7982_v16 = vpop.permute.xlu1 %7981 }
0x2fd6   :  { %11584 = vmatmul.mubr.msk.f32.vlgmr.msra.gmra.mrb[76].mxu1 %vm139_vm1, %v7982_v16 }
0x2fd7   :  { %11593 = vmatprep.mubr.msk.f32.mxu1 %vm12302_vm0, %v12301_v1 }
0x3031   :  { %v7801_v2 = vpop.f32.mrb[70].mxu0 }
0x3032   :  { %v11570_v29 = vpop.f32.mrb[71].mxu0  ;;  %v7881_v7 = vsel %vm379_vm2, %v7801_v2, -inf }
0x3033   :  { %v7877_v3 = vpop.f32.mrb[70].mxu1 }
0x3034   :  { %v11575_v47 = vpop.f32.mrb[71].mxu1  ;;  %v7884_v15 = vsel %vm379_vm2, %v7877_v3, -inf }
0x30a5   :  { %v7977_v49 = vpop.f32.mrb[76].mxu0 }
0x30a6   :  { %v11580_v14 = vpop.f32.mrb[77].mxu0  ;;  %v8059_v50 = vsel %vm379_vm2, %v7977_v49, -inf }
0x30a7   :  { %8060 = vmax.xlane.f32.xlu0 %v8059_v50 }
0x30a9   :  { %v8055_v4 = vpop.f32.mrb[76].mxu1 }
0x30aa   :  { %v11585_v57 = vpop.f32.mrb[77].mxu1  ;;  %v8062_v5 = vsel %vm379_vm2, %v8055_v4, -inf }
0x30ab   :  { %8063 = vmax.xlane.f32.xlu1 %v8062_v5  ;;  %7882 = vmax.xlane.f32.xlu0 %v7881_v7 }
0x30af   :  { %7885 = vmax.xlane.f32.xlu0 %v7884_v15 }
0x30bc   :  { %8082 = vrot.lane.b32.xlu1 %v13280_v8, %s12303_s3 }
0x3134   :  { %v8061_v30 = vpop.xlane.xlu0 %8060 }
0x3135   :  { %v8065_v18 = vsub.f32 %v7977_v49, %v8061_v30 }
0x3137   :  { %v8067_v12 = vmul.f32 1.442695, %v8065_v18 }
0x3138   :  { %v8064_v19 = vpop.xlane.xlu1 %8063  ;;  %v7883_v20 = vpop.xlane.xlu0 %7882 }
0x3139   :  { %v7887_v21 = vsub.f32 %v7801_v2, %v7883_v20  ;;  %v8066_v22 = vsub.f32 %v8055_v4, %v8064_v19 }
0x313b   :  { %v7889_v43 = vmul.f32 1.442695, %v7887_v21  ;;  %v8069_v25 = vmul.f32 1.442695, %v8066_v22 }
0x313c   :  { %v8083_v52 = vpop.permute.xlu1 %8082  ;;  %v7886_v23 = vpop.xlane.xlu0 %7885 }
0x313d   :  { %v7888_v24 = vsub.f32 %v7877_v3, %v7886_v23  ;;  %11587 = vmatpush3.msra.mxu0 %v8083_v52  ;;  %12082 = vpow2.f32 %v7889_v43 }
0x313e   :  { %11596 = vmatprep.subr.mxu0 %v12301_v1  ;;  %12084 = vpow2.f32 %v8067_v12 }
0x313f   :  { %v7891_v26 = vmul.f32 1.442695, %v7888_v24 }
0x3141   :  { %12086 = vpow2.f32 %v7891_v26 }
0x3142   :  { %12088 = vpow2.f32 %v8069_v25 }
0x3147   :  { %v12083_v48 = vpop.eup %12082 }
0x3148   :  { %v7893_v32 = vsel %vm379_vm2, %v12083_v48, 0.0  ;;  %v12085_v60 = vpop.eup %12084 }
0x3149   :  { %7894 = vadd.xlane.f32.xlu1 %v7893_v32  ;;  %v8071_v42 = vsel %vm379_vm2, %v12085_v60, 0.0 }
0x314b   :  { %v12087_v27 = vpop.eup %12086 }
0x314c   :  { %v7896_v55 = vsel %vm379_vm2, %v12087_v27, 0.0  ;;  %v12089_v56 = vpop.eup %12088 }
0x314d   :  { %7897 = vadd.xlane.f32.xlu0 %v7896_v55  ;;  %8072 = vadd.xlane.f32.xlu1 %v8071_v42  ;;  %v8074_v11 = vsel %vm379_vm2, %v12089_v56, 0.0 }
0x3151   :  { %8075 = vadd.xlane.f32.xlu0 %v8074_v11 }
0x315e   :  { %8383 = vrot.lane.b32.xlu1 %v13282_v13, %s12304_s16 }
0x3162   :  { %8461 = vrot.lane.b32.xlu1 %v13292_v33, %s12304_s16 }
0x3166   :  { %8459 = vrot.lane.b32.xlu1 %v13288_v34, %s12304_s16 }
0x3167   :  { %8159 = vrot.lane.b32.xlu0 %v13284_v6, %s12303_s3 }
0x316b   :  { %8381 = vrot.lane.b32.xlu0 %v13278_v44, %s12304_s16 }
0x31d6   :  { %v7895_v31 = vpop.xlane.xlu1 %7894 }
0x31da   :  { %v7898_v35 = vpop.xlane.xlu0 %7897  ;;  %v8073_v36 = vpop.xlane.xlu1 %8072 }
0x31db   :  { %12090 = vrcp.f32 %v8073_v36 }
0x31de   :  { %v8076_v37 = vpop.xlane.xlu0 %8075  ;;  %v8384_v40 = vpop.permute.xlu1 %8383 }
0x31df   :  { %12092 = vrcp.f32 %v8076_v37 }
0x31e0   :  { %12094 = vrcp.f32 %v7895_v31 }
0x31e1   :  { %12096 = vrcp.f32 %v7898_v35 }
0x31e2   :  { %v8160_v38 = vpop.permute.xlu0 %8159  ;;  %v8462_v45 = vpop.permute.xlu1 %8461 }
0x31e3   :  { %11592 = vmatpush3.msra.mxu1 %v8160_v38 }
0x31e4   :  { %11601 = vmatprep.subr.mxu1 %v12301_v1 }
0x31e5   :  { %v12091_v39 = vpop.eup %12090 }
0x31e6   :  { %v8079_v10 = vmul.f32 %v12091_v39, %v12085_v60  ;;  %v8382_v58 = vpop.permute.xlu0 %8381  ;;  %v8460_v59 = vpop.permute.xlu1 %8459 }
0x31e8   :  { %11589 = vmatmul.mubr.msk.f32.vlgmr.msra.gmra.mrb[78].mxu0 %vm379_vm2, %v8079_v10 }
0x31e9   :  { %v12093_v62 = vpop.eup %12092  ;;  %11597 = vmatpush3.msra.mxu0 %v13280_v8  ;;  %11598 = vmatprep.mubr.msk.f32.mxu0 %vm12302_vm0, %v12301_v1 }
0x31ea   :  { %v8080_v17 = vmul.f32 %v12093_v62, %v12089_v56  ;;  %11606 = vmatprep.subr.mxu0 %v12301_v1  ;;  %v12095_v41 = vpop.eup %12094 }
0x31eb   :  { %v12097_v46 = vpop.eup %12096  ;;  %v7901_v51 = vmul.f32 %v12095_v41, %v12083_v48 }
0x31ec   :  { %11594 = vmatmul.mubr.msk.f32.vlgmr.msra.gmra.mrb[78].mxu1 %vm379_vm2, %v8080_v17  ;;  %v7902_v9 = vmul.f32 %v12097_v46, %v12087_v27 }
0x31ed   :  { %11602 = vmatpush3.msra.mxu1 %v13284_v6  ;;  %11603 = vmatprep.mubr.msk.f32.mxu1 %vm12302_vm0, %v12301_v1 }
0x31ee   :  { %11611 = vmatprep.subr.mxu1 %v12301_v1 }
0x31f0   :  { %11599 = vmatmul.mubr.msk.f32.vlgmr.msra.gmra.mrb[78].mxu0 %vm379_vm2, %v7901_v51 }
0x31f1   :  { %11607 = vmatpush3.xpose.msk.msra.mxu0 %vm139_vm1, %v8384_v40  ;;  %11608 = vmatprep.mubr.msk.f32.mxu0 %vm12302_vm0, %v12301_v1 }
0x31f2   :  { %11616 = vmatprep.subr.mxu0 %v12301_v1 }
0x31f4   :  { %11604 = vmatmul.mubr.msk.f32.vlgmr.msra.gmra.mrb[78].mxu1 %vm379_vm2, %v7902_v9  ;;  %11609 = vmatmul.mubr.msk.f32.vlgmr.msra.gmra.mrb[80].mxu0 %vm139_vm1, %v8382_v58 }
0x31f5   :  { %11612 = vmatpush3.xpose.msk.msra.mxu1 %vm139_vm1, %v8462_v45  ;;  %11613 = vmatprep.mubr.msk.f32.mxu1 %vm12302_vm0, %v12301_v1 }
0x31f6   :  { %11621 = vmatprep.subr.mxu1 %v12301_v1  ;;  %11618 = vmatprep.mubr.msk.f32.mxu0 %vm12302_vm0, %v12301_v1 }
0x31f8   :  { %11614 = vmatmul.mubr.msk.f32.vlgmr.msra.gmra.mrb[80].mxu1 %vm139_vm1, %v8460_v59 }
0x31f9   :  { %11623 = vmatprep.mubr.msk.f32.mxu1 %vm12302_vm0, %v12301_v1 }
0x32c7   :  { %v8455_v61 = vpop.f32.mrb[80].mxu0 }
0x32c8   :  { %v11610_v63 = vpop.f32.mrb[81].mxu0  ;;  %v8537_v16 = vsel %vm379_vm2, %v8455_v61, -inf }
0x32c9   :  { %8538 = vmax.xlane.f32.xlu0 %v8537_v16 }
0x32cb   :  { %v8533_v2 = vpop.f32.mrb[80].mxu1 }
0x32cc   :  { %v11615_v29 = vpop.f32.mrb[81].mxu1  ;;  %v8540_v3 = vsel %vm379_vm2, %v8533_v2, -inf }
0x32cd   :  { %8541 = vmax.xlane.f32.xlu1 %v8540_v3 }
0x32de   :  { %8559 = vrot.lane.b32.xlu1 %v13280_v8, %s12304_s16 }
0x32df   :  { %8635 = vrot.lane.b32.xlu0 %v13284_v6, %s12304_s16 }
0x32e2   :  { %8715 = vrot.lane.b32.xlu1 %v13282_v13, %s12305_s1 }
0x32e6   :  { %8793 = vrot.lane.b32.xlu1 %v13292_v33, %s12305_s1 }
0x32ea   :  { %8791 = vrot.lane.b32.xlu1 %v13288_v34, %s12305_s1 }
0x3356   :  { %v8539_v47 = vpop.xlane.xlu0 %8538 }
0x3357   :  { %v8543_v49 = vsub.f32 %v8455_v61, %v8539_v47 }
0x3359   :  { %v8545_v14 = vmul.f32 1.442695, %v8543_v49 }
0x335a   :  { %v8542_v50 = vpop.xlane.xlu1 %8541  ;;  %v8636_v57 = vpop.permute.xlu0 %8635 }
0x335b   :  { %v8544_v4 = vsub.f32 %v8533_v2, %v8542_v50  ;;  %12098 = vpow2.f32 %v8545_v14  ;;  %11622 = vmatpush3.msra.mxu1 %v8636_v57  ;;  %v11888_v14 = vld [vmem:[#allocation2 + $0xf4] ss:$12 sps:$4 sm:$0xff]   ;;  %v11886_v50 = vld [vmem:[#allocation2 + $0xf0] ss:$12 sps:$4 sm:$0xff]   ;;  %v11892_v57 = vld [vmem:[#allocation2 + $0x10c] ss:$12 sps:$4 sm:$0xff]  }
0x335c   :  { %11631 = vmatprep.subr.mxu1 %v12301_v1 }
0x335d   :  { %v8547_v5 = vmul.f32 1.442695, %v8544_v4  ;;  %v11889_v4 = vld [vmem:[#allocation2 + $0xf8] ss:$12 sps:$4 sm:$0xff]  }
0x335e   :  { %v8560_v7 = vpop.permute.xlu1 %8559 }
0x335f   :  { %12100 = vpow2.f32 %v8547_v5  ;;  %11617 = vmatpush3.msra.mxu0 %v8560_v7  ;;  %v11890_v5 = vld [vmem:[#allocation2 + $0x108] ss:$12 sps:$4 sm:$0xff]   ;;  %v11893_v7 = vld [vmem:[#allocation2 + $0x110] ss:$12 sps:$4 sm:$0xff]  }
0x3360   :  { %11626 = vmatprep.subr.mxu0 %v12301_v1 }
0x3362   :  { %v8716_v19 = vpop.permute.xlu1 %8715 }
0x3365   :  { %v12099_v13 = vpop.eup %12098 }
0x3366   :  { %v8549_v33 = vsel %vm379_vm2, %v12099_v13, 0.0  ;;  %v8794_v43 = vpop.permute.xlu1 %8793 }
0x3367   :  { %8550 = vadd.xlane.f32.xlu0 %v8549_v33 }
0x3369   :  { %v12101_v34 = vpop.eup %12100 }
0x336a   :  { %v8552_v15 = vsel %vm379_vm2, %v12101_v34, 0.0  ;;  %v8792_v52 = vpop.permute.xlu1 %8791 }
0x336b   :  { %8553 = vadd.xlane.f32.xlu0 %v8552_v15 }
0x3381   :  { %8713 = vrot.lane.b32.xlu0 %v13278_v44, %s12305_s1 }
0x33f4   :  { %v8551_v30 = vpop.xlane.xlu0 %8550 }
0x33f5   :  { %12102 = vrcp.f32 %v8551_v30 }
0x33f8   :  { %v8554_v18 = vpop.xlane.xlu0 %8553 }
0x33f9   :  { %12104 = vrcp.f32 %v8554_v18 }
0x33fc   :  { %v8714_v44 = vpop.permute.xlu0 %8713 }
0x33ff   :  { %v12103_v20 = vpop.eup %12102 }
0x3400   :  { %v8557_v21 = vmul.f32 %v12103_v20, %v12099_v13  ;;  %v10835_v20 = vld [vmem:[#allocation6 + $0x4] ss:$0 sm:$0xff] }
0x3402   :  { %11619 = vmatmul.mubr.msk.f32.vlgmr.msra.gmra.mrb[78].mxu0 %vm379_vm2, %v8557_v21 }
0x3403   :  { %v12105_v22 = vpop.eup %12104  ;;  %11627 = vmatpush3.xpose.msk.msra.mxu0 %vm139_vm1, %v8716_v19  ;;  %11628 = vmatprep.mubr.msk.f32.mxu0 %vm12302_vm0, %v12301_v1 }
0x3404   :  { %v8558_v12 = vmul.f32 %v12105_v22, %v12101_v34  ;;  %11636 = vmatprep.subr.mxu0 %v12301_v1 }
0x3406   :  { %11624 = vmatmul.mubr.msk.f32.vlgmr.msra.gmra.mrb[78].mxu1 %vm379_vm2, %v8558_v12  ;;  %11629 = vmatmul.mubr.msk.f32.vlgmr.msra.gmra.mrb[82].mxu0 %vm139_vm1, %v8714_v44  ;;  %v10836_v12 = vld [vmem:[#allocation8 + $0x4] ss:$0 sm:$0xff] }
0x3407   :  { %11632 = vmatpush3.xpose.msk.msra.mxu1 %vm139_vm1, %v8794_v43  ;;  %11633 = vmatprep.mubr.msk.f32.mxu1 %vm12302_vm0, %v12301_v1 }
0x3408   :  { %11641 = vmatprep.subr.mxu1 %v12301_v1  ;;  %11638 = vmatprep.mubr.msk.f32.mxu0 %vm12302_vm0, %v12301_v1 }
0x340a   :  { %11634 = vmatmul.mubr.msk.f32.vlgmr.msra.gmra.mrb[82].mxu1 %vm139_vm1, %v8792_v52 }
0x340b   :  { %11643 = vmatprep.mubr.msk.f32.mxu1 %vm12302_vm0, %v12301_v1 }
0x34d9   :  { %v8787_v23 = vpop.f32.mrb[82].mxu0 }
0x34da   :  { %v11630_v24 = vpop.f32.mrb[83].mxu0  ;;  %v8869_v25 = vsel %vm379_vm2, %v8787_v23, -inf }
0x34db   :  { %8870 = vmax.xlane.f32.xlu0 %v8869_v25 }
0x34dd   :  { %v8865_v26 = vpop.f32.mrb[82].mxu1 }
0x34de   :  { %v11635_v48 = vpop.f32.mrb[83].mxu1  ;;  %v8872_v32 = vsel %vm379_vm2, %v8865_v26, -inf }
0x34df   :  { %8873 = vmax.xlane.f32.xlu1 %v8872_v32 }
0x34f0   :  { %8891 = vrot.lane.b32.xlu1 %v13280_v8, %s12305_s1 }
0x3568   :  { %v8871_v60 = vpop.xlane.xlu0 %8870 }
0x3569   :  { %v8875_v27 = vsub.f32 %v8787_v23, %v8871_v60 }
0x356b   :  { %v8877_v55 = vmul.f32 1.442695, %v8875_v27 }
0x356c   :  { %v8874_v56 = vpop.xlane.xlu1 %8873 }
0x356d   :  { %12106 = vpow2.f32 %v8877_v55  ;;  %v8876_v42 = vsub.f32 %v8865_v26, %v8874_v56 }
0x356f   :  { %v8879_v11 = vmul.f32 1.442695, %v8876_v42 }
0x3570   :  { %v8892_v31 = vpop.permute.xlu1 %8891 }
0x3571   :  { %12108 = vpow2.f32 %v8879_v11  ;;  %11637 = vmatpush3.msra.mxu0 %v8892_v31 }
0x3572   :  { %9138 = vmatprep.subr.bf16.mxu0 %v11888_v14 }
0x3577   :  { %v12107_v35 = vpop.eup %12106 }
0x3578   :  { %v8881_v36 = vsel %vm379_vm2, %v12107_v35, 0.0 }
0x3579   :  { %8882 = vadd.xlane.f32.xlu0 %v8881_v36 }
0x357b   :  { %v12109_v37 = vpop.eup %12108 }
0x357c   :  { %v8884_v38 = vsel %vm379_vm2, %v12109_v37, 0.0 }
0x357d   :  { %8885 = vadd.xlane.f32.xlu0 %v8884_v38 }
0x3593   :  { %8967 = vrot.lane.b32.xlu0 %v13284_v6, %s12305_s1 }
0x3606   :  { %v8883_v8 = vpop.xlane.xlu0 %8882 }
0x3607   :  { %12110 = vrcp.f32 %v8883_v8 }
0x360a   :  { %v8886_v39 = vpop.xlane.xlu0 %8885 }
0x360b   :  { %12112 = vrcp.f32 %v8886_v39 }
0x360e   :  { %v8968_v10 = vpop.permute.xlu0 %8967 }
0x360f   :  { %11642 = vmatpush3.msra.mxu1 %v8968_v10 }
0x3610   :  { %11646 = vmatprep.subr.bf16.mxu1 %v12301_v1 }
0x3611   :  { %v12111_v62 = vpop.eup %12110 }
0x3612   :  { %v8889_v17 = vmul.f32 %v12111_v62, %v12107_v35 }
0x3614   :  { %11639 = vmatmul.mubr.msk.f32.vlgmr.msra.gmra.mrb[78].mxu0 %vm379_vm2, %v8889_v17 }
0x3615   :  { %v12113_v40 = vpop.eup %12112  ;;  %9170 = vmatprep.mubr.bf16.mxu0 %v12300_v0  ;;  %9139 = vmatpush1.bf16.msra.mxu0 %v11886_v50 }
0x3616   :  { %v8890_v41 = vmul.f32 %v12113_v40, %v12109_v37  ;;  %9140 = vmatprep.subr.bf16.mxu0 %v11892_v57 }
0x3618   :  { %11644 = vmatmul.mubr.msk.f32.vlgmr.msra.gmra.mrb[78].mxu1 %vm379_vm2, %v8890_v41 }
0x3619   :  { %11650 = vmatprep.mubr.msk.bf16.mxu1 %vm12302_vm0, %v12301_v1  ;;  %11647 = vmatpush3.bf16.msra.mxu1 %v11889_v4 }
0x361a   :  { %11648 = vmatprep.subr.bf16.mxu1 %v12301_v1  ;;  %9141 = vmatpush1.bf16.msra.mxu0 %v11890_v5 }
0x361b   :  { %11654 = vmatprep.subr.mxu0 %v12301_v1 }
0x361d   :  { %11649 = vmatpush3.bf16.msra.mxu1 %v11893_v7 }
0x361e   :  { %11659 = vmatprep.subr.mxu1 %v12301_v1 }
0x36e7   :  { %v8963_v6 = vpop.f32.mrb[78].mxu0 }
0x36e8   :  { %v11640_v46 = vpop.f32.mrb[79].mxu0  ;;  %v9045_v51 = vsel %vm139_vm1, %v8963_v6, 0.0 }
0x36e9   :  { %9046 = vadd.xlane.f32.xlu1 %v9045_v51 }
0x36eb   :  { %v9039_v45 = vpop.f32.mrb[78].mxu1 }
0x36ec   :  { %v11645_v9 = vpop.f32.mrb[79].mxu1  ;;  %v9048_v58 = vsel %vm139_vm1, %v9039_v45, 0.0 }
0x36ed   :  { %9049 = vadd.xlane.f32.xlu0 %v9048_v58 }
0x3776   :  { %v9047_v59 = vpop.xlane.xlu1 %9046 }
0x3777   :  { %v9051_v61 = vmul.f32 0.03125, %v9047_v59 }
0x3779   :  { %v9053_v63 = vsub.f32 %v8963_v6, %v9051_v61 }
0x377a   :  { %v9050_v0 = vpop.xlane.xlu0 %9049 }
0x377b   :  { %v9052_v16 = vmul.f32 0.03125, %v9050_v0  ;;  %v9055_v2 = vmul.f32 %v9053_v63, %v9053_v63 }
0x377d   :  { %v9054_v29 = vsub.f32 %v9039_v45, %v9052_v16  ;;  %v9057_v3 = vsel %vm139_vm1, %v9055_v2, 0.0 }
0x377e   :  { %9058 = vadd.xlane.f32.xlu1 %v9057_v3 }
0x377f   :  { %v9056_v47 = vmul.f32 %v9054_v29, %v9054_v29 }
0x3781   :  { %v9060_v49 = vsel %vm139_vm1, %v9056_v47, 0.0 }
0x3782   :  { %9061 = vadd.xlane.f32.xlu0 %v9060_v49 }
0x380b   :  { %v9059_v13 = vpop.xlane.xlu1 %9058 }
0x380c   :  { %v9063_v33 = vmul.f32 0.03125, %v9059_v13 }
0x380e   :  { %v9065_v34 = vadd.f32 1e-05, %v9063_v33 }
0x380f   :  { %v9062_v15 = vpop.xlane.xlu0 %9061 }
0x3810   :  { %12114 = vrsqrt.f32 %v9065_v34  ;;  %v9064_v30 = vmul.f32 0.03125, %v9062_v15 }
0x3812   :  { %v9066_v18 = vadd.f32 1e-05, %v9064_v30 }
0x3814   :  { %12116 = vrsqrt.f32 %v9066_v18 }
0x381a   :  { %v12115_v19 = vpop.eup %12114 }
0x381b   :  { %v9069_v21 = vmul.f32 %v12115_v19, %v9053_v63 }
0x381d   :  { %v9077_v22 = vmul.f32 %v10835_v20, %v9069_v21 }
0x381e   :  { %v12117_v43 = vpop.eup %12116 }
0x381f   :  { %v9070_v44 = vmul.f32 %v12117_v43, %v9054_v29  ;;  %v9085_v23 = vadd.f32 %v10836_v12, %v9077_v22 }
0x3821   :  { %v9078_v52 = vmul.f32 %v10835_v20, %v9070_v44  ;;  %v13426_v25 = vadd.f32 %v9085_v23, %v13265_v53 }
0x3823   :  { %v9086_v24 = vadd.f32 %v10836_v12, %v9078_v52 }
0x3825   :  { %v13429_v26 = vadd.f32 %v9086_v24, %v13268_v54 }
0x3827   :  { %v9102_v48 = vpack.c.bf16 %v13429_v26, %v13426_v25 }
0x3829   :  { %10843 = vmatmul.mubr.msk.bf16.vlgmr.msra.gmra.mrb[84].mxu0 %vm139_vm1, %v9102_v48  ;;  %11651 = vmatmul.mubr.msk.bf16.vlgmr.msra.gmra.mrb[84].mxu1 %vm139_vm1, %v9102_v48 }
0x382a   :  { %11656 = vmatprep.mubr.msk.f32.mxu0 %vm12302_vm0, %v12301_v1  ;;  %11661 = vmatprep.mubr.msk.f32.mxu1 %vm12302_vm0, %v12301_v1 }
0x38fc   :  { %v13439_v32 = vpop.f32.mrb[84].mxu0  ;;  %v13441_v53 = vpop.f32.mrb[84].mxu1 }
0x38fd   :  { %v13443_v60 = vpop.f32.mrb[85].mxu0  ;;  %v11652_v54 = vpop.f32.mrb[85].mxu1 }
0x38fe   :  { %v13445_v27 = vpop.f32.mrb[86].mxu1  ;;  %9398 = vrot.lane.b32.xlu1 %v13443_v60, %s12303_s3  ;;  %v13449_v55 = vpop.f32.mrb[86].mxu0  ;;  %11655 = vmatpush3.xpose.msk.msra.mxu0 %vm139_vm1, %v13443_v60 }
0x38ff   :  { %v13453_v56 = vpop.f32.mrb[87].mxu0  ;;  %v11653_v42 = vpop.f32.mrb[87].mxu1  ;;  %11664 = vmatprep.subr.mxu0 %v12301_v1 }
0x3900   :  { %9476 = vrot.lane.b32.xlu0 %v13453_v56, %s12303_s3  ;;  %11660 = vmatpush3.xpose.msk.msra.mxu1 %vm139_vm1, %v13453_v56 }
0x3901   :  { %11657 = vmatmul.mubr.msk.f32.vlgmr.msra.gmra.mrb[88].mxu0 %vm139_vm1, %v13439_v32  ;;  %11669 = vmatprep.subr.mxu1 %v12301_v1 }
0x3902   :  { %9396 = vrot.lane.b32.xlu1 %v13439_v32, %s12303_s3  ;;  %11666 = vmatprep.mubr.msk.f32.mxu0 %vm12302_vm0, %v12301_v1 }
0x3903   :  { %11662 = vmatmul.mubr.msk.f32.vlgmr.msra.gmra.mrb[88].mxu1 %vm139_vm1, %v13449_v55 }
0x3904   :  { %11671 = vmatprep.mubr.msk.f32.mxu1 %vm12302_vm0, %v12301_v1 }
0x3906   :  { %9474 = vrot.lane.b32.xlu1 %v13449_v55, %s12303_s3 }
0x3970   :  { %v9399_v11 = vpop.permute.xlu1 %9398 }
0x3971   :  { %11665 = vmatpush3.xpose.msk.msra.mxu0 %vm139_vm1, %v9399_v11 }
0x3972   :  { %v9477_v31 = vpop.permute.xlu0 %9476  ;;  %11674 = vmatprep.subr.mxu0 %v12301_v1 }
0x3973   :  { %11670 = vmatpush3.xpose.msk.msra.mxu1 %vm139_vm1, %v9477_v31 }
0x3974   :  { %v9397_v35 = vpop.permute.xlu1 %9396  ;;  %11679 = vmatprep.subr.mxu1 %v12301_v1 }
0x3975   :  { %11667 = vmatmul.mubr.msk.f32.vlgmr.msra.gmra.mrb[90].mxu0 %vm139_vm1, %v9397_v35 }
0x3976   :  { %11676 = vmatprep.mubr.msk.f32.mxu0 %vm12302_vm0, %v12301_v1 }
0x3978   :  { %v9475_v36 = vpop.permute.xlu1 %9474 }
0x3979   :  { %11672 = vmatmul.mubr.msk.f32.vlgmr.msra.gmra.mrb[90].mxu1 %vm139_vm1, %v9475_v36 }
0x397a   :  { %11681 = vmatprep.mubr.msk.f32.mxu1 %vm12302_vm0, %v12301_v1 }
0x39d4   :  { %v9294_v37 = vpop.f32.mrb[88].mxu0 }
0x39d5   :  { %v11658_v38 = vpop.f32.mrb[89].mxu0  ;;  %v9374_v46 = vsel %vm379_vm2, %v9294_v37, -inf }
0x39d6   :  { %v9370_v8 = vpop.f32.mrb[88].mxu1 }
0x39d7   :  { %v11663_v39 = vpop.f32.mrb[89].mxu1  ;;  %v9377_v51 = vsel %vm379_vm2, %v9370_v8, -inf }
0x3a48   :  { %v9470_v10 = vpop.f32.mrb[90].mxu0 }
0x3a49   :  { %v11668_v62 = vpop.f32.mrb[91].mxu0  ;;  %v9552_v17 = vsel %vm379_vm2, %v9470_v10, -inf }
0x3a4a   :  { %9553 = vmax.xlane.f32.xlu0 %v9552_v17 }
0x3a4c   :  { %v9548_v40 = vpop.f32.mrb[90].mxu1 }
0x3a4d   :  { %v11673_v41 = vpop.f32.mrb[91].mxu1  ;;  %v9555_v6 = vsel %vm379_vm2, %v9548_v40, -inf }
0x3a4e   :  { %9556 = vmax.xlane.f32.xlu1 %v9555_v6  ;;  %9375 = vmax.xlane.f32.xlu0 %v9374_v46 }
0x3a52   :  { %9378 = vmax.xlane.f32.xlu0 %v9377_v51 }
0x3a5f   :  { %9575 = vrot.lane.b32.xlu1 %v13441_v53, %s12303_s3 }
0x3ad7   :  { %v9554_v45 = vpop.xlane.xlu0 %9553 }
0x3ad8   :  { %v9558_v9 = vsub.f32 %v9470_v10, %v9554_v45 }
0x3ada   :  { %v9560_v16 = vmul.f32 1.442695, %v9558_v9 }
0x3adb   :  { %v9557_v58 = vpop.xlane.xlu1 %9556  ;;  %v9376_v59 = vpop.xlane.xlu0 %9375 }
0x3adc   :  { %v9380_v61 = vsub.f32 %v9294_v37, %v9376_v59  ;;  %v9559_v63 = vsub.f32 %v9548_v40, %v9557_v58 }
0x3ade   :  { %v9382_v0 = vmul.f32 1.442695, %v9380_v61  ;;  %v9562_v47 = vmul.f32 1.442695, %v9559_v63 }
0x3adf   :  { %v9576_v2 = vpop.permute.xlu1 %9575  ;;  %v9379_v29 = vpop.xlane.xlu0 %9378 }
0x3ae0   :  { %v9381_v3 = vsub.f32 %v9370_v8, %v9379_v29  ;;  %11675 = vmatpush3.msra.mxu0 %v9576_v2  ;;  %12118 = vpow2.f32 %v9382_v0 }
0x3ae1   :  { %11684 = vmatprep.subr.mxu0 %v12301_v1  ;;  %12120 = vpow2.f32 %v9560_v16 }
0x3ae2   :  { %v9384_v49 = vmul.f32 1.442695, %v9381_v3 }
0x3ae4   :  { %12122 = vpow2.f32 %v9384_v49 }
0x3ae5   :  { %12124 = vpow2.f32 %v9562_v47 }
0x3aea   :  { %v12119_v14 = vpop.eup %12118 }
0x3aeb   :  { %v9386_v50 = vsel %vm379_vm2, %v12119_v14, 0.0  ;;  %v12121_v4 = vpop.eup %12120 }
0x3aec   :  { %9387 = vadd.xlane.f32.xlu1 %v9386_v50  ;;  %v9564_v13 = vsel %vm379_vm2, %v12121_v4, 0.0 }
0x3aee   :  { %v12123_v57 = vpop.eup %12122 }
0x3aef   :  { %v9389_v5 = vsel %vm379_vm2, %v12123_v57, 0.0  ;;  %v12125_v7 = vpop.eup %12124 }
0x3af0   :  { %9390 = vadd.xlane.f32.xlu0 %v9389_v5  ;;  %9565 = vadd.xlane.f32.xlu1 %v9564_v13  ;;  %v9567_v33 = vsel %vm379_vm2, %v12125_v7, 0.0 }
0x3af4   :  { %9568 = vadd.xlane.f32.xlu0 %v9567_v33 }
0x3b01   :  { %9876 = vrot.lane.b32.xlu1 %v13443_v60, %s12304_s16 }
0x3b05   :  { %9954 = vrot.lane.b32.xlu1 %v13453_v56, %s12304_s16 }
0x3b09   :  { %9952 = vrot.lane.b32.xlu1 %v13449_v55, %s12304_s16 }
0x3b0a   :  { %9652 = vrot.lane.b32.xlu0 %v13445_v27, %s12303_s3 }
0x3b0e   :  { %9874 = vrot.lane.b32.xlu0 %v13439_v32, %s12304_s16 }
0x3b79   :  { %v9388_v34 = vpop.xlane.xlu1 %9387 }
0x3b7d   :  { %v9391_v15 = vpop.xlane.xlu0 %9390  ;;  %v9566_v30 = vpop.xlane.xlu1 %9565 }
0x3b7e   :  { %12126 = vrcp.f32 %v9566_v30 }
0x3b81   :  { %v9569_v18 = vpop.xlane.xlu0 %9568  ;;  %v9877_v12 = vpop.permute.xlu1 %9876 }
0x3b82   :  { %12128 = vrcp.f32 %v9569_v18 }
0x3b83   :  { %12130 = vrcp.f32 %v9388_v34 }
0x3b84   :  { %12132 = vrcp.f32 %v9391_v15 }
0x3b85   :  { %v9653_v19 = vpop.permute.xlu0 %9652  ;;  %v9955_v24 = vpop.permute.xlu1 %9954 }
0x3b86   :  { %11680 = vmatpush3.msra.mxu1 %v9653_v19 }
0x3b87   :  { %11689 = vmatprep.subr.mxu1 %v12301_v1 }
0x3b88   :  { %v12127_v20 = vpop.eup %12126 }
0x3b89   :  { %v9572_v21 = vmul.f32 %v12127_v20, %v12121_v4  ;;  %v9875_v54 = vpop.permute.xlu0 %9874  ;;  %v9953_v42 = vpop.permute.xlu1 %9952 }
0x3b8b   :  { %11677 = vmatmul.mubr.msk.f32.vlgmr.msra.gmra.mrb[92].mxu0 %vm379_vm2, %v9572_v21 }
0x3b8c   :  { %v12129_v22 = vpop.eup %12128  ;;  %11685 = vmatpush3.msra.mxu0 %v13441_v53  ;;  %11686 = vmatprep.mubr.msk.f32.mxu0 %vm12302_vm0, %v12301_v1 }
0x3b8d   :  { %v9573_v43 = vmul.f32 %v12129_v22, %v12125_v7  ;;  %11694 = vmatprep.subr.mxu0 %v12301_v1  ;;  %v12131_v44 = vpop.eup %12130 }
0x3b8e   :  { %v12133_v52 = vpop.eup %12132  ;;  %v9394_v23 = vmul.f32 %v12131_v44, %v12119_v14 }
0x3b8f   :  { %11682 = vmatmul.mubr.msk.f32.vlgmr.msra.gmra.mrb[92].mxu1 %vm379_vm2, %v9573_v43  ;;  %v9395_v48 = vmul.f32 %v12133_v52, %v12123_v57 }
0x3b90   :  { %11690 = vmatpush3.msra.mxu1 %v13445_v27  ;;  %11691 = vmatprep.mubr.msk.f32.mxu1 %vm12302_vm0, %v12301_v1 }
0x3b91   :  { %11699 = vmatprep.subr.mxu1 %v12301_v1 }
0x3b93   :  { %11687 = vmatmul.mubr.msk.f32.vlgmr.msra.gmra.mrb[92].mxu0 %vm379_vm2, %v9394_v23 }
0x3b94   :  { %11695 = vmatpush3.xpose.msk.msra.mxu0 %vm139_vm1, %v9877_v12  ;;  %11696 = vmatprep.mubr.msk.f32.mxu0 %vm12302_vm0, %v12301_v1 }
0x3b95   :  { %11704 = vmatprep.subr.mxu0 %v12301_v1 }
0x3b97   :  { %11692 = vmatmul.mubr.msk.f32.vlgmr.msra.gmra.mrb[92].mxu1 %vm379_vm2, %v9395_v48  ;;  %11697 = vmatmul.mubr.msk.f32.vlgmr.msra.gmra.mrb[94].mxu0 %vm139_vm1, %v9875_v54 }
0x3b98   :  { %11700 = vmatpush3.xpose.msk.msra.mxu1 %vm139_vm1, %v9955_v24  ;;  %11701 = vmatprep.mubr.msk.f32.mxu1 %vm12302_vm0, %v12301_v1 }
0x3b99   :  { %11709 = vmatprep.subr.mxu1 %v12301_v1  ;;  %11706 = vmatprep.mubr.msk.f32.mxu0 %vm12302_vm0, %v12301_v1 }
0x3b9b   :  { %11702 = vmatmul.mubr.msk.f32.vlgmr.msra.gmra.mrb[94].mxu1 %vm139_vm1, %v9953_v42 }
0x3b9c   :  { %11711 = vmatprep.mubr.msk.f32.mxu1 %vm12302_vm0, %v12301_v1 }
0x3c6a   :  { %v9948_v11 = vpop.f32.mrb[94].mxu0 }
0x3c6b   :  { %v11698_v31 = vpop.f32.mrb[95].mxu0  ;;  %v10030_v35 = vsel %vm379_vm2, %v9948_v11, -inf }
0x3c6c   :  { %10031 = vmax.xlane.f32.xlu0 %v10030_v35 }
0x3c6e   :  { %v10026_v36 = vpop.f32.mrb[94].mxu1 }
0x3c6f   :  { %v11703_v37 = vpop.f32.mrb[95].mxu1  ;;  %v10033_v38 = vsel %vm379_vm2, %v10026_v36, -inf }
0x3c70   :  { %10034 = vmax.xlane.f32.xlu1 %v10033_v38 }
0x3c81   :  { %10052 = vrot.lane.b32.xlu1 %v13441_v53, %s12304_s16 }
0x3c82   :  { %10128 = vrot.lane.b32.xlu0 %v13445_v27, %s12304_s16 }
0x3c85   :  { %10208 = vrot.lane.b32.xlu1 %v13443_v60, %s12305_s1 }
0x3c89   :  { %10286 = vrot.lane.b32.xlu1 %v13453_v56, %s12305_s1 }
0x3c8d   :  { %10284 = vrot.lane.b32.xlu1 %v13449_v55, %s12305_s1 }
0x3cf9   :  { %v10032_v8 = vpop.xlane.xlu0 %10031 }
0x3cfa   :  { %v10036_v39 = vsub.f32 %v9948_v11, %v10032_v8 }
0x3cfc   :  { %v10038_v10 = vmul.f32 1.442695, %v10036_v39 }
0x3cfd   :  { %v10035_v62 = vpop.xlane.xlu1 %10034  ;;  %v10129_v40 = vpop.permute.xlu0 %10128 }
0x3cfe   :  { %v10037_v17 = vsub.f32 %v10026_v36, %v10035_v62  ;;  %12134 = vpow2.f32 %v10038_v10  ;;  %11710 = vmatpush3.msra.mxu1 %v10129_v40 }
0x3cff   :  { %11719 = vmatprep.subr.mxu1 %v12301_v1 }
0x3d00   :  { %v10040_v41 = vmul.f32 1.442695, %v10037_v17 }
0x3d01   :  { %v10053_v6 = vpop.permute.xlu1 %10052 }
0x3d02   :  { %12136 = vpow2.f32 %v10040_v41  ;;  %11705 = vmatpush3.msra.mxu0 %v10053_v6 }
0x3d03   :  { %11714 = vmatprep.subr.mxu0 %v12301_v1 }
0x3d05   :  { %v10209_v9 = vpop.permute.xlu1 %10208 }
0x3d08   :  { %v12135_v60 = vpop.eup %12134 }
0x3d09   :  { %v10042_v56 = vsel %vm379_vm2, %v12135_v60, 0.0  ;;  %v10287_v63 = vpop.permute.xlu1 %10286 }
0x3d0a   :  { %10043 = vadd.xlane.f32.xlu0 %v10042_v56 }
0x3d0c   :  { %v12137_v55 = vpop.eup %12136 }
0x3d0d   :  { %v10045_v46 = vsel %vm379_vm2, %v12137_v55, 0.0  ;;  %v10285_v16 = vpop.permute.xlu1 %10284 }
0x3d0e   :  { %10046 = vadd.xlane.f32.xlu0 %v10045_v46 }
0x3d24   :  { %10206 = vrot.lane.b32.xlu0 %v13439_v32, %s12305_s1 }
0x3d97   :  { %v10044_v51 = vpop.xlane.xlu0 %10043 }
0x3d98   :  { %12138 = vrcp.f32 %v10044_v51 }
0x3d9b   :  { %v10047_v45 = vpop.xlane.xlu0 %10046 }
0x3d9c   :  { %12140 = vrcp.f32 %v10047_v45 }
0x3d9f   :  { %v10207_v32 = vpop.permute.xlu0 %10206 }
0x3da2   :  { %v12139_v58 = vpop.eup %12138 }
0x3da3   :  { %v10050_v59 = vmul.f32 %v12139_v58, %v12135_v60 }
0x3da5   :  { %11707 = vmatmul.mubr.msk.f32.vlgmr.msra.gmra.mrb[92].mxu0 %vm379_vm2, %v10050_v59 }
0x3da6   :  { %v12141_v61 = vpop.eup %12140  ;;  %11715 = vmatpush3.xpose.msk.msra.mxu0 %vm139_vm1, %v10209_v9  ;;  %11716 = vmatprep.mubr.msk.f32.mxu0 %vm12302_vm0, %v12301_v1 }
0x3da7   :  { %v10051_v0 = vmul.f32 %v12141_v61, %v12137_v55  ;;  %11724 = vmatprep.subr.mxu0 %v12301_v1 }
0x3da9   :  { %11712 = vmatmul.mubr.msk.f32.vlgmr.msra.gmra.mrb[92].mxu1 %vm379_vm2, %v10051_v0  ;;  %11717 = vmatmul.mubr.msk.f32.vlgmr.msra.gmra.mrb[96].mxu0 %vm139_vm1, %v10207_v32 }
0x3daa   :  { %11720 = vmatpush3.xpose.msk.msra.mxu1 %vm139_vm1, %v10287_v63  ;;  %11721 = vmatprep.mubr.msk.f32.mxu1 %vm12302_vm0, %v12301_v1 }
0x3dab   :  { %11729 = vmatprep.subr.mxu1 %v12301_v1  ;;  %11726 = vmatprep.mubr.msk.f32.mxu0 %vm12302_vm0, %v12301_v1 }
0x3dad   :  { %11722 = vmatmul.mubr.msk.f32.vlgmr.msra.gmra.mrb[96].mxu1 %vm139_vm1, %v10285_v16 }
0x3dae   :  { %11731 = vmatprep.mubr.msk.f32.mxu1 %vm12302_vm0, %v12301_v1 }
0x3e7c   :  { %v10280_v2 = vpop.f32.mrb[96].mxu0 }
0x3e7d   :  { %v11718_v29 = vpop.f32.mrb[97].mxu0  ;;  %v10362_v3 = vsel %vm379_vm2, %v10280_v2, -inf }
0x3e7e   :  { %10363 = vmax.xlane.f32.xlu0 %v10362_v3 }
0x3e80   :  { %v10358_v47 = vpop.f32.mrb[96].mxu1 }
0x3e81   :  { %v11723_v49 = vpop.f32.mrb[97].mxu1  ;;  %v10365_v14 = vsel %vm379_vm2, %v10358_v47, -inf }
0x3e82   :  { %10366 = vmax.xlane.f32.xlu1 %v10365_v14 }
0x3e93   :  { %10384 = vrot.lane.b32.xlu1 %v13441_v53, %s12305_s1 }
0x3f0b   :  { %v10364_v50 = vpop.xlane.xlu0 %10363 }
0x3f0c   :  { %v10368_v4 = vsub.f32 %v10280_v2, %v10364_v50 }
0x3f0e   :  { %v10370_v57 = vmul.f32 1.442695, %v10368_v4 }
0x3f0f   :  { %v10367_v5 = vpop.xlane.xlu1 %10366 }
0x3f10   :  { %12142 = vpow2.f32 %v10370_v57  ;;  %v10369_v7 = vsub.f32 %v10358_v47, %v10367_v5 }
0x3f12   :  { %v10372_v1 = vmul.f32 1.442695, %v10369_v7 }
0x3f13   :  { %v10385_v13 = vpop.permute.xlu1 %10384 }
0x3f14   :  { %12144 = vpow2.f32 %v10372_v1  ;;  %11725 = vmatpush3.msra.mxu0 %v10385_v13 }
0x3f1a   :  { %v12143_v33 = vpop.eup %12142 }
0x3f1b   :  { %v10374_v34 = vsel %vm379_vm2, %v12143_v33, 0.0 }
0x3f1c   :  { %10375 = vadd.xlane.f32.xlu0 %v10374_v34 }
0x3f1e   :  { %v12145_v15 = vpop.eup %12144 }
0x3f1f   :  { %v10377_v30 = vsel %vm379_vm2, %v12145_v15, 0.0 }
0x3f20   :  { %10378 = vadd.xlane.f32.xlu0 %v10377_v30 }
0x3f36   :  { %10460 = vrot.lane.b32.xlu0 %v13445_v27, %s12305_s1 }
0x3fa9   :  { %v10376_v53 = vpop.xlane.xlu0 %10375 }
0x3faa   :  { %12146 = vrcp.f32 %v10376_v53 }
0x3fad   :  { %v10379_v18 = vpop.xlane.xlu0 %10378 }
0x3fae   :  { %12148 = vrcp.f32 %v10379_v18 }
0x3fb1   :  { %v10461_v19 = vpop.permute.xlu0 %10460 }
0x3fb2   :  { %11730 = vmatpush3.msra.mxu1 %v10461_v19 }
0x3fb4   :  { %v12147_v20 = vpop.eup %12146 }
0x3fb5   :  { %v10382_v21 = vmul.f32 %v12147_v20, %v12143_v33 }
0x3fb7   :  { %11727 = vmatmul.mubr.msk.f32.vlgmr.msra.gmra.mrb[92].mxu0 %vm379_vm2, %v10382_v21 }
0x3fb8   :  { %v12149_v22 = vpop.eup %12148 }
0x3fb9   :  { %v10383_v43 = vmul.f32 %v12149_v22, %v12145_v15 }
0x3fbb   :  { %11732 = vmatmul.mubr.msk.f32.vlgmr.msra.gmra.mrb[92].mxu1 %vm379_vm2, %v10383_v43 }
0x408a   :  { %v10456_v12 = vpop.f32.mrb[92].mxu0 }
0x408b   :  { %v11728_v44 = vpop.f32.mrb[93].mxu0  ;;  %v10538_v52 = vsel %vm139_vm1, %v10456_v12, 0.0 }
0x408c   :  { %10539 = vadd.xlane.f32.xlu1 %v10538_v52 }
0x408e   :  { %v10532_v27 = vpop.f32.mrb[92].mxu1 }
0x408f   :  { %v11733_v23 = vpop.f32.mrb[93].mxu1  ;;  %v10541_v24 = vsel %vm139_vm1, %v10532_v27, 0.0 }
0x4090   :  { %10542 = vadd.xlane.f32.xlu0 %v10541_v24  ;;  %4599 = vadd.xlane.f32.xlu1 %v12942_v28 }
0x4119   :  { %v10540_v48 = vpop.xlane.xlu1 %10539 }
0x411a   :  { %v10544_v54 = vmul.f32 0.03125, %v10540_v48 }
0x411c   :  { %v10546_v42 = vsub.f32 %v10456_v12, %v10544_v54 }
0x411d   :  { %v10543_v11 = vpop.xlane.xlu0 %10542  ;;  %v4600_v31 = vpop.xlane.xlu1 %4599 }
0x411e   :  { %v10545_v35 = vmul.f32 0.03125, %v10543_v11  ;;  %v4601_v36 = vrot.slane %v4600_v31, 4  ;;  %v10548_v37 = vmul.f32 %v10546_v42, %v10546_v42 }
0x4120   :  { %v10547_v38 = vsub.f32 %v10532_v27, %v10545_v35  ;;  %v4602_v8 = vadd.f32 %v4601_v36, %v4600_v31  ;;  %v10550_v39 = vsel %vm139_vm1, %v10548_v37, 0.0 }
0x4121   :  { %10551 = vadd.xlane.f32.xlu0 %v10550_v39 }
0x4122   :  { %v4603_v10 = vrot.slane %v4602_v8, 2  ;;  %v10549_v62 = vmul.f32 %v10547_v38, %v10547_v38 }
0x4124   :  { %v10553_v17 = vsel %vm139_vm1, %v10549_v62, 0.0  ;;  %v4604_v40 = vadd.f32 %v4603_v10, %v4602_v8 }
0x4125   :  { %10554 = vadd.xlane.f32.xlu1 %v10553_v17 }
0x4126   :  { %v4605_v28 = vrot.slane %v4604_v40, 1 }
0x4128   :  { %v4606_v41 = vadd.f32 %v4605_v28, %v4604_v40 }
0x412a   :  { %11818 = vpush %v4606_v41 }
0x415b   :  { %s11819_s6 = spop %11818 }
0x415c   :  { %s4608_s0 = smul.f32 0.001953125, %s11819_s6 }
0x415e   :  { %s4609_s20 = smul.f32 -0.5, %s4608_s0 }
0x4160   :  { %10597 = sst [smem:[#allocation12]] %s4609_s20 }
0x4161   :  { %12259 = shalt.err (!%p12256_p6)
}
0x4162   :  { %s12306_s10 = smov [#allocation12]   ;;  %v10869_v9 = vld [vmem:[#allocation6 + $0x5] ss:$0 sm:$0xff]  ;;  %v10870_v59 = vld [vmem:[#allocation8 + $0x5] ss:$0 sm:$0xff] }
0x4163   :  { %10617 = dma.smem_to_hbm %s12306_s10, 16, %s13616_s8, [#allocation5]  }
0x4164   :  { %s12307_s8 = smov [#allocation11]  }
0x4165   :  { %s10603_s15 = sshll.u32 %s12307_s8, 4  ;;  %s10604_s15 = int_to_ptr.vmem [resolvable:$true] %s10603_s15 }
0x4166   :  { %s12260_s3 = scalar_lea.vmem %s10604_s15, 256  ;;  %p12265_p8 = scmp.lt.s32.totalorder %s10604_s15, %s10604_s15 }
0x4167   :  { %p12261_p7 = scmp.ne.s32.totalorder %s10604_s15, %s12260_s3  ;;  %p12266_p9 = scmp.lt.s32.totalorder %s12260_s3, %s12260_s3 }
0x4169   :  { %p12267_p10 = por %p12266_p9, %p12265_p8 }
0x416b   :  { %p12268_p11 = pnand %p12267_p10, %p12261_p7 }
0x41ae   :  { %v10552_v6 = vpop.xlane.xlu0 %10551 }
0x41af   :  { %v10556_v60 = vmul.f32 0.03125, %v10552_v6 }
0x41b1   :  { %v10558_v56 = vadd.f32 1e-05, %v10556_v60 }
0x41b2   :  { %v10555_v55 = vpop.xlane.xlu1 %10554 }
0x41b3   :  { %12150 = vrsqrt.f32 %v10558_v56  ;;  %v10557_v46 = vmul.f32 0.03125, %v10555_v55 }
0x41b5   :  { %v10559_v51 = vadd.f32 1e-05, %v10557_v46 }
0x41b7   :  { %12152 = vrsqrt.f32 %v10559_v51 }
0x41bd   :  { %v12151_v45 = vpop.eup %12150 }
0x41be   :  { %v10562_v58 = vmul.f32 %v12151_v45, %v10546_v42 }
0x41c0   :  { %v10570_v61 = vmul.f32 %v10869_v9, %v10562_v58 }
0x41c1   :  { %v12153_v63 = vpop.eup %12152 }
0x41c2   :  { %v10578_v0 = vadd.f32 %v10870_v59, %v10570_v61  ;;  %v10563_v32 = vmul.f32 %v12153_v63, %v10547_v38 }
0x41c4   :  { %v10580_v16 = vadd.f32 %v10578_v0, %v13426_v25  ;;  %v10571_v2 = vmul.f32 %v10869_v9, %v10563_v32 }
0x41c6   :  { %v10871_v29 = vmul.f32 -1.442695, %v10580_v16  ;;  %v10579_v3 = vadd.f32 %v10870_v59, %v10571_v2 }
0x41c8   :  { %12154 = vpow2.f32 %v10871_v29  ;;  %v10581_v47 = vadd.f32 %v10579_v3, %v13429_v26 }
0x41ca   :  { %v10872_v49 = vmul.f32 -1.442695, %v10581_v47 }
0x41cc   :  { %12156 = vpow2.f32 %v10872_v49 }
0x41d2   :  { %v12155_v14 = vpop.eup %12154 }
0x41d3   :  { %v10588_v50 = vadd.f32 1.0, %v12155_v14 }
0x41d5   :  { %12158 = vrcp.f32 %v10588_v50 }
0x41d6   :  { %v12157_v4 = vpop.eup %12156 }
0x41d7   :  { %v10589_v57 = vadd.f32 1.0, %v12157_v4 }
0x41d9   :  { %12160 = vrcp.f32 %v10589_v57 }
0x41df   :  { %v12159_v5 = vpop.eup %12158 }
0x41e0   :  { %10594 = vst.msk [vmem:[#allocation11] sm:$0xff] %vm139_vm1, %v12159_v5 }
0x41e3   :  { %v12161_v25 = vpop.eup %12160 }
0x41e4   :  { %10595 = vst.msk [vmem:[#allocation11 + $0x8] sm:$0xff] %vm139_vm1, %v12161_v25 }
0x41e5   :  { %12271 = shalt.err (!%p12268_p11)
}
0x41e6   :  { %s12272_s28 = scalar_lea.hbm %s13615_s7, 256 }
0x41e7   :  { %p12273_p12 = scmp.ne.s32.totalorder %s13615_s7, %s12272_s28  ;;  %p12276_p13 = scmp.lt.u32.totalorder %s12272_s28, %s13615_s7 }
0x41e9   :  { %p12278_p0 = pnand %p12276_p13, %p12273_p12 }
0x41eb   :  { %12281 = shalt.err (!%p12278_p0)
}
0x41ec   :  { %s12308_s18 = smov 128   ;;  %s12309_s19 = smov 8  }
0x41ed   :  { %10609 = dma.vmem_to_hbm [thread:$0]  %s10604_s15, 256, %s13615_s7, [#allocation4], %s12308_s18, %s12308_s18, %s12309_s19  }
0x41ee   :  { %12288 = dma.done.wait [#allocation4], 256  }
0x41ef   :  { %12289 = vsyncadd [#allocation4], 4294967040 }
0x41f0   :  { %12290 = dma.done.wait [#allocation5], 16  }
0x41f1   :  { %12291 = vsyncadd [#allocation5], 4294967280 }
0x41f2   :  { %10624 = sfence }
0x41f3   :  { %10625 = vsyncpa [#allocation3], 1 }
0x41f4   :  { %10626 = vsyncpa [#allocation7], 1 }
0x41f5   :  { %10627 = vsyncpa [#allocation10], 1 }
0x41f6   :  { %10628 = vsyncpa [#allocation4], 1 }
0x41f7   :  { %10629 = vsyncpa [#allocation5], 1 }

</bundles_post_ra>
